<compile_context>
chip_gen: v6e
topology: v6e:2x2x1
jax: 0.10.0
libtpu: 0.0.40
codegen_flags: <defaults>
</compile_context>

<pallas_src>
import jax
import jax.numpy as jnp
from jax.experimental import pallas as pl
from jax.experimental.pallas import tpu as pltpu


# ------------------------------------------------------------------------------------ kernel
def _lenet_kernel(x_ref, g1_ref, b1_ref, sc1_ref, sr1_ref,
                  g2_ref, b2_ref, sc2_ref, sr2_ref,
                  w1_ref, fb1_ref, w2_ref, fb2_ref, w3_ref, fb3_ref,
                  o_ref):
    """Whole LeNet forward for one image (one grid step).

    Activation layout: spatial W on sublanes, (channel, H) stacked on lanes.
      conv1+relu : c1[w, co*28 + h]   (28, 168)
      pool1      : p1[w, co*14 + h]   (14,  84)
      conv2+relu : c2[w, k*10  + h]   (10, 160)
      pool2      : p2[w, k*5   + h]   ( 5,  80)
      fc         : row vectors (1,120) -> (1,84) -> (1,128 zero-padded)
    """
    f32 = jnp.float32
    xt = x_ref[0]                                     # (30, 30) padded image, stored as (w, h)

    # ---- conv1 3x3 (pad=1) + bias + ReLU:  c1 = sum_t X_t @ (w1_t ⊗ I28) -----------------
    c1 = jnp.zeros((28, 168), f32)
    for i in range(3):
        for j in range(3):
            c1 = c1 + jnp.dot(xt[j:j + 28, i:i + 28], g1_ref[i * 3 + j],
                              preferred_element_type=f32)
    c1 = jnp.maximum(c1 + b1_ref[...], 0.0)

    # ---- maxpool 2x2 (pairwise max + exact 0/1 selection matmuls) --------------------------
    m = jnp.maximum(c1[0:27, :], c1[1:28, :])                        # pair-max along W (27,168)
    m = jnp.maximum(m[:, 0:167], m[:, 1:168])                        # pair-max along H (27,167)
    p1 = jnp.dot(sc1_ref[...], m, preferred_element_type=f32)        # keep even W  -> (14,167)
    p1 = jnp.dot(p1, sr1_ref[...], preferred_element_type=f32)       # keep even H  -> (14, 84)

    # ---- conv2 5x5 (valid) + bias + ReLU ----------------------------------------------------
    c2 = jnp.zeros((10, 160), f32)
    for i in range(5):
        for j in range(5):
            c2 = c2 + jnp.dot(p1[j:j + 10, i:i + 80], g2_ref[i * 5 + j],
                              preferred_element_type=f32)
    c2 = jnp.maximum(c2 + b2_ref[...], 0.0)

    # ---- maxpool 2x2 ------------------------------------------------------------------------
    m2 = jnp.maximum(c2[0:9, :], c2[1:10, :])                        # (9, 160)
    m2 = jnp.maximum(m2[:, 0:159], m2[:, 1:160])                     # (9, 159)
    p2 = jnp.dot(sc2_ref[...], m2, preferred_element_type=f32)       # (5, 159)
    p2 = jnp.dot(p2, sr2_ref[...], preferred_element_type=f32)       # (5, 80)

    # ---- fc stack (Linear 400->120->84->10, no activations, per the module) -----------------
    h = fb1_ref[...]                                                 # (1, 120)
    for b in range(5):
        h = h + jnp.dot(p2[b:b + 1, :], w1_ref[b], preferred_element_type=f32)
    h = jnp.dot(h, w2_ref[...], preferred_element_type=f32) + fb2_ref[...]     # (1, 84)
    h = jnp.dot(h, w3_ref[...], preferred_element_type=f32) + fb3_ref[...]     # (1, 128)
    o_ref[0] = h                                                     # lane-dense 128-wide store


# --------------------------------------------------------------------------------- wrappers
def _const_spec(arr):
    """Full-array VMEM block, reused unchanged every grid step."""
    zeros = (0,) * arr.ndim
    return pl.BlockSpec(arr.shape, lambda b, _z=zeros: _z)


@jax.jit
def lenet_forward(x, packed):
    """x: (B, 1, 28, 28) float32  ->  logits (B, 10).  `packed` = pack_params(init_params(...))."""
    B = x.shape[0]
    # Only input-side glue: pad (conv1 padding=1) and present each image as (W, H) once.
    xt = jnp.transpose(jnp.pad(x[:, 0].astype(jnp.float32),
                               ((0, 0), (1, 1), (1, 1))), (0, 2, 1))        # (B, 30, 30)

    operands = (xt, packed["g1"], packed["b1"], packed["sc1"], packed["sr1"],
                packed["g2"], packed["b2"], packed["sc2"], packed["sr2"],
                packed["w1"], packed["fb1"], packed["w2"], packed["fb2"],
                packed["w3"], packed["fb3"])

    in_specs = [pl.BlockSpec((1, 30, 30), lambda b: (b, 0, 0))]
    in_specs += [_const_spec(op) for op in operands[1:]]

    out = pl.pallas_call(
        _lenet_kernel,
        out_shape=jax.ShapeDtypeStruct((B, 1, 128), jnp.float32),
        grid_spec=pltpu.PrefetchScalarGridSpec(
            num_scalar_prefetch=0,
            grid=(B,),
            in_specs=in_specs,
            out_specs=pl.BlockSpec((1, 1, 128), lambda b: (b, 0, 0)),
        ),
        compiler_params=pltpu.CompilerParams(
            dimension_semantics=("parallel",)),
    )(*operands)
    return out[:, 0, :10]


# ------------------------------------------------------------------------------------ params
def init_params(key):
    """PyTorch-layout parameters of LeNetPytorch."""
    ks = jax.random.split(key, 10)
    s = 0.1
    return {
        "cw1": s * jax.random.normal(ks[0], (6, 1, 3, 3), jnp.float32),
        "cb1": s * jax.random.normal(ks[1], (6,), jnp.float32),
        "cw2": s * jax.random.normal(ks[2], (16, 6, 5, 5), jnp.float32),
        "cb2": s * jax.random.normal(ks[3], (16,), jnp.float32),
        "fw1": s * jax.random.normal(ks[4], (120, 400), jnp.float32),
        "fb1": s * jax.random.normal(ks[5], (120,), jnp.float32),
        "fw2": s * jax.random.normal(ks[6], (84, 120), jnp.float32),
        "fb2": s * jax.random.normal(ks[7], (84,), jnp.float32),
        "fw3": s * jax.random.normal(ks[8], (10, 84), jnp.float32),
        "fb3": s * jax.random.normal(ks[9], (10,), jnp.float32),
    }


def pack_params(p):
    """One-time repack of the PyTorch weights into the kernel's VMEM layouts (hoisted out of jit)."""
    f32 = jnp.float32
    cw1, cb1 = p["cw1"].astype(f32), p["cb1"].astype(f32)
    cw2, cb2 = p["cw2"].astype(f32), p["cb2"].astype(f32)
    fw1, fb1 = p["fw1"].astype(f32), p["fb1"].astype(f32)
    fw2, fb2 = p["fw2"].astype(f32), p["fb2"].astype(f32)
    fw3, fb3 = p["fw3"].astype(f32), p["fb3"].astype(f32)

    # conv weights expanded to "channel-stacked" form: per tap, (w_tap ⊗ I) so a single matmul
    # produces all output channels stacked along the lane axis.
    eye28 = jnp.eye(28, dtype=f32)
    g1 = jnp.stack([jnp.kron(cw1[:, 0, i, j][:, None], eye28).T           # (28, 168)
                    for i in range(3) for j in range(3)])                 # (9, 28, 168)
    eye10_14 = jnp.eye(10, 14, dtype=f32)
    g2 = jnp.stack([jnp.kron(cw2[:, :, i, j], eye10_14)[:, :80].T         # (80, 160)
                    for i in range(5) for j in range(5)])                 # (25, 80, 160)

    # 0/1 selection matrices implementing the stride-2 downsample of MaxPool(2,2) (exact).
    sc1 = (jnp.arange(27)[None, :] == 2 * jnp.arange(14)[:, None]).astype(f32)          # (14, 27)
    q1 = jnp.arange(84)
    sr1 = (jnp.arange(167)[:, None] ==
           ((q1 // 14) * 28 + (q1 % 14) * 2)[None, :]).astype(f32)                      # (167, 84)
    sc2 = (jnp.arange(9)[None, :] == 2 * jnp.arange(5)[:, None]).astype(f32)            # (5, 9)
    q2 = jnp.arange(80)
    sr2 = (jnp.arange(159)[:, None] ==
           ((q2 // 5) * 10 + (q2 % 5) * 2)[None, :]).astype(f32)                        # (159, 80)

    # FC weights pre-transposed / re-laid-out; last layer zero-padded to 128 lanes.
    w1 = jnp.transpose(fw1.reshape(120, 80, 5), (2, 1, 0))                # (5, 80, 120)
    w3 = jnp.zeros((84, 128), f32).at[:, :10].set(fw3.T)                  # (84, 128)
    fb3p = jnp.zeros((1, 128), f32).at[0, :10].set(fb3)

    return {
        "g1": g1, "b1": jnp.repeat(cb1, 28)[None, :],      # (1, 168)
        "sc1": sc1, "sr1": sr1,
        "g2": g2, "b2": jnp.repeat(cb2, 10)[None, :],      # (1, 160)
        "sc2": sc2, "sr2": sr2,
        "w1": w1, "fb1": fb1[None, :],
        "w2": fw2.T, "fb2": fb2[None, :],
        "w3": w3, "fb3": fb3p,
    }


# --------------------------------------------------------------------- pure-JAX reference
def lenet_reference(x, p):
    h = jax.lax.conv_general_dilated(x, p["cw1"], (1, 1), ((1, 1), (1, 1)),
                                     dimension_numbers=("NCHW", "OIHW", "NCHW"))
    h = jax.nn.relu(h + p["cb1"][None, :, None, None])
    h = jax.lax.reduce_window(h, -jnp.inf, jax.lax.max, (1, 1, 2, 2), (1, 1, 2, 2), "VALID")
    h = jax.lax.conv_general_dilated(h, p["cw2"], (1, 1), ((0, 0), (0, 0)),
                                     dimension_numbers=("NCHW", "OIHW", "NCHW"))
    h = jax.nn.relu(h + p["cb2"][None, :, None, None])
    h = jax.lax.reduce_window(h, -jnp.inf, jax.lax.max, (1, 1, 2, 2), (1, 1, 2, 2), "VALID")
    h = h.reshape(h.shape[0], -1)
    h = h @ p["fw1"].T + p["fb1"]
    h = h @ p["fw2"].T + p["fb2"]
    h = h @ p["fw3"].T + p["fb3"]
    return h


if __name__ == "__main__":
    key = jax.random.PRNGKey(0)
    pkey, xkey = jax.random.split(key)
    params = init_params(pkey)
    packed = pack_params(params)            # one-time weight repack, outside the jitted forward
    # LeNet geometry (Linear(400) after two pools) forces 1x28x28 inputs.
    x = jax.random.normal(xkey, (2, 1, 28, 28), jnp.float32)

    out = jax.block_until_ready(lenet_forward(x, packed))
    assert out.shape == (2, 10)
    assert bool(jnp.all(jnp.isfinite(out)))

    ref = lenet_reference(x, params)
    assert bool(jnp.allclose(out, ref, rtol=5e-2, atol=5e-2)), (
        f"max abs err {float(jnp.max(jnp.abs(out - ref)))}")
    print("KERNEL_OK")
</pallas_src>

<mosaic_0001>
module attributes {stable_mosaic.version = 11 : i64} {
  func.func @_lenet_kernel(%arg0: i32, %arg1: memref<1x30x30xf32, #tpu.memory_space<vmem>>, %arg2: memref<9x28x168xf32, #tpu.memory_space<vmem>>, %arg3: memref<1x168xf32, #tpu.memory_space<vmem>>, %arg4: memref<14x27xf32, #tpu.memory_space<vmem>>, %arg5: memref<167x84xf32, #tpu.memory_space<vmem>>, %arg6: memref<25x80x160xf32, #tpu.memory_space<vmem>>, %arg7: memref<1x160xf32, #tpu.memory_space<vmem>>, %arg8: memref<5x9xf32, #tpu.memory_space<vmem>>, %arg9: memref<159x80xf32, #tpu.memory_space<vmem>>, %arg10: memref<5x80x120xf32, #tpu.memory_space<vmem>>, %arg11: memref<1x120xf32, #tpu.memory_space<vmem>>, %arg12: memref<120x84xf32, #tpu.memory_space<vmem>>, %arg13: memref<1x84xf32, #tpu.memory_space<vmem>>, %arg14: memref<84x128xf32, #tpu.memory_space<vmem>>, %arg15: memref<1x128xf32, #tpu.memory_space<vmem>>, %arg16: memref<1x1x128xf32, #tpu.memory_space<vmem>>) attributes {dimension_semantics = [#tpu.dimension_semantics<parallel>], iteration_bounds = array<i64: 2>, scalar_prefetch = 0 : i64, scratch_operands = 0 : i64, tpu.core_type = #tpu.core_type<tc>, window_params = [{transform_indices = @transform_0, window_bounds = array<i64: 1, 30, 30>}, {pipeline_mode = #tpu.pipeline_mode<synchronous>, transform_indices = @transform_1, window_bounds = array<i64: 9, 28, 168>}, {pipeline_mode = #tpu.pipeline_mode<synchronous>, transform_indices = @transform_2, window_bounds = array<i64: 1, 168>}, {pipeline_mode = #tpu.pipeline_mode<synchronous>, transform_indices = @transform_3, window_bounds = array<i64: 14, 27>}, {pipeline_mode = #tpu.pipeline_mode<synchronous>, transform_indices = @transform_4, window_bounds = array<i64: 167, 84>}, {pipeline_mode = #tpu.pipeline_mode<synchronous>, transform_indices = @transform_5, window_bounds = array<i64: 25, 80, 160>}, {pipeline_mode = #tpu.pipeline_mode<synchronous>, transform_indices = @transform_6, window_bounds = array<i64: 1, 160>}, {pipeline_mode = #tpu.pipeline_mode<synchronous>, transform_indices = @transform_7, window_bounds = array<i64: 5, 9>}, {pipeline_mode = #tpu.pipeline_mode<synchronous>, transform_indices = @transform_8, window_bounds = array<i64: 159, 80>}, {pipeline_mode = #tpu.pipeline_mode<synchronous>, transform_indices = @transform_9, window_bounds = array<i64: 5, 80, 120>}, {pipeline_mode = #tpu.pipeline_mode<synchronous>, transform_indices = @transform_10, window_bounds = array<i64: 1, 120>}, {pipeline_mode = #tpu.pipeline_mode<synchronous>, transform_indices = @transform_11, window_bounds = array<i64: 120, 84>}, {pipeline_mode = #tpu.pipeline_mode<synchronous>, transform_indices = @transform_12, window_bounds = array<i64: 1, 84>}, {pipeline_mode = #tpu.pipeline_mode<synchronous>, transform_indices = @transform_13, window_bounds = array<i64: 84, 128>}, {pipeline_mode = #tpu.pipeline_mode<synchronous>, transform_indices = @transform_14, window_bounds = array<i64: 1, 128>}, {transform_indices = @transform_15, window_bounds = array<i64: 1, 1, 128>}]} {
    %c0 = arith.constant 0 : index
    %c0_0 = arith.constant 0 : index
    %c0_1 = arith.constant 0 : index
    %0 = vector.load %arg1[%c0, %c0_0, %c0_1] : memref<1x30x30xf32, #tpu.memory_space<vmem>>, vector<1x30x30xf32>
    %1 = vector.shape_cast %0 : vector<1x30x30xf32> to vector<30x30xf32>
    %cst = arith.constant 0.000000e+00 : f32
    %2 = vector.broadcast %cst : f32 to vector<28x168xf32>
    %3 = vector.extract_strided_slice %1 {offsets = [0, 0], sizes = [28, 28], strides = [1, 1]} : vector<30x30xf32> to vector<28x28xf32>
    %c0_2 = arith.constant 0 : index
    %c0_3 = arith.constant 0 : index
    %c0_4 = arith.constant 0 : index
    %4 = vector.load %arg2[%c0_2, %c0_3, %c0_4] : memref<9x28x168xf32, #tpu.memory_space<vmem>>, vector<1x28x168xf32>
    %5 = vector.shape_cast %4 : vector<1x28x168xf32> to vector<28x168xf32>
    %cst_5 = arith.constant dense<0.000000e+00> : vector<28x168xf32>
    %6 = tpu.matmul %3, %5, %cst_5 {dimension_numbers = #tpu.dot_dimension_numbers<[1], [0], [0], [1], [0, 0, 1, 1], [], []>} : vector<28x28xf32>, vector<28x168xf32>, vector<28x168xf32> -> vector<28x168xf32>
    %7 = arith.addf %2, %6 : vector<28x168xf32>
    %8 = vector.extract_strided_slice %1 {offsets = [1, 0], sizes = [28, 28], strides = [1, 1]} : vector<30x30xf32> to vector<28x28xf32>
    %c1 = arith.constant 1 : index
    %c0_6 = arith.constant 0 : index
    %c0_7 = arith.constant 0 : index
    %9 = vector.load %arg2[%c1, %c0_6, %c0_7] : memref<9x28x168xf32, #tpu.memory_space<vmem>>, vector<1x28x168xf32>
    %10 = vector.shape_cast %9 : vector<1x28x168xf32> to vector<28x168xf32>
    %cst_8 = arith.constant dense<0.000000e+00> : vector<28x168xf32>
    %11 = tpu.matmul %8, %10, %cst_8 {dimension_numbers = #tpu.dot_dimension_numbers<[1], [0], [0], [1], [0, 0, 1, 1], [], []>} : vector<28x28xf32>, vector<28x168xf32>, vector<28x168xf32> -> vector<28x168xf32>
    %12 = arith.addf %7, %11 : vector<28x168xf32>
    %13 = vector.extract_strided_slice %1 {offsets = [2, 0], sizes = [28, 28], strides = [1, 1]} : vector<30x30xf32> to vector<28x28xf32>
    %c2 = arith.constant 2 : index
    %c0_9 = arith.constant 0 : index
    %c0_10 = arith.constant 0 : index
    %14 = vector.load %arg2[%c2, %c0_9, %c0_10] : memref<9x28x168xf32, #tpu.memory_space<vmem>>, vector<1x28x168xf32>
    %15 = vector.shape_cast %14 : vector<1x28x168xf32> to vector<28x168xf32>
    %cst_11 = arith.constant dense<0.000000e+00> : vector<28x168xf32>
    %16 = tpu.matmul %13, %15, %cst_11 {dimension_numbers = #tpu.dot_dimension_numbers<[1], [0], [0], [1], [0, 0, 1, 1], [], []>} : vector<28x28xf32>, vector<28x168xf32>, vector<28x168xf32> -> vector<28x168xf32>
    %17 = arith.addf %12, %16 : vector<28x168xf32>
    %18 = vector.extract_strided_slice %1 {offsets = [0, 1], sizes = [28, 28], strides = [1, 1]} : vector<30x30xf32> to vector<28x28xf32>
    %c3 = arith.constant 3 : index
    %c0_12 = arith.constant 0 : index
    %c0_13 = arith.constant 0 : index
    %19 = vector.load %arg2[%c3, %c0_12, %c0_13] : memref<9x28x168xf32, #tpu.memory_space<vmem>>, vector<1x28x168xf32>
    %20 = vector.shape_cast %19 : vector<1x28x168xf32> to vector<28x168xf32>
    %cst_14 = arith.constant dense<0.000000e+00> : vector<28x168xf32>
    %21 = tpu.matmul %18, %20, %cst_14 {dimension_numbers = #tpu.dot_dimension_numbers<[1], [0], [0], [1], [0, 0, 1, 1], [], []>} : vector<28x28xf32>, vector<28x168xf32>, vector<28x168xf32> -> vector<28x168xf32>
    %22 = arith.addf %17, %21 : vector<28x168xf32>
    %23 = vector.extract_strided_slice %1 {offsets = [1, 1], sizes = [28, 28], strides = [1, 1]} : vector<30x30xf32> to vector<28x28xf32>
    %c4 = arith.constant 4 : index
    %c0_15 = arith.constant 0 : index
    %c0_16 = arith.constant 0 : index
    %24 = vector.load %arg2[%c4, %c0_15, %c0_16] : memref<9x28x168xf32, #tpu.memory_space<vmem>>, vector<1x28x168xf32>
    %25 = vector.shape_cast %24 : vector<1x28x168xf32> to vector<28x168xf32>
    %cst_17 = arith.constant dense<0.000000e+00> : vector<28x168xf32>
    %26 = tpu.matmul %23, %25, %cst_17 {dimension_numbers = #tpu.dot_dimension_numbers<[1], [0], [0], [1], [0, 0, 1, 1], [], []>} : vector<28x28xf32>, vector<28x168xf32>, vector<28x168xf32> -> vector<28x168xf32>
    %27 = arith.addf %22, %26 : vector<28x168xf32>
    %28 = vector.extract_strided_slice %1 {offsets = [2, 1], sizes = [28, 28], strides = [1, 1]} : vector<30x30xf32> to vector<28x28xf32>
    %c5 = arith.constant 5 : index
    %c0_18 = arith.constant 0 : index
    %c0_19 = arith.constant 0 : index
    %29 = vector.load %arg2[%c5, %c0_18, %c0_19] : memref<9x28x168xf32, #tpu.memory_space<vmem>>, vector<1x28x168xf32>
    %30 = vector.shape_cast %29 : vector<1x28x168xf32> to vector<28x168xf32>
    %cst_20 = arith.constant dense<0.000000e+00> : vector<28x168xf32>
    %31 = tpu.matmul %28, %30, %cst_20 {dimension_numbers = #tpu.dot_dimension_numbers<[1], [0], [0], [1], [0, 0, 1, 1], [], []>} : vector<28x28xf32>, vector<28x168xf32>, vector<28x168xf32> -> vector<28x168xf32>
    %32 = arith.addf %27, %31 : vector<28x168xf32>
    %33 = vector.extract_strided_slice %1 {offsets = [0, 2], sizes = [28, 28], strides = [1, 1]} : vector<30x30xf32> to vector<28x28xf32>
    %c6 = arith.constant 6 : index
    %c0_21 = arith.constant 0 : index
    %c0_22 = arith.constant 0 : index
    %34 = vector.load %arg2[%c6, %c0_21, %c0_22] : memref<9x28x168xf32, #tpu.memory_space<vmem>>, vector<1x28x168xf32>
    %35 = vector.shape_cast %34 : vector<1x28x168xf32> to vector<28x168xf32>
    %cst_23 = arith.constant dense<0.000000e+00> : vector<28x168xf32>
    %36 = tpu.matmul %33, %35, %cst_23 {dimension_numbers = #tpu.dot_dimension_numbers<[1], [0], [0], [1], [0, 0, 1, 1], [], []>} : vector<28x28xf32>, vector<28x168xf32>, vector<28x168xf32> -> vector<28x168xf32>
    %37 = arith.addf %32, %36 : vector<28x168xf32>
    %38 = vector.extract_strided_slice %1 {offsets = [1, 2], sizes = [28, 28], strides = [1, 1]} : vector<30x30xf32> to vector<28x28xf32>
    %c7 = arith.constant 7 : index
    %c0_24 = arith.constant 0 : index
    %c0_25 = arith.constant 0 : index
    %39 = vector.load %arg2[%c7, %c0_24, %c0_25] : memref<9x28x168xf32, #tpu.memory_space<vmem>>, vector<1x28x168xf32>
    %40 = vector.shape_cast %39 : vector<1x28x168xf32> to vector<28x168xf32>
    %cst_26 = arith.constant dense<0.000000e+00> : vector<28x168xf32>
    %41 = tpu.matmul %38, %40, %cst_26 {dimension_numbers = #tpu.dot_dimension_numbers<[1], [0], [0], [1], [0, 0, 1, 1], [], []>} : vector<28x28xf32>, vector<28x168xf32>, vector<28x168xf32> -> vector<28x168xf32>
    %42 = arith.addf %37, %41 : vector<28x168xf32>
    %43 = vector.extract_strided_slice %1 {offsets = [2, 2], sizes = [28, 28], strides = [1, 1]} : vector<30x30xf32> to vector<28x28xf32>
    %c8 = arith.constant 8 : index
    %c0_27 = arith.constant 0 : index
    %c0_28 = arith.constant 0 : index
    %44 = vector.load %arg2[%c8, %c0_27, %c0_28] : memref<9x28x168xf32, #tpu.memory_space<vmem>>, vector<1x28x168xf32>
    %45 = vector.shape_cast %44 : vector<1x28x168xf32> to vector<28x168xf32>
    %cst_29 = arith.constant dense<0.000000e+00> : vector<28x168xf32>
    %46 = tpu.matmul %43, %45, %cst_29 {dimension_numbers = #tpu.dot_dimension_numbers<[1], [0], [0], [1], [0, 0, 1, 1], [], []>} : vector<28x28xf32>, vector<28x168xf32>, vector<28x168xf32> -> vector<28x168xf32>
    %47 = arith.addf %42, %46 : vector<28x168xf32>
    %c0_30 = arith.constant 0 : index
    %c0_31 = arith.constant 0 : index
    %48 = vector.load %arg3[%c0_30, %c0_31] : memref<1x168xf32, #tpu.memory_space<vmem>>, vector<1x168xf32>
    %49 = vector.broadcast %48 : vector<1x168xf32> to vector<28x168xf32>
    %50 = arith.addf %47, %49 : vector<28x168xf32>
    %cst_32 = arith.constant 0.000000e+00 : f32
    %51 = vector.broadcast %cst_32 : f32 to vector<28x168xf32>
    %52 = arith.maximumf %50, %51 : vector<28x168xf32>
    %53 = vector.extract_strided_slice %52 {offsets = [0, 0], sizes = [27, 168], strides = [1, 1]} : vector<28x168xf32> to vector<27x168xf32>
    %54 = vector.extract_strided_slice %52 {offsets = [1, 0], sizes = [27, 168], strides = [1, 1]} : vector<28x168xf32> to vector<27x168xf32>
    %55 = arith.maximumf %53, %54 : vector<27x168xf32>
    %56 = vector.extract_strided_slice %55 {offsets = [0, 0], sizes = [27, 167], strides = [1, 1]} : vector<27x168xf32> to vector<27x167xf32>
    %57 = vector.extract_strided_slice %55 {offsets = [0, 1], sizes = [27, 167], strides = [1, 1]} : vector<27x168xf32> to vector<27x167xf32>
    %58 = arith.maximumf %56, %57 : vector<27x167xf32>
    %c0_33 = arith.constant 0 : index
    %c0_34 = arith.constant 0 : index
    %59 = vector.load %arg4[%c0_33, %c0_34] : memref<14x27xf32, #tpu.memory_space<vmem>>, vector<14x27xf32>
    %cst_35 = arith.constant dense<0.000000e+00> : vector<14x167xf32>
    %60 = tpu.matmul %59, %58, %cst_35 {dimension_numbers = #tpu.dot_dimension_numbers<[1], [0], [0], [1], [0, 0, 1, 1], [], []>} : vector<14x27xf32>, vector<27x167xf32>, vector<14x167xf32> -> vector<14x167xf32>
    %c0_36 = arith.constant 0 : index
    %c0_37 = arith.constant 0 : index
    %61 = vector.load %arg5[%c0_36, %c0_37] : memref<167x84xf32, #tpu.memory_space<vmem>>, vector<167x84xf32>
    %cst_38 = arith.constant dense<0.000000e+00> : vector<14x84xf32>
    %62 = tpu.matmul %60, %61, %cst_38 {dimension_numbers = #tpu.dot_dimension_numbers<[1], [0], [0], [1], [0, 0, 1, 1], [], []>} : vector<14x167xf32>, vector<167x84xf32>, vector<14x84xf32> -> vector<14x84xf32>
    %cst_39 = arith.constant 0.000000e+00 : f32
    %63 = vector.broadcast %cst_39 : f32 to vector<10x160xf32>
    %64 = vector.extract_strided_slice %62 {offsets = [0, 0], sizes = [10, 80], strides = [1, 1]} : vector<14x84xf32> to vector<10x80xf32>
    %c0_40 = arith.constant 0 : index
    %c0_41 = arith.constant 0 : index
    %c0_42 = arith.constant 0 : index
    %65 = vector.load %arg6[%c0_40, %c0_41, %c0_42] : memref<25x80x160xf32, #tpu.memory_space<vmem>>, vector<1x80x160xf32>
    %66 = vector.shape_cast %65 : vector<1x80x160xf32> to vector<80x160xf32>
    %cst_43 = arith.constant dense<0.000000e+00> : vector<10x160xf32>
    %67 = tpu.matmul %64, %66, %cst_43 {dimension_numbers = #tpu.dot_dimension_numbers<[1], [0], [0], [1], [0, 0, 1, 1], [], []>} : vector<10x80xf32>, vector<80x160xf32>, vector<10x160xf32> -> vector<10x160xf32>
    %68 = arith.addf %63, %67 : vector<10x160xf32>
    %69 = vector.extract_strided_slice %62 {offsets = [1, 0], sizes = [10, 80], strides = [1, 1]} : vector<14x84xf32> to vector<10x80xf32>
    %c1_44 = arith.constant 1 : index
    %c0_45 = arith.constant 0 : index
    %c0_46 = arith.constant 0 : index
    %70 = vector.load %arg6[%c1_44, %c0_45, %c0_46] : memref<25x80x160xf32, #tpu.memory_space<vmem>>, vector<1x80x160xf32>
    %71 = vector.shape_cast %70 : vector<1x80x160xf32> to vector<80x160xf32>
    %cst_47 = arith.constant dense<0.000000e+00> : vector<10x160xf32>
    %72 = tpu.matmul %69, %71, %cst_47 {dimension_numbers = #tpu.dot_dimension_numbers<[1], [0], [0], [1], [0, 0, 1, 1], [], []>} : vector<10x80xf32>, vector<80x160xf32>, vector<10x160xf32> -> vector<10x160xf32>
    %73 = arith.addf %68, %72 : vector<10x160xf32>
    %74 = vector.extract_strided_slice %62 {offsets = [2, 0], sizes = [10, 80], strides = [1, 1]} : vector<14x84xf32> to vector<10x80xf32>
    %c2_48 = arith.constant 2 : index
    %c0_49 = arith.constant 0 : index
    %c0_50 = arith.constant 0 : index
    %75 = vector.load %arg6[%c2_48, %c0_49, %c0_50] : memref<25x80x160xf32, #tpu.memory_space<vmem>>, vector<1x80x160xf32>
    %76 = vector.shape_cast %75 : vector<1x80x160xf32> to vector<80x160xf32>
    %cst_51 = arith.constant dense<0.000000e+00> : vector<10x160xf32>
    %77 = tpu.matmul %74, %76, %cst_51 {dimension_numbers = #tpu.dot_dimension_numbers<[1], [0], [0], [1], [0, 0, 1, 1], [], []>} : vector<10x80xf32>, vector<80x160xf32>, vector<10x160xf32> -> vector<10x160xf32>
    %78 = arith.addf %73, %77 : vector<10x160xf32>
    %79 = vector.extract_strided_slice %62 {offsets = [3, 0], sizes = [10, 80], strides = [1, 1]} : vector<14x84xf32> to vector<10x80xf32>
    %c3_52 = arith.constant 3 : index
    %c0_53 = arith.constant 0 : index
    %c0_54 = arith.constant 0 : index
    %80 = vector.load %arg6[%c3_52, %c0_53, %c0_54] : memref<25x80x160xf32, #tpu.memory_space<vmem>>, vector<1x80x160xf32>
    %81 = vector.shape_cast %80 : vector<1x80x160xf32> to vector<80x160xf32>
    %cst_55 = arith.constant dense<0.000000e+00> : vector<10x160xf32>
    %82 = tpu.matmul %79, %81, %cst_55 {dimension_numbers = #tpu.dot_dimension_numbers<[1], [0], [0], [1], [0, 0, 1, 1], [], []>} : vector<10x80xf32>, vector<80x160xf32>, vector<10x160xf32> -> vector<10x160xf32>
    %83 = arith.addf %78, %82 : vector<10x160xf32>
    %84 = vector.extract_strided_slice %62 {offsets = [4, 0], sizes = [10, 80], strides = [1, 1]} : vector<14x84xf32> to vector<10x80xf32>
    %c4_56 = arith.constant 4 : index
    %c0_57 = arith.constant 0 : index
    %c0_58 = arith.constant 0 : index
    %85 = vector.load %arg6[%c4_56, %c0_57, %c0_58] : memref<25x80x160xf32, #tpu.memory_space<vmem>>, vector<1x80x160xf32>
    %86 = vector.shape_cast %85 : vector<1x80x160xf32> to vector<80x160xf32>
    %cst_59 = arith.constant dense<0.000000e+00> : vector<10x160xf32>
    %87 = tpu.matmul %84, %86, %cst_59 {dimension_numbers = #tpu.dot_dimension_numbers<[1], [0], [0], [1], [0, 0, 1, 1], [], []>} : vector<10x80xf32>, vector<80x160xf32>, vector<10x160xf32> -> vector<10x160xf32>
    %88 = arith.addf %83, %87 : vector<10x160xf32>
    %89 = vector.extract_strided_slice %62 {offsets = [0, 1], sizes = [10, 80], strides = [1, 1]} : vector<14x84xf32> to vector<10x80xf32>
    %c5_60 = arith.constant 5 : index
    %c0_61 = arith.constant 0 : index
    %c0_62 = arith.constant 0 : index
    %90 = vector.load %arg6[%c5_60, %c0_61, %c0_62] : memref<25x80x160xf32, #tpu.memory_space<vmem>>, vector<1x80x160xf32>
    %91 = vector.shape_cast %90 : vector<1x80x160xf32> to vector<80x160xf32>
    %cst_63 = arith.constant dense<0.000000e+00> : vector<10x160xf32>
    %92 = tpu.matmul %89, %91, %cst_63 {dimension_numbers = #tpu.dot_dimension_numbers<[1], [0], [0], [1], [0, 0, 1, 1], [], []>} : vector<10x80xf32>, vector<80x160xf32>, vector<10x160xf32> -> vector<10x160xf32>
    %93 = arith.addf %88, %92 : vector<10x160xf32>
    %94 = vector.extract_strided_slice %62 {offsets = [1, 1], sizes = [10, 80], strides = [1, 1]} : vector<14x84xf32> to vector<10x80xf32>
    %c6_64 = arith.constant 6 : index
    %c0_65 = arith.constant 0 : index
    %c0_66 = arith.constant 0 : index
    %95 = vector.load %arg6[%c6_64, %c0_65, %c0_66] : memref<25x80x160xf32, #tpu.memory_space<vmem>>, vector<1x80x160xf32>
    %96 = vector.shape_cast %95 : vector<1x80x160xf32> to vector<80x160xf32>
    %cst_67 = arith.constant dense<0.000000e+00> : vector<10x160xf32>
    %97 = tpu.matmul %94, %96, %cst_67 {dimension_numbers = #tpu.dot_dimension_numbers<[1], [0], [0], [1], [0, 0, 1, 1], [], []>} : vector<10x80xf32>, vector<80x160xf32>, vector<10x160xf32> -> vector<10x160xf32>
    %98 = arith.addf %93, %97 : vector<10x160xf32>
    %99 = vector.extract_strided_slice %62 {offsets = [2, 1], sizes = [10, 80], strides = [1, 1]} : vector<14x84xf32> to vector<10x80xf32>
    %c7_68 = arith.constant 7 : index
    %c0_69 = arith.constant 0 : index
    %c0_70 = arith.constant 0 : index
    %100 = vector.load %arg6[%c7_68, %c0_69, %c0_70] : memref<25x80x160xf32, #tpu.memory_space<vmem>>, vector<1x80x160xf32>
    %101 = vector.shape_cast %100 : vector<1x80x160xf32> to vector<80x160xf32>
    %cst_71 = arith.constant dense<0.000000e+00> : vector<10x160xf32>
    %102 = tpu.matmul %99, %101, %cst_71 {dimension_numbers = #tpu.dot_dimension_numbers<[1], [0], [0], [1], [0, 0, 1, 1], [], []>} : vector<10x80xf32>, vector<80x160xf32>, vector<10x160xf32> -> vector<10x160xf32>
    %103 = arith.addf %98, %102 : vector<10x160xf32>
    %104 = vector.extract_strided_slice %62 {offsets = [3, 1], sizes = [10, 80], strides = [1, 1]} : vector<14x84xf32> to vector<10x80xf32>
    %c8_72 = arith.constant 8 : index
    %c0_73 = arith.constant 0 : index
    %c0_74 = arith.constant 0 : index
    %105 = vector.load %arg6[%c8_72, %c0_73, %c0_74] : memref<25x80x160xf32, #tpu.memory_space<vmem>>, vector<1x80x160xf32>
    %106 = vector.shape_cast %105 : vector<1x80x160xf32> to vector<80x160xf32>
    %cst_75 = arith.constant dense<0.000000e+00> : vector<10x160xf32>
    %107 = tpu.matmul %104, %106, %cst_75 {dimension_numbers = #tpu.dot_dimension_numbers<[1], [0], [0], [1], [0, 0, 1, 1], [], []>} : vector<10x80xf32>, vector<80x160xf32>, vector<10x160xf32> -> vector<10x160xf32>
    %108 = arith.addf %103, %107 : vector<10x160xf32>
    %109 = vector.extract_strided_slice %62 {offsets = [4, 1], sizes = [10, 80], strides = [1, 1]} : vector<14x84xf32> to vector<10x80xf32>
    %c9 = arith.constant 9 : index
    %c0_76 = arith.constant 0 : index
    %c0_77 = arith.constant 0 : index
    %110 = vector.load %arg6[%c9, %c0_76, %c0_77] : memref<25x80x160xf32, #tpu.memory_space<vmem>>, vector<1x80x160xf32>
    %111 = vector.shape_cast %110 : vector<1x80x160xf32> to vector<80x160xf32>
    %cst_78 = arith.constant dense<0.000000e+00> : vector<10x160xf32>
    %112 = tpu.matmul %109, %111, %cst_78 {dimension_numbers = #tpu.dot_dimension_numbers<[1], [0], [0], [1], [0, 0, 1, 1], [], []>} : vector<10x80xf32>, vector<80x160xf32>, vector<10x160xf32> -> vector<10x160xf32>
    %113 = arith.addf %108, %112 : vector<10x160xf32>
    %114 = vector.extract_strided_slice %62 {offsets = [0, 2], sizes = [10, 80], strides = [1, 1]} : vector<14x84xf32> to vector<10x80xf32>
    %c10 = arith.constant 10 : index
    %c0_79 = arith.constant 0 : index
    %c0_80 = arith.constant 0 : index
    %115 = vector.load %arg6[%c10, %c0_79, %c0_80] : memref<25x80x160xf32, #tpu.memory_space<vmem>>, vector<1x80x160xf32>
    %116 = vector.shape_cast %115 : vector<1x80x160xf32> to vector<80x160xf32>
    %cst_81 = arith.constant dense<0.000000e+00> : vector<10x160xf32>
    %117 = tpu.matmul %114, %116, %cst_81 {dimension_numbers = #tpu.dot_dimension_numbers<[1], [0], [0], [1], [0, 0, 1, 1], [], []>} : vector<10x80xf32>, vector<80x160xf32>, vector<10x160xf32> -> vector<10x160xf32>
    %118 = arith.addf %113, %117 : vector<10x160xf32>
    %119 = vector.extract_strided_slice %62 {offsets = [1, 2], sizes = [10, 80], strides = [1, 1]} : vector<14x84xf32> to vector<10x80xf32>
    %c11 = arith.constant 11 : index
    %c0_82 = arith.constant 0 : index
    %c0_83 = arith.constant 0 : index
    %120 = vector.load %arg6[%c11, %c0_82, %c0_83] : memref<25x80x160xf32, #tpu.memory_space<vmem>>, vector<1x80x160xf32>
    %121 = vector.shape_cast %120 : vector<1x80x160xf32> to vector<80x160xf32>
    %cst_84 = arith.constant dense<0.000000e+00> : vector<10x160xf32>
    %122 = tpu.matmul %119, %121, %cst_84 {dimension_numbers = #tpu.dot_dimension_numbers<[1], [0], [0], [1], [0, 0, 1, 1], [], []>} : vector<10x80xf32>, vector<80x160xf32>, vector<10x160xf32> -> vector<10x160xf32>
    %123 = arith.addf %118, %122 : vector<10x160xf32>
    %124 = vector.extract_strided_slice %62 {offsets = [2, 2], sizes = [10, 80], strides = [1, 1]} : vector<14x84xf32> to vector<10x80xf32>
    %c12 = arith.constant 12 : index
    %c0_85 = arith.constant 0 : index
    %c0_86 = arith.constant 0 : index
    %125 = vector.load %arg6[%c12, %c0_85, %c0_86] : memref<25x80x160xf32, #tpu.memory_space<vmem>>, vector<1x80x160xf32>
    %126 = vector.shape_cast %125 : vector<1x80x160xf32> to vector<80x160xf32>
    %cst_87 = arith.constant dense<0.000000e+00> : vector<10x160xf32>
    %127 = tpu.matmul %124, %126, %cst_87 {dimension_numbers = #tpu.dot_dimension_numbers<[1], [0], [0], [1], [0, 0, 1, 1], [], []>} : vector<10x80xf32>, vector<80x160xf32>, vector<10x160xf32> -> vector<10x160xf32>
    %128 = arith.addf %123, %127 : vector<10x160xf32>
    %129 = vector.extract_strided_slice %62 {offsets = [3, 2], sizes = [10, 80], strides = [1, 1]} : vector<14x84xf32> to vector<10x80xf32>
    %c13 = arith.constant 13 : index
    %c0_88 = arith.constant 0 : index
    %c0_89 = arith.constant 0 : index
    %130 = vector.load %arg6[%c13, %c0_88, %c0_89] : memref<25x80x160xf32, #tpu.memory_space<vmem>>, vector<1x80x160xf32>
    %131 = vector.shape_cast %130 : vector<1x80x160xf32> to vector<80x160xf32>
    %cst_90 = arith.constant dense<0.000000e+00> : vector<10x160xf32>
    %132 = tpu.matmul %129, %131, %cst_90 {dimension_numbers = #tpu.dot_dimension_numbers<[1], [0], [0], [1], [0, 0, 1, 1], [], []>} : vector<10x80xf32>, vector<80x160xf32>, vector<10x160xf32> -> vector<10x160xf32>
    %133 = arith.addf %128, %132 : vector<10x160xf32>
    %134 = vector.extract_strided_slice %62 {offsets = [4, 2], sizes = [10, 80], strides = [1, 1]} : vector<14x84xf32> to vector<10x80xf32>
    %c14 = arith.constant 14 : index
    %c0_91 = arith.constant 0 : index
    %c0_92 = arith.constant 0 : index
    %135 = vector.load %arg6[%c14, %c0_91, %c0_92] : memref<25x80x160xf32, #tpu.memory_space<vmem>>, vector<1x80x160xf32>
    %136 = vector.shape_cast %135 : vector<1x80x160xf32> to vector<80x160xf32>
    %cst_93 = arith.constant dense<0.000000e+00> : vector<10x160xf32>
    %137 = tpu.matmul %134, %136, %cst_93 {dimension_numbers = #tpu.dot_dimension_numbers<[1], [0], [0], [1], [0, 0, 1, 1], [], []>} : vector<10x80xf32>, vector<80x160xf32>, vector<10x160xf32> -> vector<10x160xf32>
    %138 = arith.addf %133, %137 : vector<10x160xf32>
    %139 = vector.extract_strided_slice %62 {offsets = [0, 3], sizes = [10, 80], strides = [1, 1]} : vector<14x84xf32> to vector<10x80xf32>
    %c15 = arith.constant 15 : index
    %c0_94 = arith.constant 0 : index
    %c0_95 = arith.constant 0 : index
    %140 = vector.load %arg6[%c15, %c0_94, %c0_95] : memref<25x80x160xf32, #tpu.memory_space<vmem>>, vector<1x80x160xf32>
    %141 = vector.shape_cast %140 : vector<1x80x160xf32> to vector<80x160xf32>
    %cst_96 = arith.constant dense<0.000000e+00> : vector<10x160xf32>
    %142 = tpu.matmul %139, %141, %cst_96 {dimension_numbers = #tpu.dot_dimension_numbers<[1], [0], [0], [1], [0, 0, 1, 1], [], []>} : vector<10x80xf32>, vector<80x160xf32>, vector<10x160xf32> -> vector<10x160xf32>
    %143 = arith.addf %138, %142 : vector<10x160xf32>
    %144 = vector.extract_strided_slice %62 {offsets = [1, 3], sizes = [10, 80], strides = [1, 1]} : vector<14x84xf32> to vector<10x80xf32>
    %c16 = arith.constant 16 : index
    %c0_97 = arith.constant 0 : index
    %c0_98 = arith.constant 0 : index
    %145 = vector.load %arg6[%c16, %c0_97, %c0_98] : memref<25x80x160xf32, #tpu.memory_space<vmem>>, vector<1x80x160xf32>
    %146 = vector.shape_cast %145 : vector<1x80x160xf32> to vector<80x160xf32>
    %cst_99 = arith.constant dense<0.000000e+00> : vector<10x160xf32>
    %147 = tpu.matmul %144, %146, %cst_99 {dimension_numbers = #tpu.dot_dimension_numbers<[1], [0], [0], [1], [0, 0, 1, 1], [], []>} : vector<10x80xf32>, vector<80x160xf32>, vector<10x160xf32> -> vector<10x160xf32>
    %148 = arith.addf %143, %147 : vector<10x160xf32>
    %149 = vector.extract_strided_slice %62 {offsets = [2, 3], sizes = [10, 80], strides = [1, 1]} : vector<14x84xf32> to vector<10x80xf32>
    %c17 = arith.constant 17 : index
    %c0_100 = arith.constant 0 : index
    %c0_101 = arith.constant 0 : index
    %150 = vector.load %arg6[%c17, %c0_100, %c0_101] : memref<25x80x160xf32, #tpu.memory_space<vmem>>, vector<1x80x160xf32>
    %151 = vector.shape_cast %150 : vector<1x80x160xf32> to vector<80x160xf32>
    %cst_102 = arith.constant dense<0.000000e+00> : vector<10x160xf32>
    %152 = tpu.matmul %149, %151, %cst_102 {dimension_numbers = #tpu.dot_dimension_numbers<[1], [0], [0], [1], [0, 0, 1, 1], [], []>} : vector<10x80xf32>, vector<80x160xf32>, vector<10x160xf32> -> vector<10x160xf32>
    %153 = arith.addf %148, %152 : vector<10x160xf32>
    %154 = vector.extract_strided_slice %62 {offsets = [3, 3], sizes = [10, 80], strides = [1, 1]} : vector<14x84xf32> to vector<10x80xf32>
    %c18 = arith.constant 18 : index
    %c0_103 = arith.constant 0 : index
    %c0_104 = arith.constant 0 : index
    %155 = vector.load %arg6[%c18, %c0_103, %c0_104] : memref<25x80x160xf32, #tpu.memory_space<vmem>>, vector<1x80x160xf32>
    %156 = vector.shape_cast %155 : vector<1x80x160xf32> to vector<80x160xf32>
    %cst_105 = arith.constant dense<0.000000e+00> : vector<10x160xf32>
    %157 = tpu.matmul %154, %156, %cst_105 {dimension_numbers = #tpu.dot_dimension_numbers<[1], [0], [0], [1], [0, 0, 1, 1], [], []>} : vector<10x80xf32>, vector<80x160xf32>, vector<10x160xf32> -> vector<10x160xf32>
    %158 = arith.addf %153, %157 : vector<10x160xf32>
    %159 = vector.extract_strided_slice %62 {offsets = [4, 3], sizes = [10, 80], strides = [1, 1]} : vector<14x84xf32> to vector<10x80xf32>
    %c19 = arith.constant 19 : index
    %c0_106 = arith.constant 0 : index
    %c0_107 = arith.constant 0 : index
    %160 = vector.load %arg6[%c19, %c0_106, %c0_107] : memref<25x80x160xf32, #tpu.memory_space<vmem>>, vector<1x80x160xf32>
    %161 = vector.shape_cast %160 : vector<1x80x160xf32> to vector<80x160xf32>
    %cst_108 = arith.constant dense<0.000000e+00> : vector<10x160xf32>
    %162 = tpu.matmul %159, %161, %cst_108 {dimension_numbers = #tpu.dot_dimension_numbers<[1], [0], [0], [1], [0, 0, 1, 1], [], []>} : vector<10x80xf32>, vector<80x160xf32>, vector<10x160xf32> -> vector<10x160xf32>
    %163 = arith.addf %158, %162 : vector<10x160xf32>
    %164 = vector.extract_strided_slice %62 {offsets = [0, 4], sizes = [10, 80], strides = [1, 1]} : vector<14x84xf32> to vector<10x80xf32>
    %c20 = arith.constant 20 : index
    %c0_109 = arith.constant 0 : index
    %c0_110 = arith.constant 0 : index
    %165 = vector.load %arg6[%c20, %c0_109, %c0_110] : memref<25x80x160xf32, #tpu.memory_space<vmem>>, vector<1x80x160xf32>
    %166 = vector.shape_cast %165 : vector<1x80x160xf32> to vector<80x160xf32>
    %cst_111 = arith.constant dense<0.000000e+00> : vector<10x160xf32>
    %167 = tpu.matmul %164, %166, %cst_111 {dimension_numbers = #tpu.dot_dimension_numbers<[1], [0], [0], [1], [0, 0, 1, 1], [], []>} : vector<10x80xf32>, vector<80x160xf32>, vector<10x160xf32> -> vector<10x160xf32>
    %168 = arith.addf %163, %167 : vector<10x160xf32>
    %169 = vector.extract_strided_slice %62 {offsets = [1, 4], sizes = [10, 80], strides = [1, 1]} : vector<14x84xf32> to vector<10x80xf32>
    %c21 = arith.constant 21 : index
    %c0_112 = arith.constant 0 : index
    %c0_113 = arith.constant 0 : index
    %170 = vector.load %arg6[%c21, %c0_112, %c0_113] : memref<25x80x160xf32, #tpu.memory_space<vmem>>, vector<1x80x160xf32>
    %171 = vector.shape_cast %170 : vector<1x80x160xf32> to vector<80x160xf32>
    %cst_114 = arith.constant dense<0.000000e+00> : vector<10x160xf32>
    %172 = tpu.matmul %169, %171, %cst_114 {dimension_numbers = #tpu.dot_dimension_numbers<[1], [0], [0], [1], [0, 0, 1, 1], [], []>} : vector<10x80xf32>, vector<80x160xf32>, vector<10x160xf32> -> vector<10x160xf32>
    %173 = arith.addf %168, %172 : vector<10x160xf32>
    %174 = vector.extract_strided_slice %62 {offsets = [2, 4], sizes = [10, 80], strides = [1, 1]} : vector<14x84xf32> to vector<10x80xf32>
    %c22 = arith.constant 22 : index
    %c0_115 = arith.constant 0 : index
    %c0_116 = arith.constant 0 : index
    %175 = vector.load %arg6[%c22, %c0_115, %c0_116] : memref<25x80x160xf32, #tpu.memory_space<vmem>>, vector<1x80x160xf32>
    %176 = vector.shape_cast %175 : vector<1x80x160xf32> to vector<80x160xf32>
    %cst_117 = arith.constant dense<0.000000e+00> : vector<10x160xf32>
    %177 = tpu.matmul %174, %176, %cst_117 {dimension_numbers = #tpu.dot_dimension_numbers<[1], [0], [0], [1], [0, 0, 1, 1], [], []>} : vector<10x80xf32>, vector<80x160xf32>, vector<10x160xf32> -> vector<10x160xf32>
    %178 = arith.addf %173, %177 : vector<10x160xf32>
    %179 = vector.extract_strided_slice %62 {offsets = [3, 4], sizes = [10, 80], strides = [1, 1]} : vector<14x84xf32> to vector<10x80xf32>
    %c23 = arith.constant 23 : index
    %c0_118 = arith.constant 0 : index
    %c0_119 = arith.constant 0 : index
    %180 = vector.load %arg6[%c23, %c0_118, %c0_119] : memref<25x80x160xf32, #tpu.memory_space<vmem>>, vector<1x80x160xf32>
    %181 = vector.shape_cast %180 : vector<1x80x160xf32> to vector<80x160xf32>
    %cst_120 = arith.constant dense<0.000000e+00> : vector<10x160xf32>
    %182 = tpu.matmul %179, %181, %cst_120 {dimension_numbers = #tpu.dot_dimension_numbers<[1], [0], [0], [1], [0, 0, 1, 1], [], []>} : vector<10x80xf32>, vector<80x160xf32>, vector<10x160xf32> -> vector<10x160xf32>
    %183 = arith.addf %178, %182 : vector<10x160xf32>
    %184 = vector.extract_strided_slice %62 {offsets = [4, 4], sizes = [10, 80], strides = [1, 1]} : vector<14x84xf32> to vector<10x80xf32>
    %c24 = arith.constant 24 : index
    %c0_121 = arith.constant 0 : index
    %c0_122 = arith.constant 0 : index
    %185 = vector.load %arg6[%c24, %c0_121, %c0_122] : memref<25x80x160xf32, #tpu.memory_space<vmem>>, vector<1x80x160xf32>
    %186 = vector.shape_cast %185 : vector<1x80x160xf32> to vector<80x160xf32>
    %cst_123 = arith.constant dense<0.000000e+00> : vector<10x160xf32>
    %187 = tpu.matmul %184, %186, %cst_123 {dimension_numbers = #tpu.dot_dimension_numbers<[1], [0], [0], [1], [0, 0, 1, 1], [], []>} : vector<10x80xf32>, vector<80x160xf32>, vector<10x160xf32> -> vector<10x160xf32>
    %188 = arith.addf %183, %187 : vector<10x160xf32>
    %c0_124 = arith.constant 0 : index
    %c0_125 = arith.constant 0 : index
    %189 = vector.load %arg7[%c0_124, %c0_125] : memref<1x160xf32, #tpu.memory_space<vmem>>, vector<1x160xf32>
    %190 = vector.broadcast %189 : vector<1x160xf32> to vector<10x160xf32>
    %191 = arith.addf %188, %190 : vector<10x160xf32>
    %cst_126 = arith.constant 0.000000e+00 : f32
    %192 = vector.broadcast %cst_126 : f32 to vector<10x160xf32>
    %193 = arith.maximumf %191, %192 : vector<10x160xf32>
    %194 = vector.extract_strided_slice %193 {offsets = [0, 0], sizes = [9, 160], strides = [1, 1]} : vector<10x160xf32> to vector<9x160xf32>
    %195 = vector.extract_strided_slice %193 {offsets = [1, 0], sizes = [9, 160], strides = [1, 1]} : vector<10x160xf32> to vector<9x160xf32>
    %196 = arith.maximumf %194, %195 : vector<9x160xf32>
    %197 = vector.extract_strided_slice %196 {offsets = [0, 0], sizes = [9, 159], strides = [1, 1]} : vector<9x160xf32> to vector<9x159xf32>
    %198 = vector.extract_strided_slice %196 {offsets = [0, 1], sizes = [9, 159], strides = [1, 1]} : vector<9x160xf32> to vector<9x159xf32>
    %199 = arith.maximumf %197, %198 : vector<9x159xf32>
    %c0_127 = arith.constant 0 : index
    %c0_128 = arith.constant 0 : index
    %200 = vector.load %arg8[%c0_127, %c0_128] : memref<5x9xf32, #tpu.memory_space<vmem>>, vector<5x9xf32>
    %cst_129 = arith.constant dense<0.000000e+00> : vector<5x159xf32>
    %201 = tpu.matmul %200, %199, %cst_129 {dimension_numbers = #tpu.dot_dimension_numbers<[1], [0], [0], [1], [0, 0, 1, 1], [], []>} : vector<5x9xf32>, vector<9x159xf32>, vector<5x159xf32> -> vector<5x159xf32>
    %c0_130 = arith.constant 0 : index
    %c0_131 = arith.constant 0 : index
    %202 = vector.load %arg9[%c0_130, %c0_131] : memref<159x80xf32, #tpu.memory_space<vmem>>, vector<159x80xf32>
    %cst_132 = arith.constant dense<0.000000e+00> : vector<5x80xf32>
    %203 = tpu.matmul %201, %202, %cst_132 {dimension_numbers = #tpu.dot_dimension_numbers<[1], [0], [0], [1], [0, 0, 1, 1], [], []>} : vector<5x159xf32>, vector<159x80xf32>, vector<5x80xf32> -> vector<5x80xf32>
    %c0_133 = arith.constant 0 : index
    %c0_134 = arith.constant 0 : index
    %204 = vector.load %arg11[%c0_133, %c0_134] : memref<1x120xf32, #tpu.memory_space<vmem>>, vector<1x120xf32>
    %205 = vector.extract_strided_slice %203 {offsets = [0, 0], sizes = [1, 80], strides = [1, 1]} : vector<5x80xf32> to vector<1x80xf32>
    %c0_135 = arith.constant 0 : index
    %c0_136 = arith.constant 0 : index
    %c0_137 = arith.constant 0 : index
    %206 = vector.load %arg10[%c0_135, %c0_136, %c0_137] : memref<5x80x120xf32, #tpu.memory_space<vmem>>, vector<1x80x120xf32>
    %207 = vector.shape_cast %206 : vector<1x80x120xf32> to vector<80x120xf32>
    %cst_138 = arith.constant dense<0.000000e+00> : vector<1x120xf32>
    %208 = tpu.matmul %205, %207, %cst_138 {dimension_numbers = #tpu.dot_dimension_numbers<[1], [0], [0], [1], [0, 0, 1, 1], [], []>} : vector<1x80xf32>, vector<80x120xf32>, vector<1x120xf32> -> vector<1x120xf32>
    %209 = arith.addf %204, %208 : vector<1x120xf32>
    %210 = vector.extract_strided_slice %203 {offsets = [1, 0], sizes = [1, 80], strides = [1, 1]} : vector<5x80xf32> to vector<1x80xf32>
    %c1_139 = arith.constant 1 : index
    %c0_140 = arith.constant 0 : index
    %c0_141 = arith.constant 0 : index
    %211 = vector.load %arg10[%c1_139, %c0_140, %c0_141] : memref<5x80x120xf32, #tpu.memory_space<vmem>>, vector<1x80x120xf32>
    %212 = vector.shape_cast %211 : vector<1x80x120xf32> to vector<80x120xf32>
    %cst_142 = arith.constant dense<0.000000e+00> : vector<1x120xf32>
    %213 = tpu.matmul %210, %212, %cst_142 {dimension_numbers = #tpu.dot_dimension_numbers<[1], [0], [0], [1], [0, 0, 1, 1], [], []>} : vector<1x80xf32>, vector<80x120xf32>, vector<1x120xf32> -> vector<1x120xf32>
    %214 = arith.addf %209, %213 : vector<1x120xf32>
    %215 = vector.extract_strided_slice %203 {offsets = [2, 0], sizes = [1, 80], strides = [1, 1]} : vector<5x80xf32> to vector<1x80xf32>
    %c2_143 = arith.constant 2 : index
    %c0_144 = arith.constant 0 : index
    %c0_145 = arith.constant 0 : index
    %216 = vector.load %arg10[%c2_143, %c0_144, %c0_145] : memref<5x80x120xf32, #tpu.memory_space<vmem>>, vector<1x80x120xf32>
    %217 = vector.shape_cast %216 : vector<1x80x120xf32> to vector<80x120xf32>
    %cst_146 = arith.constant dense<0.000000e+00> : vector<1x120xf32>
    %218 = tpu.matmul %215, %217, %cst_146 {dimension_numbers = #tpu.dot_dimension_numbers<[1], [0], [0], [1], [0, 0, 1, 1], [], []>} : vector<1x80xf32>, vector<80x120xf32>, vector<1x120xf32> -> vector<1x120xf32>
    %219 = arith.addf %214, %218 : vector<1x120xf32>
    %220 = vector.extract_strided_slice %203 {offsets = [3, 0], sizes = [1, 80], strides = [1, 1]} : vector<5x80xf32> to vector<1x80xf32>
    %c3_147 = arith.constant 3 : index
    %c0_148 = arith.constant 0 : index
    %c0_149 = arith.constant 0 : index
    %221 = vector.load %arg10[%c3_147, %c0_148, %c0_149] : memref<5x80x120xf32, #tpu.memory_space<vmem>>, vector<1x80x120xf32>
    %222 = vector.shape_cast %221 : vector<1x80x120xf32> to vector<80x120xf32>
    %cst_150 = arith.constant dense<0.000000e+00> : vector<1x120xf32>
    %223 = tpu.matmul %220, %222, %cst_150 {dimension_numbers = #tpu.dot_dimension_numbers<[1], [0], [0], [1], [0, 0, 1, 1], [], []>} : vector<1x80xf32>, vector<80x120xf32>, vector<1x120xf32> -> vector<1x120xf32>
    %224 = arith.addf %219, %223 : vector<1x120xf32>
    %225 = vector.extract_strided_slice %203 {offsets = [4, 0], sizes = [1, 80], strides = [1, 1]} : vector<5x80xf32> to vector<1x80xf32>
    %c4_151 = arith.constant 4 : index
    %c0_152 = arith.constant 0 : index
    %c0_153 = arith.constant 0 : index
    %226 = vector.load %arg10[%c4_151, %c0_152, %c0_153] : memref<5x80x120xf32, #tpu.memory_space<vmem>>, vector<1x80x120xf32>
    %227 = vector.shape_cast %226 : vector<1x80x120xf32> to vector<80x120xf32>
    %cst_154 = arith.constant dense<0.000000e+00> : vector<1x120xf32>
    %228 = tpu.matmul %225, %227, %cst_154 {dimension_numbers = #tpu.dot_dimension_numbers<[1], [0], [0], [1], [0, 0, 1, 1], [], []>} : vector<1x80xf32>, vector<80x120xf32>, vector<1x120xf32> -> vector<1x120xf32>
    %229 = arith.addf %224, %228 : vector<1x120xf32>
    %c0_155 = arith.constant 0 : index
    %c0_156 = arith.constant 0 : index
    %230 = vector.load %arg12[%c0_155, %c0_156] : memref<120x84xf32, #tpu.memory_space<vmem>>, vector<120x84xf32>
    %cst_157 = arith.constant dense<0.000000e+00> : vector<1x84xf32>
    %231 = tpu.matmul %229, %230, %cst_157 {dimension_numbers = #tpu.dot_dimension_numbers<[1], [0], [0], [1], [0, 0, 1, 1], [], []>} : vector<1x120xf32>, vector<120x84xf32>, vector<1x84xf32> -> vector<1x84xf32>
    %c0_158 = arith.constant 0 : index
    %c0_159 = arith.constant 0 : index
    %232 = vector.load %arg13[%c0_158, %c0_159] : memref<1x84xf32, #tpu.memory_space<vmem>>, vector<1x84xf32>
    %233 = arith.addf %231, %232 : vector<1x84xf32>
    %c0_160 = arith.constant 0 : index
    %c0_161 = arith.constant 0 : index
    %234 = vector.load %arg14[%c0_160, %c0_161] : memref<84x128xf32, #tpu.memory_space<vmem>>, vector<84x128xf32>
    %cst_162 = arith.constant dense<0.000000e+00> : vector<1x128xf32>
    %235 = tpu.matmul %233, %234, %cst_162 {dimension_numbers = #tpu.dot_dimension_numbers<[1], [0], [0], [1], [0, 0, 1, 1], [], []>} : vector<1x84xf32>, vector<84x128xf32>, vector<1x128xf32> -> vector<1x128xf32>
    %c0_163 = arith.constant 0 : index
    %c0_164 = arith.constant 0 : index
    %236 = vector.load %arg15[%c0_163, %c0_164] : memref<1x128xf32, #tpu.memory_space<vmem>>, vector<1x128xf32>
    %237 = arith.addf %235, %236 : vector<1x128xf32>
    %c0_165 = arith.constant 0 : index
    %c0_166 = arith.constant 0 : index
    %c0_167 = arith.constant 0 : index
    %238 = vector.load %arg16[%c0_165, %c0_166, %c0_167] : memref<1x1x128xf32, #tpu.memory_space<vmem>>, vector<1x1x128xf32>
    %239 = vector.shape_cast %238 : vector<1x1x128xf32> to vector<1x128xf32>
    %240 = vector.shape_cast %237 : vector<1x128xf32> to vector<1x1x128xf32>
    tpu.vector_store %arg16[%c0_165, %c0_166, %c0_167], %240 {strides = array<i32>} : memref<1x1x128xf32, #tpu.memory_space<vmem>>, vector<1x1x128xf32>,
    return
  }
  func.func @transform_0(%arg0: i32) -> (i32, i32, i32) {
    %c0_i32 = arith.constant 0 : i32
    %c0_i32_0 = arith.constant 0 : i32
    %c0_i32_1 = arith.constant 0 : i32
    return %arg0, %c0_i32, %c0_i32_0 : i32, i32, i32
  }
  func.func @transform_1(%arg0: i32) -> (i32, i32, i32) {
    %c0_i32 = arith.constant 0 : i32
    %c0_i32_0 = arith.constant 0 : i32
    %c0_i32_1 = arith.constant 0 : i32
    %c0_i32_2 = arith.constant 0 : i32
    return %c0_i32, %c0_i32_0, %c0_i32_1 : i32, i32, i32
  }
  func.func @transform_2(%arg0: i32) -> (i32, i32) {
    %c0_i32 = arith.constant 0 : i32
    %c0_i32_0 = arith.constant 0 : i32
    %c0_i32_1 = arith.constant 0 : i32
    return %c0_i32, %c0_i32_0 : i32, i32
  }
  func.func @transform_3(%arg0: i32) -> (i32, i32) {
    %c0_i32 = arith.constant 0 : i32
    %c0_i32_0 = arith.constant 0 : i32
    %c0_i32_1 = arith.constant 0 : i32
    return %c0_i32, %c0_i32_0 : i32, i32
  }
  func.func @transform_4(%arg0: i32) -> (i32, i32) {
    %c0_i32 = arith.constant 0 : i32
    %c0_i32_0 = arith.constant 0 : i32
    %c0_i32_1 = arith.constant 0 : i32
    return %c0_i32, %c0_i32_0 : i32, i32
  }
  func.func @transform_5(%arg0: i32) -> (i32, i32, i32) {
    %c0_i32 = arith.constant 0 : i32
    %c0_i32_0 = arith.constant 0 : i32
    %c0_i32_1 = arith.constant 0 : i32
    %c0_i32_2 = arith.constant 0 : i32
    return %c0_i32, %c0_i32_0, %c0_i32_1 : i32, i32, i32
  }
  func.func @transform_6(%arg0: i32) -> (i32, i32) {
    %c0_i32 = arith.constant 0 : i32
    %c0_i32_0 = arith.constant 0 : i32
    %c0_i32_1 = arith.constant 0 : i32
    return %c0_i32, %c0_i32_0 : i32, i32
  }
  func.func @transform_7(%arg0: i32) -> (i32, i32) {
    %c0_i32 = arith.constant 0 : i32
    %c0_i32_0 = arith.constant 0 : i32
    %c0_i32_1 = arith.constant 0 : i32
    return %c0_i32, %c0_i32_0 : i32, i32
  }
  func.func @transform_8(%arg0: i32) -> (i32, i32) {
    %c0_i32 = arith.constant 0 : i32
    %c0_i32_0 = arith.constant 0 : i32
    %c0_i32_1 = arith.constant 0 : i32
    return %c0_i32, %c0_i32_0 : i32, i32
  }
  func.func @transform_9(%arg0: i32) -> (i32, i32, i32) {
    %c0_i32 = arith.constant 0 : i32
    %c0_i32_0 = arith.constant 0 : i32
    %c0_i32_1 = arith.constant 0 : i32
    %c0_i32_2 = arith.constant 0 : i32
    return %c0_i32, %c0_i32_0, %c0_i32_1 : i32, i32, i32
  }
  func.func @transform_10(%arg0: i32) -> (i32, i32) {
    %c0_i32 = arith.constant 0 : i32
    %c0_i32_0 = arith.constant 0 : i32
    %c0_i32_1 = arith.constant 0 : i32
    return %c0_i32, %c0_i32_0 : i32, i32
  }
  func.func @transform_11(%arg0: i32) -> (i32, i32) {
    %c0_i32 = arith.constant 0 : i32
    %c0_i32_0 = arith.constant 0 : i32
    %c0_i32_1 = arith.constant 0 : i32
    return %c0_i32, %c0_i32_0 : i32, i32
  }
  func.func @transform_12(%arg0: i32) -> (i32, i32) {
    %c0_i32 = arith.constant 0 : i32
    %c0_i32_0 = arith.constant 0 : i32
    %c0_i32_1 = arith.constant 0 : i32
    return %c0_i32, %c0_i32_0 : i32, i32
  }
  func.func @transform_13(%arg0: i32) -> (i32, i32) {
    %c0_i32 = arith.constant 0 : i32
    %c0_i32_0 = arith.constant 0 : i32
    %c0_i32_1 = arith.constant 0 : i32
    return %c0_i32, %c0_i32_0 : i32, i32
  }
  func.func @transform_14(%arg0: i32) -> (i32, i32) {
    %c0_i32 = arith.constant 0 : i32
    %c0_i32_0 = arith.constant 0 : i32
    %c0_i32_1 = arith.constant 0 : i32
    return %c0_i32, %c0_i32_0 : i32, i32
  }
  func.func @transform_15(%arg0: i32) -> (i32, i32, i32) {
    %c0_i32 = arith.constant 0 : i32
    %c0_i32_0 = arith.constant 0 : i32
    %c0_i32_1 = arith.constant 0 : i32
    return %arg0, %c0_i32, %c0_i32_0 : i32, i32, i32
  }
}

</mosaic_0001>

<bundles_post_ra>
// kernel: lenet_forward.1
= control target key start
LH: loop header
LB: loop body
LE: loop exit
PB: predicated region body
PF: predicated region fallthrough
CT: control target
= control target key end

     0   :  { %s8232_s0 = inlined_call_operand.vmem [shape: f32[2,30,30], index: 0, kind: input, shape index: {}]   ;;  %s8233_s1 = inlined_call_operand.hbm [shape: f32[9,28,168], index: 1, kind: input, shape index: {}]   ;;  %s8234_s2 = inlined_call_operand.hbm [shape: f32[1,168], index: 2, kind: input, shape index: {}]   ;;  %s8235_s3 = inlined_call_operand.hbm [shape: f32[14,27], index: 3, kind: input, shape index: {}]   ;;  %s8236_s4 = inlined_call_operand.hbm [shape: f32[167,84], index: 4, kind: input, shape index: {}]   ;;  %s8237_s5 = inlined_call_operand.hbm [shape: f32[25,80,160], index: 5, kind: input, shape index: {}]   ;;  %s8238_s6 = inlined_call_operand.hbm [shape: f32[1,160], index: 6, kind: input, shape index: {}]   ;;  %s8239_s7 = inlined_call_operand.hbm [shape: f32[5,9], index: 7, kind: input, shape index: {}]   ;;  %s8240_s8 = inlined_call_operand.hbm [shape: f32[159,80], index: 8, kind: input, shape index: {}]   ;;  %s8241_s9 = inlined_call_operand.hbm [shape: f32[5,80,120], index: 9, kind: input, shape index: {}]   ;;  %s8242_s10 = inlined_call_operand.hbm [shape: f32[1,120], index: 10, kind: input, shape index: {}]   ;;  %s8243_s11 = inlined_call_operand.vmem [shape: f32[120,84], index: 11, kind: input, shape index: {}]   ;;  %s8244_s12 = inlined_call_operand.hbm [shape: f32[1,84], index: 12, kind: input, shape index: {}]   ;;  %s8245_s13 = inlined_call_operand.hbm [shape: f32[84,128], index: 13, kind: input, shape index: {}]   ;;  %s8246_s14 = inlined_call_operand.hbm [shape: f32[1,128], index: 14, kind: input, shape index: {}]   ;;  %s8247_s15 = inlined_call_operand.hbm [shape: f32[2,1,128], index: 15, kind: output, shape index: {}]  }
   0x1   :  { %8267 = sst [smem:[#allocation51_spill]] %s8233_s1 }
   0x2   :  { %8268 = sst [smem:[#allocation52_spill]] %s8234_s2 }
   0x3   :  { %8269 = sst [smem:[#allocation53_spill]] %s8236_s4 }
   0x4   :  { %8270 = sst [smem:[#allocation54_spill]] %s8238_s6 }
   0x5   :  { %8271 = sst [smem:[#allocation55_spill]] %s8240_s8 }
   0x6   :  { %20 = vsyncpa [#allocation3], 0 }
   0x7   :  { %21 = vsyncpa [#allocation6], 0 }
   0x8   :  { %22 = vsyncpa [#allocation9], 0 }
   0x9   :  { %23 = vsyncpa [#allocation12], 0 }
   0xa   :  { %24 = vsyncpa [#allocation15], 0 }
   0xb   :  { %25 = vsyncpa [#allocation18], 0 }
   0xc   :  { %26 = vsyncpa [#allocation21], 0 }
   0xd   :  { %27 = vsyncpa [#allocation4], 0 }
   0xe   :  { %29 = vsyncpa [#allocation4 + $0x1], 0  ;;  %s7020_s18 = smov 0   ;;  %s7022_s19 = smov 0  }
   0xf   :  { %s7024_s20 = smov 0   ;;  %s7026_s21 = smov 0  }
  0x10 LB: > { %8272 = sst [smem:[#allocation32_spill]] %s6902_s18  ;;  %s7041_s22 = sadd.s32 4294967295, %s6914_s21   ;;  %s6914_s21 = sphi %s7026_s21, %s8346_s21   ;;  %s6910_s20 = sphi %s7024_s20, %s8348_s20   ;;  %s6906_s19 = sphi %s7022_s19, %s8350_s19   ;;  %s6902_s18 = sphi %s7020_s18, %s8349_s18  }
  0x11   : > { %8273 = sst [smem:[#allocation33_spill]] %s6910_s20  ;;  %s5892_s23 = sadd.s32 4294967294, %s6914_s21  }
  0x12   : > { %s7045_s24 = sadd.s32 1, %s6914_s21   ;;  %s362_s25 = sadd.s32 1, %s6910_s20 }
  0x13   : > { %8274 = sst [smem:[#allocation34_spill]] %s7045_s24  ;;  %s359_s26 = ssub.s32 %s6914_s21, %s7045_s24 }
  0x14   : > { %p372_p0 = scmp.ne.s32.totalorder %s6910_s20, %s6906_s19  ;;  %p360_p1 = scmp.eq.s32.totalorder %s359_s26, 0 }
  0x15   : > { %p373_p2 = scmp.eq.s32.totalorder %s7041_s22, 1  ;;  %p378_p3 = scmp.ne.s32.totalorder %s6906_s19, %s6902_s18 }
  0x16   : > { %p379_p4 = scmp.eq.s32.totalorder %s5892_s23, 1  ;;  %p5893_p7 = scmp.ge.s32.totalorder %s6914_s21, 1 }
  0x17   : > { %s7056_s27 = scalar_select %p360_p1, %s6910_s20, %s362_s25  }
  0x18   : > { %p7058_p5 = por %p373_p2, %p372_p0  ;;  %p7062_p6 = por %p379_p4, %p378_p3 }
  0x19   : > { %8275 = sst [smem:[#allocation35_spill]] %s7056_s27  ;;  %p386_p8 = scmp.lt.s32.totalorder %s6914_s21, 3 }
  0x1a   : > { %s8276_s28 = scalar_select %p7058_p5, 1, 0 }
  0x1b   : > { %s8277_s29 = scalar_select %p7062_p6, 1, 0 }
  0x1c   : > { %p8252_p9 = scmp.eq.s32.totalorder %s7041_s22, 0  ;;  %p7069_p10 = pnand %p5893_p7, %p386_p8 }
  0x1d   : > { %8278 = sst [smem:[#allocation36_spill]] %s8277_s29  ;;  %s6916_s16 = smov [#allocation5]  }
  0x1e   : > { %s8279_s30 = scalar_select %p7069_p10, 1, 0 }
  0x1f   : > { %s412_s17 = sshll.u32 %s6916_s16, 4  ;;  %p6362_p11 = pneg %p7069_p10  ;;  %s413_s17 = int_to_ptr.vmem [resolvable:$true] %s412_s17 }
  0x20   : > { %s6917_s25 = smov [#allocation8]   ;;  %s6918_s27 = smov [#allocation11]  }
  0x21   : > { %p7077_p12 = pnand %p8252_p9, %p6362_p11  ;;  %s435_s26 = sshll.u32 %s6917_s25, 4  ;;  %s436_s26 = int_to_ptr.vmem [resolvable:$true] %s435_s26 }
  0x22   : > { %s462_s20 = sshll.u32 %s6918_s27, 4  ;;  %s6499_s16 = scalar_lea.vmem %s413_s17, 32  ;;  %s463_s20 = int_to_ptr.vmem [resolvable:$true] %s462_s20 }
  0x23   : > { %p7083_p13 = pneg %p7077_p12  ;;  %p6500_p0 = scmp.ne.s32.totalorder %s413_s17, %s6499_s16 }
  0x24   : > { %p6507_p3 = scmp.lt.s32.totalorder %s413_s17, %s413_s17  ;;  %p6508_p4 = scmp.lt.s32.totalorder %s6499_s16, %s6499_s16 }
  0x25   : > { %p6502_p1 = pnand %p6500_p0, %p7083_p13 }
  0x26   : > { %p6509_p7 = por %p6508_p4, %p6507_p3 }
  0x27   : > { %p6503_p2 = pneg %p6502_p1 }
  0x29   : > { %p6510_p8 = pnand %p6509_p7, %p6503_p2 }
  0x2b   : > { %6513 = shalt.err (!%p6510_p8)
}
  0x2c   : > { %s8282_s2 = sld [smem:[#allocation52_spill]]  ;;  %s6525_s29 = scalar_lea.vmem %s436_s26, 2688 }
  0x2d   : > { %p6526_p11 = scmp.ne.s32.totalorder %s436_s26, %s6525_s29  ;;  %p6533_p5 = scmp.lt.s32.totalorder %s436_s26, %s436_s26 }
  0x2e   : > { %p6534_p0 = scmp.lt.s32.totalorder %s6525_s29, %s6525_s29 }
  0x2f   : > { %p6528_p9 = pnand %p6526_p11, %p7083_p13 }
  0x30   : > { %p6535_p1 = por %p6534_p0, %p6533_p5 }
  0x31   : > { %p6529_p6 = pneg %p6528_p9 }
  0x32   : > { %6368 = dma.hbm_to_vmem [thread:$0]  (!%p7077_p12), %s8282_s2, 32, %s413_s17, [#allocation6]  }
  0x33   : > { %p6536_p10 = pnand %p6535_p1, %p6529_p6 }
  0x35   : > { %6539 = shalt.err (!%p6536_p10)
}
  0x36   : > { %s8256_s16 = smov 128   ;;  %s8258_s18 = smov 8  }
  0x37   : > { %s8283_s4 = sld [smem:[#allocation53_spill]]  ;;  %s6551_s27 = scalar_lea.vmem %s463_s20, 32 }
  0x38   : > { %p6552_p9 = scmp.ne.s32.totalorder %s463_s20, %s6551_s27  ;;  %p6559_p6 = scmp.lt.s32.totalorder %s463_s20, %s463_s20 }
  0x39   : > { %p6560_p10 = scmp.lt.s32.totalorder %s6551_s27, %s6551_s27 }
  0x3a   : > { %p6554_p2 = pnand %p6552_p9, %p7083_p13 }
  0x3b   : > { %p6561_p3 = por %p6560_p10, %p6559_p6 }
  0x3c   : > { %p6555_p5 = pneg %p6554_p2 }
  0x3d   : > { %6374 = dma.hbm_to_vmem [thread:$0]  (!%p7077_p12), %s8283_s4, 2688, %s436_s26, [#allocation9], %s8256_s16, %s8256_s16, %s8258_s18  }
  0x3e   : > { %p6562_p4 = pnand %p6561_p3, %p6555_p5 }
  0x40   : > { %6565 = shalt.err (!%p6562_p4)
}
  0x41   : > { %s8284_s6 = sld [smem:[#allocation54_spill]]  ;;  %s6921_s25 = smov [#allocation14]  }
  0x42   : > { %s483_s26 = sshll.u32 %s6921_s25, 4  ;;  %s6922_s17 = smov [#allocation17]   ;;  %s484_s26 = int_to_ptr.vmem [resolvable:$true] %s483_s26 }
  0x43   : > { %s510_s16 = sshll.u32 %s6922_s17, 4  ;;  %s6577_s18 = scalar_lea.vmem %s484_s26, 2560  ;;  %s511_s16 = int_to_ptr.vmem [resolvable:$true] %s510_s16 }
  0x44   : > { %p6578_p7 = scmp.ne.s32.totalorder %s484_s26, %s6577_s18  ;;  %p6585_p0 = scmp.lt.s32.totalorder %s484_s26, %s484_s26 }
  0x45   : > { %p6586_p1 = scmp.lt.s32.totalorder %s6577_s18, %s6577_s18 }
  0x46   : > { %p6580_p8 = pnand %p6578_p7, %p7083_p13 }
  0x47   : > { %6380 = dma.hbm_to_vmem [thread:$0]  (!%p7077_p12), %s8284_s6, 32, %s463_s20, [#allocation12]  }
  0x48   : > { %p6581_p11 = pneg %p6580_p8  ;;  %p6587_p9 = por %p6586_p1, %p6585_p0 }
  0x4a   : > { %p6588_p2 = pnand %p6587_p9, %p6581_p11 }
  0x4c   : > { %6591 = shalt.err (!%p6588_p2)
}
  0x4d   : > { %s8285_s2 = smov 8   ;;  %s8286_s27 = smov 128  }
  0x4e   : > { %s8287_s8 = sld [smem:[#allocation55_spill]]  ;;  %s6603_s25 = scalar_lea.vmem %s511_s16, 16 }
  0x4f   : > { %p6604_p5 = scmp.ne.s32.totalorder %s511_s16, %s6603_s25  ;;  %s6610_s18 = scalar_lea.vmem %s511_s16, 32 }
  0x50   : > { %p6611_p3 = scmp.lt.s32.totalorder %s511_s16, %s511_s16  ;;  %p6612_p4 = scmp.lt.s32.totalorder %s6610_s18, %s6603_s25 }
  0x51   : > { %p6606_p6 = pnand %p6604_p5, %p7083_p13 }
  0x52   : > { %p6613_p7 = por %p6612_p4, %p6611_p3 }
  0x53   : > { %p6607_p10 = pneg %p6606_p6 }
  0x54   : > { %6386 = dma.hbm_to_vmem [thread:$0]  (!%p7077_p12), %s8287_s8, 2560, %s484_s26, [#allocation15], %s8286_s27, %s8286_s27, %s8285_s2  }
  0x55   : > { %p6614_p8 = pnand %p6613_p7, %p6607_p10 }
  0x57   : > { %6617 = shalt.err (!%p6614_p8)
}
  0x58   : > { %6392 = dma.hbm_to_vmem [thread:$0]  (!%p7077_p12), %s8242_s10, 16, %s511_s16, [#allocation18]  }
  0x59   : > { %s6923_s26 = smov [#allocation20]   ;;  %s6924_s29 = smov [#allocation2]  }
  0x5a   : > { %s534_s20 = sshll.u32 %s6923_s26, 4  ;;  %s398_s6 = sshll.u32 %s6924_s29, 4  ;;  %s535_s20 = int_to_ptr.vmem [resolvable:$true] %s534_s20  ;;  %s399_s6 = int_to_ptr.vmem [resolvable:$true] %s398_s6 }
  0x5b   : > { %s6629_s8 = scalar_lea.vmem %s535_s20, 1408  ;;  %p6637_p9 = scmp.lt.s32.totalorder %s535_s20, %s535_s20 }
  0x5c   : > { %p6630_p11 = scmp.ne.s32.totalorder %s535_s20, %s6629_s8  ;;  %p6638_p2 = scmp.lt.s32.totalorder %s6629_s8, %s6629_s8 }
  0x5e   : > { %p6632_p0 = pnand %p6630_p11, %p7083_p13  ;;  %p6639_p5 = por %p6638_p2, %p6637_p9 }
  0x60   : > { %p6633_p1 = pneg %p6632_p0 }
  0x62   : > { %p6640_p6 = pnand %p6639_p5, %p6633_p1 }
  0x64   : > { %6643 = shalt.err (!%p6640_p6)
}
  0x65   : > { %6398 = dma.hbm_to_vmem [thread:$0]  (!%p7077_p12), %s8245_s13, 1408, %s535_s20, [#allocation21], %s8286_s27, %s8286_s27, %s8285_s2  }
  0x66   : > { %s6655_s25 = scalar_lea.vmem %s399_s6, 9216  ;;  %p6663_p7 = scmp.lt.s32.totalorder %s399_s6, %s399_s6 }
  0x67   : > { %p6656_p10 = scmp.ne.s32.totalorder %s399_s6, %s6655_s25  ;;  %p6664_p8 = scmp.lt.s32.totalorder %s6655_s25, %s6655_s25 }
  0x69   : > { %p6658_p3 = pnand %p6656_p10, %p7083_p13  ;;  %p6665_p11 = por %p6664_p8, %p6663_p7 }
  0x6b   : > { %p6659_p4 = pneg %p6658_p3 }
  0x6d   : > { %p6666_p0 = pnand %p6665_p11, %p6659_p4 }
  0x6f   : > { %6669 = shalt.err (!%p6666_p0)
}
  0x70   : > { %s6925_s8 = smov 256   ;;  %s6926_s18 = smov 16  }
  0x71   : > { %s8288_s1 = sld [smem:[#allocation51_spill]]  ;;  %s6927_s20 = smov [#allocation7]  }
  0x72   : > { %s422_s29 = sshll.u32 %s6927_s20, 4  ;;  %s6928_s4 = smov [#allocation10]   ;;  %s423_s29 = int_to_ptr.vmem [resolvable:$true] %s422_s29 }
  0x73   : > { %s448_s16 = sshll.u32 %s6928_s4, 4  ;;  %s6681_s25 = scalar_lea.vmem %s423_s29, 256  ;;  %s449_s16 = int_to_ptr.vmem [resolvable:$true] %s448_s16 }
  0x74   : > { %p6682_p1 = scmp.ne.s32.totalorder %s423_s29, %s6681_s25  ;;  %p6689_p5 = scmp.lt.s32.totalorder %s423_s29, %s423_s29 }
  0x75   : > { %p6690_p6 = scmp.lt.s32.totalorder %s6681_s25, %s6681_s25 }
  0x76   : > { %p6684_p9 = pnand %p6682_p1, %p7083_p13 }
  0x77   : > { %6365 = dma.hbm_to_vmem [thread:$0]  (!%p7077_p12), %s8288_s1, 9216, %s399_s6, [#allocation3], %s6925_s8, %s6925_s8, %s6926_s18  }
  0x78   : > { %p6685_p2 = pneg %p6684_p9  ;;  %p6691_p10 = por %p6690_p6, %p6689_p5 }
  0x7a   : > { %p6692_p3 = pnand %p6691_p10, %p6685_p2 }
  0x7c   : > { %6695 = shalt.err (!%p6692_p3)
}
  0x7d   : > { %6371 = dma.hbm_to_vmem [thread:$0]  (!%p7077_p12), %s8235_s3, 256, %s423_s29, [#allocation6], %s8286_s27, %s8286_s27, %s8285_s2  }
  0x7e   : > { %s6707_s26 = scalar_lea.vmem %s449_s16, 64000  ;;  %p6715_p11 = scmp.lt.s32.totalorder %s449_s16, %s449_s16 }
  0x7f   : > { %p6708_p4 = scmp.ne.s32.totalorder %s449_s16, %s6707_s26  ;;  %p6716_p0 = scmp.lt.s32.totalorder %s6707_s26, %s6707_s26 }
  0x81   : > { %p6710_p7 = pnand %p6708_p4, %p7083_p13  ;;  %p6717_p1 = por %p6716_p0, %p6715_p11 }
  0x83   : > { %p6711_p8 = pneg %p6710_p7 }
  0x85   : > { %p6718_p9 = pnand %p6717_p1, %p6711_p8 }
  0x87   : > { %6721 = shalt.err (!%p6718_p9)
}
  0x88   : > { %6377 = dma.hbm_to_vmem [thread:$0]  (!%p7077_p12), %s8237_s5, 64000, %s449_s16, [#allocation9], %s6925_s8, %s6925_s8, %s6926_s18  }
  0x89   : > { %s6929_s29 = smov [#allocation13]   ;;  %s6930_s6 = smov [#allocation16]  }
  0x8a   : > { %s473_s25 = sshll.u32 %s6929_s29, 4  ;;  %s496_s17 = sshll.u32 %s6930_s6, 4  ;;  %s474_s25 = int_to_ptr.vmem [resolvable:$true] %s473_s25  ;;  %s497_s17 = int_to_ptr.vmem [resolvable:$true] %s496_s17 }
  0x8b   : > { %s6733_s1 = scalar_lea.vmem %s474_s25, 128  ;;  %p6741_p10 = scmp.lt.s32.totalorder %s474_s25, %s474_s25 }
  0x8c   : > { %p6734_p2 = scmp.ne.s32.totalorder %s474_s25, %s6733_s1  ;;  %p6742_p3 = scmp.lt.s32.totalorder %s6733_s1, %s6733_s1 }
  0x8e   : > { %p6736_p5 = pnand %p6734_p2, %p7083_p13  ;;  %p6743_p4 = por %p6742_p3, %p6741_p10 }
  0x90   : > { %p6737_p6 = pneg %p6736_p5 }
  0x92   : > { %p6744_p7 = pnand %p6743_p4, %p6737_p6 }
  0x94   : > { %6747 = shalt.err (!%p6744_p7)
}
  0x95   : > { %6383 = dma.hbm_to_vmem [thread:$0]  (!%p7077_p12), %s8239_s7, 128, %s474_s25, [#allocation12]  }
  0x96   : > { %s6759_s8 = scalar_lea.vmem %s497_s17, 6400  ;;  %p6767_p1 = scmp.lt.s32.totalorder %s497_s17, %s497_s17 }
  0x97   : > { %p6760_p8 = scmp.ne.s32.totalorder %s497_s17, %s6759_s8  ;;  %p6768_p9 = scmp.lt.s32.totalorder %s6759_s8, %s6759_s8 }
  0x99   : > { %p6762_p11 = pnand %p6760_p8, %p7083_p13  ;;  %p6769_p2 = por %p6768_p9, %p6767_p1 }
  0x9b   : > { %p6763_p0 = pneg %p6762_p11 }
  0x9d   : > { %p6770_p5 = pnand %p6769_p2, %p6763_p0 }
  0x9f   : > { %6773 = shalt.err (!%p6770_p5)
}
  0xa0   : > { %6389 = dma.hbm_to_vmem [thread:$0]  (!%p7077_p12), %s8241_s9, 6400, %s497_s17, [#allocation15], %s8286_s27, %s8286_s27, %s8285_s2  }
  0xa1   : > { %s6931_s16 = smov [#allocation19]   ;;  %s6932_s29 = smov [#allocation22]  }
  0xa2   : > { %s524_s4 = sshll.u32 %s6931_s16, 4  ;;  %s548_s25 = sshll.u32 %s6932_s29, 4  ;;  %s525_s4 = int_to_ptr.vmem [resolvable:$true] %s524_s4  ;;  %s549_s25 = int_to_ptr.vmem [resolvable:$true] %s548_s25 }
  0xa3   : > { %s6785_s6 = scalar_lea.vmem %s525_s4, 16  ;;  %s6792_s26 = scalar_lea.vmem %s525_s4, 32 }
  0xa4   : > { %p6786_p6 = scmp.ne.s32.totalorder %s525_s4, %s6785_s6  ;;  %p6793_p4 = scmp.lt.s32.totalorder %s525_s4, %s525_s4 }
  0xa5   : > { %p6794_p7 = scmp.lt.s32.totalorder %s6792_s26, %s6785_s6 }
  0xa6   : > { %p6788_p10 = pnand %p6786_p6, %p7083_p13 }
  0xa7   : > { %p6795_p8 = por %p6794_p7, %p6793_p4 }
  0xa8   : > { %p6789_p3 = pneg %p6788_p10 }
  0xaa   : > { %p6796_p11 = pnand %p6795_p8, %p6789_p3 }
  0xac   : > { %6799 = shalt.err (!%p6796_p11)
}
  0xad   : > { %6395 = dma.hbm_to_vmem [thread:$0]  (!%p7077_p12), %s8244_s12, 16, %s525_s4, [#allocation18]  }
  0xae   : > { %s6811_s27 = scalar_lea.vmem %s549_s25, 16  ;;  %s6818_s17 = scalar_lea.vmem %s549_s25, 32 }
  0xaf   : > { %p6812_p0 = scmp.ne.s32.totalorder %s549_s25, %s6811_s27  ;;  %p6819_p2 = scmp.lt.s32.totalorder %s549_s25, %s549_s25 }
  0xb0   : > { %p6820_p5 = scmp.lt.s32.totalorder %s6818_s17, %s6811_s27 }
  0xb1   : > { %p6814_p1 = pnand %p6812_p0, %p7083_p13 }
  0xb2   : > { %p6821_p6 = por %p6820_p5, %p6819_p2 }
  0xb3   : > { %p6815_p9 = pneg %p6814_p1 }
  0xb5   : > { %p6822_p10 = pnand %p6821_p6, %p6815_p9 }
  0xb7   : > { %6825 = shalt.err (!%p6822_p10)
}
  0xb8   : > { %6401 = dma.hbm_to_vmem [thread:$0]  (!%p7077_p12), %s8246_s14, 16, %s549_s25, [#allocation21]  }
  0xb9   : > { %p8289_p3 = scmp.ne.s32.totalorder %s8279_s30, 0 }
  0xbb   : > { %569 = sbr.rel (%p8289_p3) target bundleno = 2802 (0xaf2), region = 80 }
  0xc0   : > { %p8290_p4 = scmp.eq.s32.totalorder %s7041_s22, 0 }
  0xc2   : > { %6869 = dma.done.wait (%p8290_p4), [#allocation3], 9216   ;;  %p8291_p13 = pmov %p8290_p4 }
  0xc3   : > { %p8292_p7 = pmov %p8290_p4 }
  0xc4   : > { %6871 = vsyncadd (%p8291_p13), [#allocation3], 4294958080 }
  0xc5   : > { %6873 = dma.done.wait (%p8292_p7), [#allocation6], 288   ;;  %p8293_p8 = pmov %p8290_p4 }
  0xc6   : > { %p8294_p11 = pmov %p8290_p4 }
  0xc7   : > { %6875 = vsyncadd (%p8293_p8), [#allocation6], 4294967008 }
  0xc8   : > { %6877 = dma.done.wait (%p8294_p11), [#allocation9], 66688   ;;  %p8295_p12 = pmov %p8290_p4 }
  0xc9   : > { %p8296_p0 = pmov %p8290_p4 }
  0xca   : > { %6879 = vsyncadd (%p8295_p12), [#allocation9], 4294900608 }
  0xcb   : > { %6881 = dma.done.wait (%p8296_p0), [#allocation12], 160   ;;  %p8297_p1 = pmov %p8296_p0 }
  0xcc   : > { %p8298_p9 = pmov %p8296_p0 }
  0xcd   : > { %6883 = vsyncadd (%p8297_p1), [#allocation12], 4294967136 }
  0xce   : > { %6885 = dma.done.wait (%p8298_p9), [#allocation15], 8960   ;;  %p8299_p2 = pmov %p8296_p0 }
  0xcf   : > { %p8300_p5 = pmov %p8296_p0 }
  0xd0   : > { %6887 = vsyncadd (%p8299_p2), [#allocation15], 4294958336 }
  0xd1   : > { %6889 = dma.done.wait (%p8300_p5), [#allocation18], 32   ;;  %p8301_p6 = pmov %p8296_p0 }
  0xd2   : > { %p8302_p10 = pmov %p8296_p0 }
  0xd3   : > { %6891 = vsyncadd (%p8301_p6), [#allocation18], 4294967264 }
  0xd4   : > { %6893 = dma.done.wait (%p8302_p10), [#allocation21], 1424   ;;  %p8303_p3 = pmov %p8296_p0 }
  0xd5   : > { %p664_p4 = scmp.lt.s32.totalorder %s7041_s22, 1  ;;  %v8260_v0 = vmov 0.0   ;;  %vm694_vm0 = vcmask 1046528   ;;  %vm711_vm1 = vcmask 1043456   ;;  %s6934_s4 = smov 127   ;;  %v687_v12 = vld [vmem:[#allocation2 + $0x68] sm:$0xff] }
  0xd6   : > { %6895 = vsyncadd (%p8303_p3), [#allocation21], 4294965872  ;;  %782 = vmatprep.mubr.f32.mxu0 %v8260_v0  ;;  %885 = vmatprep.mubr.f32.mxu1 %v8260_v0  ;;  %v689_v9 = vld [vmem:[#allocation2 + $0x78] sm:$0xf]  ;;  %v688_v11 = vld [vmem:[#allocation2 + $0x70] sm:$0xf] }
  0xd7   : > { %s665_s24 = scalar_select %p664_p4, %s7041_s22, 1  ;;  %5924 = vmatprep.subr.msk.mxu0 %vm711_vm1, %v689_v9  ;;  %v686_v14 = vld [vmem:[#allocation2 + $0x60] sm:$0xff]  ;;  %v685_v15 = vld [vmem:[#allocation2 + $0x58] sm:$0xff]  ;;  %v679_v17 = vld [vmem:[#allocation2 + $0x30] sm:$0xf]  ;;  %vm919_vm2 = vcmask 1045504  }
  0xd8   : > { %5925 = vmatpush1.msk.msra.mxu0 %vm711_vm1, %v688_v11  ;;  %v680_v16 = vld [vmem:[#allocation2 + $0x38] sm:$0xf]  ;;  %v678_v18 = vld [vmem:[#allocation2 + $0x28] sm:$0xff]  ;;  %v684_v20 = vld [vmem:[#allocation2 + $0x50] sm:$0xff]  ;;  %vm702_vm3 = vcmask 228352   ;;  %s6935_s29 = smov 126  }
  0xd9   : > { %s6051_s30 = sshll.u32 %s665_s24, 5  ;;  %744 = vmatprep.subr.mxu0 %v687_v12  ;;  %5930 = vmatprep.subr.msk.mxu1 %vm711_vm1, %v680_v16  ;;  %v677_v21 = vld [vmem:[#allocation2 + $0x20] sm:$0xff]  ;;  %v683_v22 = vld [vmem:[#allocation2 + $0x48] sm:$0xff]  ;;  %v676_v23 = vld [vmem:[#allocation2 + $0x18] sm:$0xff]  ;;  %vm1896_vm4 = vcmask 1039360   ;;  %vm1926_vm5 = vcmask 1042432  }
  0xda   : > { %s668_s16 = scalar_lea.vmem %s8232_s0, %s6051_s30  ;;  %745 = vmatpush1.msra.mxu0 %v686_v14  ;;  %5931 = vmatpush1.msk.msra.mxu1 %vm711_vm1, %v679_v17  ;;  %v682_v24 = vld [vmem:[#allocation2 + $0x40] sm:$0xff]  ;;  %v675_v25 = vld [vmem:[#allocation2 + $0x10] sm:$0xff]  ;;  %v918_v28 = vld [vmem:[#allocation2 + $0xb8] sm:$0xf]  ;;  %vm1919_vm6 = vcmask 220160   ;;  %vm2031_vm7 = vcmask 318464  }
  0xdb   : > { %v7236_v1 = vld [vmem:[%s668_s16] sm:$0xff]  ;;  %v7238_v2 = vld [vmem:[%s668_s16 + $0x18] sm:$0x3f]  ;;  %v7240_v3 = vld [vmem:[%s668_s16 + $0x8] sm:$0xff]  ;;  %746 = vmatprep.subr.mxu0 %v685_v15  ;;  %847 = vmatprep.subr.mxu1 %v678_v18  ;;  %vm2162_vm8 = vcmask 654336   ;;  %vm2455_vm9 = vcmask 1044480  }
  0xdc   : > { %1047 = vrot.lane.b32.xlu0 %v7236_v1, %s6934_s4  ;;  %1049 = vrot.lane.b32.xlu1 %v7240_v3, %s6934_s4  ;;  %v695_v4 = vrot.slane %v7236_v1, 1  ;;  %v696_v5 = vrot.slane %v7240_v3, 1  ;;  %v7248_v6 = vld [vmem:[%s668_s16 + $0x10] sm:$0xff]  ;;  %v7252_v8 = vrot.slane %v7238_v2, 1  ;;  %v920_v26 = vrot.slane %v7236_v1, 2  ;;  %v916_v30 = vld [vmem:[#allocation2 + $0xa8] sm:$0xff] }
  0xdd   : > { %v698_v7 = vrot.slane %v7248_v6, 1  ;;  %v921_v27 = vrot.slane %v7240_v3, 2  ;;  %747 = vmatpush1.msra.mxu0 %v684_v20  ;;  %848 = vmatpush1.msra.mxu1 %v677_v21  ;;  %v917_v29 = vld [vmem:[#allocation2 + $0xb0] sm:$0xf]  ;;  %v674_v31 = vld [vmem:[#allocation2 + $0x8] sm:$0xff]  ;;  %v923_v33 = vrot.slane %v7248_v6, 2 }
  0xde   : > { %v7255_v10 = vsel %vm694_vm0, %v695_v4, %v696_v5  ;;  %748 = vmatprep.subr.mxu0 %v683_v22  ;;  %849 = vmatprep.subr.mxu1 %v676_v23  ;;  %v673_v34 = vld [vmem:[#allocation2] sm:$0xff]  ;;  %v914_v36 = vld [vmem:[#allocation2 + $0x98] sm:$0xff]  ;;  %v7294_v38 = vrot.slane %v7238_v2, 2  ;;  %v913_v39 = vld [vmem:[#allocation2 + $0x90] sm:$0xff]  ;;  %s6936_s25 = smov 125   ;;  %s6937_s6 = smov 124  }
  0xdf   : > { %v7259_v13 = vsel %vm694_vm0, %v696_v5, %v698_v7  ;;  %v7268_v19 = vsel %vm694_vm0, %v698_v7, %v7252_v8  ;;  %749 = vmatpush1.msra.mxu0 %v682_v24  ;;  %850 = vmatpush1.msra.mxu1 %v675_v25  ;;  %v922_v32 = vsel %vm919_vm2, %v920_v26, %v921_v27  ;;  %v915_v35 = vld [vmem:[#allocation2 + $0xa0] sm:$0xff]  ;;  %v912_v40 = vld [vmem:[#allocation2 + $0x88] sm:$0xff]  ;;  %v1046_v43 = vld [vmem:[#allocation2 + $0xf8] sm:$0xf]  ;;  %vm4918_vm10 = vcmask 1040384   ;;  %p8342_p7 = scmp.ne.s32.totalorder %s8276_s28, 0 }
  0xe0   : > { %1175 = vrot.lane.b32.xlu0 %v7255_v10, %s6934_s4  ;;  %1177 = vrot.lane.b32.xlu1 %v7259_v13, %s6934_s4  ;;  %v924_v37 = vsel %vm919_vm2, %v921_v27, %v923_v33  ;;  %v926_v41 = vsel %vm919_vm2, %v923_v33, %v7294_v38  ;;  %v911_v42 = vld [vmem:[#allocation2 + $0x80] sm:$0xff]  ;;  %v1045_v44 = vld [vmem:[#allocation2 + $0xf0] sm:$0xf]  ;;  %v1044_v45 = vld [vmem:[#allocation2 + $0xe8] sm:$0xff]  ;;  %vm4914_vm11 = vcmask 72704   ;;  %vm5016_vm12 = vcmask 252928  }
  0xe1   : > { %5926 = vmatmul.mubr.msk.f32.vlgmr.msra.gmra.mxu0 %vm702_vm3, %v7255_v10  ;;  %5936 = vmatprep.subr.msk.mxu0 %vm711_vm1, %v918_v28  ;;  %v1174_v46 = vld [vmem:[#allocation2 + $0x138] sm:$0xf]  ;;  %v1043_v47 = vld [vmem:[#allocation2 + $0xe0] sm:$0xff]  ;;  %v1173_v48 = vld [vmem:[#allocation2 + $0x130] sm:$0xf]  ;;  %vm6938_vm13 = vmmov 0  }
  0xe2   : > { %788 = vmatprep.mubr.f32.mxu0 %v8260_v0  ;;  %5937 = vmatpush1.msk.msra.mxu0 %vm711_vm1, %v917_v29  ;;  %v1042_v49 = vld [vmem:[#allocation2 + $0xd8] sm:$0xff]  ;;  %v1041_v50 = vld [vmem:[#allocation2 + $0xd0] sm:$0xff]  ;;  %v1040_v51 = vld [vmem:[#allocation2 + $0xc8] sm:$0xff]  ;;  %vm5534_vm14 = vcmask 982016   ;;  %vm5620_vm15 = vcmask 687104   ;;  %s6939_s24 = smov [#allocation23]  }
  0xe3   : > { %967 = vmatprep.subr.mxu0 %v916_v30  ;;  %851 = vmatprep.subr.mxu1 %v674_v31  ;;  %v1172_v52 = vld [vmem:[#allocation2 + $0x128] sm:$0xff]  ;;  %v1039_v53 = vld [vmem:[#allocation2 + $0xc0] sm:$0xff]  ;;  %v1170_v55 = vld [vmem:[#allocation2 + $0x118] sm:$0xff] }
  0xe4   : > { %1051 = vrot.lane.b32.xlu0 %v7248_v6, %s6934_s4  ;;  %1179 = vrot.lane.b32.xlu1 %v7268_v19, %s6934_s4  ;;  %v1171_v54 = vld [vmem:[#allocation2 + $0x120] sm:$0xff]  ;;  %v1302_v56 = vld [vmem:[#allocation2 + $0x178] sm:$0xf]  ;;  %v1169_v57 = vld [vmem:[#allocation2 + $0x110] sm:$0xff] }
  0xe5   : > { %5927 = vmatmul.mubr.msk.f32.gmra.mxu0 %vm702_vm3, %v7259_v13  ;;  %852 = vmatpush1.msra.mxu1 %v673_v34  ;;  %v1168_v58 = vld [vmem:[#allocation2 + $0x108] sm:$0xff]  ;;  %v1167_v59 = vld [vmem:[#allocation2 + $0x100] sm:$0xff]  ;;  %v1430_v60 = vld [vmem:[#allocation2 + $0x1b8] sm:$0xf] }
  0xe6   : > { %794 = vmatprep.mubr.f32.mxu0 %v8260_v0  ;;  %968 = vmatpush1.msra.mxu0 %v915_v35  ;;  %v1301_v61 = vld [vmem:[#allocation2 + $0x170] sm:$0xf]  ;;  %v1296_v11 = vld [vmem:[#allocation2 + $0x148] sm:$0xff]  ;;  %v1427_v12 = vld [vmem:[#allocation2 + $0x1a0] sm:$0xff] }
  0xe7   : > { %969 = vmatprep.subr.mxu0 %v914_v36  ;;  %5932 = vmatmul.mubr.msk.f32.vlgmr.msra.gmra.mxu1 %vm702_vm3, %v7236_v1  ;;  %v1429_v5 = vld [vmem:[#allocation2 + $0x1b0] sm:$0xf]  ;;  %v1426_v14 = vld [vmem:[#allocation2 + $0x198] sm:$0xff]  ;;  %v1423_v20 = vld [vmem:[#allocation2 + $0x180] sm:$0xff] }
  0xe8   : > { %1053 = vrot.lane.b32.xlu0 %v7238_v2, %s6934_s4  ;;  %1181 = vrot.lane.b32.xlu1 %v7252_v8, %s6934_s4  ;;  %v1297_v7 = vld [vmem:[#allocation2 + $0x150] sm:$0xff]  ;;  %v1558_v18 = vld [vmem:[#allocation2 + $0x1f8] sm:$0xf]  ;;  %v1556_v24 = vld [vmem:[#allocation2 + $0x1e8] sm:$0xff] }
  0xe9   : > { %5928 = vmatmul.mubr.msk.f32.gmra.mxu0 %vm702_vm3, %v7268_v19  ;;  %891 = vmatprep.mubr.f32.mxu1 %v8260_v0  ;;  %v1425_v17 = vld [vmem:[#allocation2 + $0x190] sm:$0xff]  ;;  %v1686_v25 = vld [vmem:[#allocation2 + $0x238] sm:$0xf]  ;;  %v1555_v28 = vld [vmem:[#allocation2 + $0x1e0] sm:$0xff] }
  0xea   : > { %800 = vmatprep.mubr.f32.mxu0 %v8260_v0  ;;  %970 = vmatpush1.msra.mxu0 %v913_v39  ;;  %v1557_v23 = vld [vmem:[#allocation2 + $0x1f0] sm:$0xf]  ;;  %v1554_v30 = vld [vmem:[#allocation2 + $0x1d8] sm:$0xff]  ;;  %v1684_v31 = vld [vmem:[#allocation2 + $0x228] sm:$0xff] }
  0xeb   : > { %971 = vmatprep.subr.mxu0 %v912_v40  ;;  %5933 = vmatmul.mubr.msk.f32.gmra.mxu1 %vm702_vm3, %v7240_v3  ;;  %v1685_v29 = vld [vmem:[#allocation2 + $0x230] sm:$0xf]  ;;  %v1683_v35 = vld [vmem:[#allocation2 + $0x220] sm:$0xff]  ;;  %v1552_v36 = vld [vmem:[#allocation2 + $0x1c8] sm:$0xff] }
  0xec   : > { %1303 = vrot.lane.b32.xlu0 %v922_v32, %s6934_s4  ;;  %1431 = vrot.lane.b32.xlu1 %v7236_v1, %s6935_s29  ;;  %v1300_v1 = vld [vmem:[#allocation2 + $0x168] sm:$0xff]  ;;  %v1553_v34 = vld [vmem:[#allocation2 + $0x1d0] sm:$0xff] }
  0xed   : > { %5929 = vmatmul.mubr.msk.f32.gmra.mxu0 %vm702_vm3, %v7252_v8  ;;  %897 = vmatprep.mubr.f32.mxu1 %v8260_v0 }
  0xee   : > { %972 = vmatpush1.msra.mxu0 %v911_v42  ;;  %1005 = vmatprep.mubr.f32.mxu0 %v8260_v0  ;;  %v1680_v42 = vld [vmem:[#allocation2 + $0x208] sm:$0xff] }
  0xef   : > { %5934 = vmatmul.mubr.msk.f32.gmra.mxu1 %vm702_vm3, %v7248_v6  ;;  %5942 = vmatprep.subr.msk.mxu1 %vm711_vm1, %v1046_v43  ;;  %v1679_v43 = vld [vmem:[#allocation2 + $0x200] sm:$0xff] }
  0xf0   : > { %1305 = vrot.lane.b32.xlu0 %v924_v37, %s6934_s4  ;;  %1433 = vrot.lane.b32.xlu1 %v7240_v3, %s6935_s29 }
  0xf1   : > { %5938 = vmatmul.mubr.msk.f32.vlgmr.msra.gmra.mxu0 %vm702_vm3, %v922_v32  ;;  %903 = vmatprep.mubr.f32.mxu1 %v8260_v0 }
  0xf2   : > { %1011 = vmatprep.mubr.f32.mxu0 %v8260_v0  ;;  %5943 = vmatpush1.msk.msra.mxu1 %vm711_vm1, %v1045_v44 }
  0xf3   : > { %5935 = vmatmul.mubr.msk.f32.gmra.mxu1 %vm702_vm3, %v7238_v2  ;;  %1095 = vmatprep.subr.mxu1 %v1044_v45 }
  0xf4   : > { %1307 = vrot.lane.b32.xlu0 %v926_v41, %s6934_s4  ;;  %1435 = vrot.lane.b32.xlu1 %v7248_v6, %s6935_s29  ;;  %v1298_v6 = vld [vmem:[#allocation2 + $0x158] sm:$0xff] }
  0xf5   : > { %5939 = vmatmul.mubr.msk.f32.gmra.mxu0 %vm702_vm3, %v924_v37  ;;  %5948 = vmatprep.subr.msk.mxu0 %vm711_vm1, %v1174_v46 }
  0xf6   : > { %1017 = vmatprep.mubr.f32.mxu0 %v8260_v0  ;;  %1096 = vmatpush1.msra.mxu1 %v1043_v47 }
  0xf7   : > { %5949 = vmatpush1.msk.msra.mxu0 %vm711_vm1, %v1173_v48  ;;  %1097 = vmatprep.subr.mxu1 %v1042_v49 }
  0xf8   : > { %1309 = vrot.lane.b32.xlu0 %v7294_v38, %s6934_s4  ;;  %1437 = vrot.lane.b32.xlu1 %v7238_v2, %s6935_s29  ;;  %v1299_v2 = vld [vmem:[#allocation2 + $0x160] sm:$0xff] }
  0xf9   : > { %5940 = vmatmul.mubr.msk.f32.gmra.mxu0 %vm702_vm3, %v926_v41  ;;  %1098 = vmatpush1.msra.mxu1 %v1041_v50 }
  0xfa   : > { %1023 = vmatprep.mubr.f32.mxu0 %v8260_v0  ;;  %1099 = vmatprep.subr.mxu1 %v1040_v51 }
  0xfb   : > { %1223 = vmatprep.subr.mxu0 %v1172_v52  ;;  %1100 = vmatpush1.msra.mxu1 %v1039_v53 }
  0xfc   : > { %1559 = vrot.lane.b32.xlu0 %v7255_v10, %s6935_s29  ;;  %1687 = vrot.lane.b32.xlu1 %v922_v32, %s6935_s29 }
  0xfd   : > { %5941 = vmatmul.mubr.msk.f32.gmra.mxu0 %vm702_vm3, %v7294_v38  ;;  %1133 = vmatprep.mubr.f32.mxu1 %v8260_v0 }
  0xfe   : > { %1224 = vmatpush1.msra.mxu0 %v1171_v54  ;;  %1261 = vmatprep.mubr.f32.mxu0 %v8260_v0 }
  0xff   : > { %1225 = vmatprep.subr.mxu0 %v1170_v55  ;;  %5954 = vmatprep.subr.msk.mxu1 %vm711_vm1, %v1302_v56 }
 0x100   : > { %1561 = vrot.lane.b32.xlu0 %v7259_v13, %s6935_s29  ;;  %1689 = vrot.lane.b32.xlu1 %v924_v37, %s6935_s29  ;;  %v1295_v13 = vld [vmem:[#allocation2 + $0x140] sm:$0xff]  ;;  %v1682_v37 = vld [vmem:[#allocation2 + $0x218] sm:$0xff] }
 0x101   : > { %1226 = vmatpush1.msra.mxu0 %v1169_v57 }
 0x102   : > { %1227 = vmatprep.subr.mxu0 %v1168_v58 }
 0x103   : > { %1228 = vmatpush1.msra.mxu0 %v1167_v59 }
 0x104   : > { %1563 = vrot.lane.b32.xlu0 %v7268_v19, %s6935_s29  ;;  %1691 = vrot.lane.b32.xlu1 %v926_v41, %s6935_s29  ;;  %v1424_v19 = vld [vmem:[#allocation2 + $0x188] sm:$0xff]  ;;  %v1681_v41 = vld [vmem:[#allocation2 + $0x210] sm:$0xff] }
 0x105   : > { %5960 = vmatprep.subr.msk.mxu0 %vm711_vm1, %v1430_v60 }
 0x108   : > { %1565 = vrot.lane.b32.xlu0 %v7252_v8, %s6935_s29  ;;  %1693 = vrot.lane.b32.xlu1 %v7294_v38, %s6935_s29  ;;  %v1428_v8 = vld [vmem:[#allocation2 + $0x1a8] sm:$0xff]  ;;  %v1551_v38 = vld [vmem:[#allocation2 + $0x1c0] sm:$0xff] }
 0x14e   : > { %v1048_v62 = vpop.permute.xlu0 %1047  ;;  %v1050_v63 = vpop.permute.xlu1 %1049 }
 0x14f   : > { %5944 = vmatmul.mubr.msk.f32.vlgmr.msra.gmra.mxu1 %vm702_vm3, %v1048_v62 }
 0x150   : > { %1139 = vmatprep.mubr.f32.mxu1 %v8260_v0  ;;  %5955 = vmatpush1.msk.msra.mxu1 %vm711_vm1, %v1301_v61 }
 0x151   : > { %1351 = vmatprep.subr.mxu1 %v1300_v1 }
 0x152   : > { %v1176_v3 = vpop.permute.xlu0 %1175  ;;  %v1178_v4 = vpop.permute.xlu1 %1177  ;;  %1352 = vmatpush1.msra.mxu1 %v1299_v2 }
 0x153   : > { %5945 = vmatmul.mubr.msk.f32.gmra.mxu1 %vm702_vm3, %v1050_v63  ;;  %5950 = vmatmul.mubr.msk.f32.vlgmr.msra.gmra.mxu0 %vm702_vm3, %v1176_v3 }
 0x154   : > { %1145 = vmatprep.mubr.f32.mxu1 %v8260_v0  ;;  %1267 = vmatprep.mubr.f32.mxu0 %v8260_v0 }
 0x155   : > { %5961 = vmatpush1.msk.msra.mxu0 %vm711_vm1, %v1429_v5  ;;  %1353 = vmatprep.subr.mxu1 %v1298_v6 }
 0x156   : > { %v1052_v9 = vpop.permute.xlu0 %1051  ;;  %v1180_v10 = vpop.permute.xlu1 %1179  ;;  %1354 = vmatpush1.msra.mxu1 %v1297_v7  ;;  %1479 = vmatprep.subr.mxu0 %v1428_v8 }
 0x157   : > { %5946 = vmatmul.mubr.msk.f32.gmra.mxu1 %vm702_vm3, %v1052_v9  ;;  %5951 = vmatmul.mubr.msk.f32.gmra.mxu0 %vm702_vm3, %v1178_v4 }
 0x158   : > { %1151 = vmatprep.mubr.f32.mxu1 %v8260_v0  ;;  %1273 = vmatprep.mubr.f32.mxu0 %v8260_v0 }
 0x159   : > { %1355 = vmatprep.subr.mxu1 %v1296_v11  ;;  %1480 = vmatpush1.msra.mxu0 %v1427_v12 }
 0x15a   : > { %v1054_v15 = vpop.permute.xlu0 %1053  ;;  %v1182_v16 = vpop.permute.xlu1 %1181  ;;  %1356 = vmatpush1.msra.mxu1 %v1295_v13  ;;  %1481 = vmatprep.subr.mxu0 %v1426_v14 }
 0x15b   : > { %5947 = vmatmul.mubr.msk.f32.gmra.mxu1 %vm702_vm3, %v1054_v15  ;;  %5952 = vmatmul.mubr.msk.f32.gmra.mxu0 %vm702_vm3, %v1180_v10 }
 0x15c   : > { %1389 = vmatprep.mubr.f32.mxu1 %v8260_v0  ;;  %1279 = vmatprep.mubr.f32.mxu0 %v8260_v0 }
 0x15d   : > { %1482 = vmatpush1.msra.mxu0 %v1425_v17  ;;  %5966 = vmatprep.subr.msk.mxu1 %vm711_vm1, %v1558_v18 }
 0x15e   : > { %v1304_v21 = vpop.permute.xlu0 %1303  ;;  %1483 = vmatprep.subr.mxu0 %v1424_v19  ;;  %v1432_v22 = vpop.permute.xlu1 %1431 }
 0x15f   : > { %5953 = vmatmul.mubr.msk.f32.gmra.mxu0 %vm702_vm3, %v1182_v16  ;;  %5956 = vmatmul.mubr.msk.f32.vlgmr.msra.gmra.mxu1 %vm702_vm3, %v1304_v21 }
 0x160   : > { %1395 = vmatprep.mubr.f32.mxu1 %v8260_v0  ;;  %1484 = vmatpush1.msra.mxu0 %v1423_v20 }
 0x161   : > { %1517 = vmatprep.mubr.f32.mxu0 %v8260_v0  ;;  %5967 = vmatpush1.msk.msra.mxu1 %vm711_vm1, %v1557_v23 }
 0x162   : > { %v1306_v26 = vpop.permute.xlu0 %1305  ;;  %v1434_v27 = vpop.permute.xlu1 %1433  ;;  %1607 = vmatprep.subr.mxu1 %v1556_v24  ;;  %5972 = vmatprep.subr.msk.mxu0 %vm711_vm1, %v1686_v25 }
 0x163   : > { %5957 = vmatmul.mubr.msk.f32.gmra.mxu1 %vm702_vm3, %v1306_v26  ;;  %5962 = vmatmul.mubr.msk.f32.vlgmr.msra.gmra.mxu0 %vm702_vm3, %v1432_v22 }
 0x164   : > { %1401 = vmatprep.mubr.f32.mxu1 %v8260_v0  ;;  %1523 = vmatprep.mubr.f32.mxu0 %v8260_v0 }
 0x165   : > { %1608 = vmatpush1.msra.mxu1 %v1555_v28  ;;  %5973 = vmatpush1.msk.msra.mxu0 %vm711_vm1, %v1685_v29 }
 0x166   : > { %v1308_v32 = vpop.permute.xlu0 %1307  ;;  %v1436_v33 = vpop.permute.xlu1 %1435  ;;  %1609 = vmatprep.subr.mxu1 %v1554_v30  ;;  %1735 = vmatprep.subr.mxu0 %v1684_v31 }
 0x167   : > { %5958 = vmatmul.mubr.msk.f32.gmra.mxu1 %vm702_vm3, %v1308_v32  ;;  %5963 = vmatmul.mubr.msk.f32.gmra.mxu0 %vm702_vm3, %v1434_v27 }
 0x168   : > { %1407 = vmatprep.mubr.f32.mxu1 %v8260_v0  ;;  %1529 = vmatprep.mubr.f32.mxu0 %v8260_v0 }
 0x169   : > { %1610 = vmatpush1.msra.mxu1 %v1553_v34  ;;  %1736 = vmatpush1.msra.mxu0 %v1683_v35 }
 0x16a   : > { %v1310_v39 = vpop.permute.xlu0 %1309  ;;  %1611 = vmatprep.subr.mxu1 %v1552_v36  ;;  %v1438_v40 = vpop.permute.xlu1 %1437  ;;  %1737 = vmatprep.subr.mxu0 %v1682_v37  ;;  %v1808_v37 = vlaneseq }
 0x16b   : > { %5959 = vmatmul.mubr.msk.f32.gmra.mxu1 %vm702_vm3, %v1310_v39  ;;  %5964 = vmatmul.mubr.msk.f32.gmra.mxu0 %vm702_vm3, %v1436_v33 }
 0x16c   : > { %1612 = vmatpush1.msra.mxu1 %v1551_v38  ;;  %1645 = vmatprep.mubr.f32.mxu1 %v8260_v0 }
 0x16d   : > { %1535 = vmatprep.mubr.f32.mxu0 %v8260_v0  ;;  %1738 = vmatpush1.msra.mxu0 %v1681_v41 }
 0x16e   : > { %v1560_v44 = vpop.permute.xlu0 %1559  ;;  %1739 = vmatprep.subr.mxu0 %v1680_v42  ;;  %v1688_v45 = vpop.permute.xlu1 %1687 }
 0x16f   : > { %5965 = vmatmul.mubr.msk.f32.gmra.mxu0 %vm702_vm3, %v1438_v40  ;;  %5968 = vmatmul.mubr.msk.f32.vlgmr.msra.gmra.mxu1 %vm702_vm3, %v1560_v44  ;;  %v7445_v44 = vshrl.u32 %v1808_v37, 7 }
 0x170   : > { %1651 = vmatprep.mubr.f32.mxu1 %v8260_v0  ;;  %1740 = vmatpush1.msra.mxu0 %v1679_v43 }
 0x171   : > { %1773 = vmatprep.mubr.f32.mxu0 %v8260_v0  ;;  %2041 = vmatprep.subr.mxu0 %v8260_v0  ;;  %8307 = vst [vmem:[#allocation40_spill] sm:$0xff] %v7445_v44 }
 0x172   : > { %v1562_v46 = vpop.permute.xlu0 %1561  ;;  %v1690_v47 = vpop.permute.xlu1 %1689 }
 0x173   : > { %5969 = vmatmul.mubr.msk.f32.gmra.mxu1 %vm702_vm3, %v1562_v46  ;;  %5974 = vmatmul.mubr.msk.f32.vlgmr.msra.gmra.mxu0 %vm702_vm3, %v1688_v45 }
 0x174   : > { %1657 = vmatprep.mubr.f32.mxu1 %v8260_v0  ;;  %1779 = vmatprep.mubr.f32.mxu0 %v8260_v0 }
 0x176   : > { %v1564_v48 = vpop.permute.xlu0 %1563  ;;  %v1692_v49 = vpop.permute.xlu1 %1691 }
 0x177   : > { %5970 = vmatmul.mubr.msk.f32.gmra.mxu1 %vm702_vm3, %v1564_v48  ;;  %5975 = vmatmul.mubr.msk.f32.gmra.mxu0 %vm702_vm3, %v1690_v47 }
 0x178   : > { %1663 = vmatprep.mubr.f32.mxu1 %v8260_v0  ;;  %1785 = vmatprep.mubr.f32.mxu0 %v8260_v0 }
 0x17a   : > { %v1566_v50 = vpop.permute.xlu0 %1565  ;;  %v1694_v51 = vpop.permute.xlu1 %1693 }
 0x17b   : > { %5971 = vmatmul.mubr.msk.f32.gmra.mxu1 %vm702_vm3, %v1566_v50  ;;  %5976 = vmatmul.mubr.msk.f32.gmra.mxu0 %vm702_vm3, %v1692_v49 }
 0x17c   : > { %1791 = vmatprep.mubr.f32.mxu0 %v8260_v0  ;;  %1997 = vmatprep.mubr.f32.mxu1 %v8260_v0 }
 0x17f   : > { %5977 = vmatmul.mubr.msk.f32.gmra.mxu0 %vm702_vm3, %v1694_v51 }
 0x1a1   : > { %v784_v52 = vpop.f32.mrf.mxu0 }
 0x1a3   : > { %v7411_v53 = vpop.f32.mrf.mxu0 }
 0x1a5   : > { %v790_v54 = vpop.f32.mrf.mxu0 }
 0x1a7   : > { %v792_v55 = vpop.f32.mrf.mxu0  ;;  %v887_v60 = vpop.f32.mrf.mxu1 }
 0x1a8   : > { %v888_v51 = vadd.f32 %v887_v60, %v784_v52 }
 0x1a9   : > { %v796_v56 = vpop.f32.mrf.mxu0  ;;  %v889_v61 = vpop.f32.mrf.mxu1 }
 0x1aa   : > { %v890_v37 = vadd.f32 %v889_v61, %v7411_v53  ;;  %v8262_v53 = vsub.s32 1, %v7445_v44 }
 0x1ab   : > { %v798_v57 = vpop.f32.mrf.mxu0  ;;  %v893_v63 = vpop.f32.mrf.mxu1 }
 0x1ac   : > { %v894_v38 = vadd.f32 %v893_v63, %v790_v54  ;;  %v8263_v54 = vsub.s32 0, %v7445_v44 }
 0x1ad   : > { %v802_v58 = vpop.f32.mrf.mxu0  ;;  %v895_v2 = vpop.f32.mrf.mxu1 }
 0x1ae   : > { %v896_v41 = vadd.f32 %v895_v2, %v792_v55 }
 0x1af   : > { %v7413_v59 = vpop.f32.mrf.mxu0  ;;  %v899_v4 = vpop.f32.mrf.mxu1 }
 0x1b0   : > { %v900_v46 = vadd.f32 %v899_v4, %v796_v56 }
 0x1b1   : > { %v7415_v62 = vpop.f32.mrf.mxu0  ;;  %v901_v6 = vpop.f32.mrf.mxu1 }
 0x1b2   : > { %v902_v49 = vadd.f32 %v901_v6, %v798_v57 }
 0x1b3   : > { %v7417_v1 = vpop.f32.mrf.mxu0  ;;  %v905_v8 = vpop.f32.mrf.mxu1 }
 0x1b4   : > { %v906_v55 = vadd.f32 %v905_v8, %v802_v58  ;;  %v1031_v8 = vadd.f32 %v7417_v1, %v890_v37 }
 0x1b5   : > { %v1013_v3 = vpop.f32.mrf.mxu0  ;;  %v907_v10 = vpop.f32.mrf.mxu1 }
 0x1b6   : > { %v1032_v45 = vadd.f32 %v1013_v3, %v894_v38  ;;  %v908_v56 = vadd.f32 %v907_v10, %v7413_v59 }
 0x1b7   : > { %v1015_v5 = vpop.f32.mrf.mxu0 }
 0x1b8   : > { %v1033_v0 = vadd.f32 %v1015_v5, %v896_v41  ;;  %v1030_v5 = vadd.f32 %v7415_v62, %v888_v51 }
 0x1b9   : > { %v1019_v7 = vpop.f32.mrf.mxu0 }
 0x1ba   : > { %v1034_v63 = vadd.f32 %v1019_v7, %v900_v46 }
 0x1bb   : > { %v1021_v9 = vpop.f32.mrf.mxu0 }
 0x1bc   : > { %v1035_v57 = vadd.f32 %v1021_v9, %v902_v49 }
 0x1bd   : > { %v7419_v11 = vpop.f32.mrf.mxu0 }
 0x1be   : > { %v1036_v59 = vadd.f32 %v7419_v11, %v906_v55 }
 0x1bf   : > { %v7423_v13 = vpop.f32.mrf.mxu0 }
 0x1c0   : > { %v1037_v9 = vadd.f32 %v7423_v13, %v908_v56 }
 0x20f   : > { %v7421_v12 = vpop.f32.mrf.mxu1 }
 0x210   : > { %v1158_v62 = vadd.f32 %v7421_v12, %v1030_v5 }
 0x211   : > { %v7425_v14 = vpop.f32.mrf.mxu1 }
 0x212   : > { %v1159_v46 = vadd.f32 %v7425_v14, %v1031_v8 }
 0x213   : > { %v1141_v15 = vpop.f32.mrf.mxu1  ;;  %v7427_v16 = vpop.f32.mrf.mxu0 }
 0x214   : > { %v1160_v50 = vadd.f32 %v1141_v15, %v1032_v45  ;;  %v1286_v11 = vadd.f32 %v7427_v16, %v1158_v62 }
 0x215   : > { %v1143_v17 = vpop.f32.mrf.mxu1  ;;  %v7429_v18 = vpop.f32.mrf.mxu0 }
 0x216   : > { %v1161_v3 = vadd.f32 %v1143_v17, %v1033_v0 }
 0x217   : > { %v1147_v19 = vpop.f32.mrf.mxu1  ;;  %v1269_v20 = vpop.f32.mrf.mxu0 }
 0x218   : > { %v1288_v2 = vadd.f32 %v1269_v20, %v1160_v50  ;;  %v1162_v52 = vadd.f32 %v1147_v19, %v1034_v63  ;;  %v1287_v50 = vadd.f32 %v7429_v18, %v1159_v46 }
 0x219   : > { %v1149_v21 = vpop.f32.mrf.mxu1  ;;  %v1271_v22 = vpop.f32.mrf.mxu0 }
 0x21a   : > { %v1289_v6 = vadd.f32 %v1271_v22, %v1161_v3  ;;  %v1163_v0 = vadd.f32 %v1149_v21, %v1035_v57 }
 0x21b   : > { %v1153_v23 = vpop.f32.mrf.mxu1  ;;  %v1275_v24 = vpop.f32.mrf.mxu0 }
 0x21c   : > { %v1290_v61 = vadd.f32 %v1275_v24, %v1162_v52  ;;  %v1164_v20 = vadd.f32 %v1153_v23, %v1036_v59 }
 0x21d   : > { %v7431_v25 = vpop.f32.mrf.mxu1  ;;  %v1277_v26 = vpop.f32.mrf.mxu0 }
 0x21e   : > { %v1291_v22 = vadd.f32 %v1277_v26, %v1163_v0  ;;  %v1165_v21 = vadd.f32 %v7431_v25, %v1037_v9 }
 0x21f   : > { %v7433_v27 = vpop.f32.mrf.mxu0  ;;  %v7435_v28 = vpop.f32.mrf.mxu1 }
 0x220   : > { %v1292_v13 = vadd.f32 %v7433_v27, %v1164_v20  ;;  %v1414_v23 = vadd.f32 %v7435_v28, %v1286_v11 }
 0x221   : > { %v7437_v29 = vpop.f32.mrf.mxu0  ;;  %v7439_v30 = vpop.f32.mrf.mxu1 }
 0x222   : > { %8304 = vst [vmem:[#allocation37_spill] sm:$0xff] %v7439_v30  ;;  %v1806_v30 = vld [vmem:[#allocation5] sm:$0x3]  ;;  %v1293_v26 = vadd.f32 %v7437_v29, %v1165_v21 }
 0x223   : > { %v1397_v31 = vpop.f32.mrf.mxu1  ;;  %v7441_v32 = vpop.f32.mrf.mxu0  ;;  %v7459_v58 = vrot.slane %v1806_v30, %v8263_v54 }
 0x224   : > { %8305 = vst [vmem:[#allocation38_spill] sm:$0xff] %v7441_v32  ;;  %v1416_v60 = vadd.f32 %v1397_v31, %v1288_v2 }
 0x225   : > { %v1399_v33 = vpop.f32.mrf.mxu1  ;;  %v7443_v34 = vpop.f32.mrf.mxu0 }
 0x226   : > { %8306 = vst [vmem:[#allocation39_spill] sm:$0xff] %v7443_v34  ;;  %v1417_v10 = vadd.f32 %v1399_v33, %v1289_v6 }
 0x227   : > { %v1403_v35 = vpop.f32.mrf.mxu1  ;;  %v1525_v36 = vpop.f32.mrf.mxu0 }
 0x228   : > { %v1544_v7 = vadd.f32 %v1525_v36, %v1416_v60  ;;  %v1418_v31 = vadd.f32 %v1403_v35, %v1290_v61 }
 0x229   : > { %v1405_v39 = vpop.f32.mrf.mxu1  ;;  %v1527_v40 = vpop.f32.mrf.mxu0  ;;  %v8308_v55 = vld [vmem:[#allocation37_spill] sm:$0xff] }
 0x22a   : > { %v1545_v24 = vadd.f32 %v1527_v40, %v1417_v10  ;;  %v1419_v49 = vadd.f32 %v1405_v39, %v1291_v22  ;;  %v1415_v2 = vadd.f32 %v8308_v55, %v1287_v50 }
 0x22b   : > { %v1409_v42 = vpop.f32.mrf.mxu1  ;;  %v1531_v43 = vpop.f32.mrf.mxu0  ;;  %v8309_v27 = vld [vmem:[#allocation38_spill] sm:$0xff] }
 0x22c   : > { %v1546_v12 = vadd.f32 %v1531_v43, %v1418_v31  ;;  %v1420_v16 = vadd.f32 %v1409_v42, %v1292_v13  ;;  %v1542_v39 = vadd.f32 %v8309_v27, %v1414_v23  ;;  %v1815_v43 = vrot.slane %v1806_v30, %v8262_v53  ;;  %v2025_v27 = vld [vmem:[#allocation8 + $0x78] sm:$0xff] }
 0x22d   : > { %v7447_v47 = vpop.f32.mrf.mxu1  ;;  %v1533_v48 = vpop.f32.mrf.mxu0  ;;  %v8310_v42 = vld [vmem:[#allocation39_spill] sm:$0xff]  ;;  %2042 = vmatpush1.msra.mxu0 %v2025_v27 }
 0x22e   : > { %v1547_v63 = vadd.f32 %v1533_v48, %v1419_v49  ;;  %v1421_v29 = vadd.f32 %v7447_v47, %v1293_v26  ;;  %v1543_v48 = vadd.f32 %v8310_v42, %v1415_v2  ;;  %v2018_v42 = vld [vmem:[#allocation8 + $0x40] sm:$0xff] }
 0x22f   : > { %v1537_v34 = vpop.f32.mrf.mxu0  ;;  %v7449_v32 = vpop.f32.mrf.mxu1 }
 0x230   : > { %v1548_v56 = vadd.f32 %v1537_v34, %v1420_v16  ;;  %v1670_v52 = vadd.f32 %v7449_v32, %v1542_v39  ;;  %v2024_v39 = vld [vmem:[#allocation8 + $0x70] sm:$0xff] }
 0x231   : > { %v1539_v4 = vpop.f32.mrf.mxu0  ;;  %v7454_v38 = vpop.f32.mrf.mxu1 }
 0x232   : > { %v1549_v59 = vadd.f32 %v1539_v4, %v1421_v29  ;;  %v2022_v29 = vld [vmem:[#allocation8 + $0x60] sm:$0xff] }
 0x233   : > { %v1653_v15 = vpop.f32.mrf.mxu1  ;;  %v1775_v41 = vpop.f32.mrf.mxu0 }
 0x234   : > { %v1672_v45 = vadd.f32 %v1653_v15, %v1544_v7  ;;  %v1671_v7 = vadd.f32 %v7454_v38, %v1543_v48  ;;  %v1798_v8 = vadd.f32 %v1775_v41, %v1670_v52  ;;  %v2017_v48 = vld [vmem:[#allocation8 + $0x38] sm:$0xff]  ;;  %v2016_v52 = vld [vmem:[#allocation8 + $0x30] sm:$0xff] }
 0x235   : > { %v1655_v17 = vpop.f32.mrf.mxu1  ;;  %v1777_v19 = vpop.f32.mrf.mxu0 }
 0x236   : > { %v1673_v35 = vadd.f32 %v1655_v17, %v1545_v24  ;;  %v1799_v20 = vadd.f32 %v1777_v19, %v1671_v7  ;;  %v1818_v11 = vadd.f32 %v7459_v58, %v1798_v8  ;;  %v2028_v7 = vld [vmem:[#allocation8 + $0x90] sm:$0xff] }
 0x237   : > { %v1659_v36 = vpop.f32.mrf.mxu1  ;;  %v1781_v1 = vpop.f32.mrf.mxu0 }
 0x238   : > { %v1800_v33 = vadd.f32 %v1781_v1, %v1672_v45  ;;  %v1674_v25 = vadd.f32 %v1659_v36, %v1546_v12  ;;  %v1819_v13 = vadd.f32 %v1815_v43, %v1799_v20  ;;  %v1826_v50 = vmax.f32 %v1818_v11, 0.0 }
 0x239   : > { %v1661_v14 = vpop.f32.mrf.mxu1  ;;  %v1783_v51 = vpop.f32.mrf.mxu0 }
 0x23a   : > { %v1820_v40 = vadd.f32 %v7459_v58, %v1800_v33  ;;  %v1801_v18 = vadd.f32 %v1783_v51, %v1673_v35  ;;  %v1675_v3 = vadd.f32 %v1661_v14, %v1547_v63  ;;  %v1827_v26 = vmax.f32 %v1819_v13, 0.0  ;;  %v1917_v13 = vld [vmem:[#allocation7] sm:$0xff] }
 0x23b   : > { %v1665_v37 = vpop.f32.mrf.mxu1  ;;  %v1787_v28 = vpop.f32.mrf.mxu0  ;;  %v1842_v51 = vrot.slane %v1826_v50, 1 }
 0x23c   : > { %v1802_v57 = vadd.f32 %v1787_v28, %v1674_v25  ;;  %v1828_v60 = vmax.f32 %v1820_v40, 0.0  ;;  %v1821_v5 = vadd.f32 %v1815_v43, %v1801_v18  ;;  %v1676_v0 = vadd.f32 %v1665_v37, %v1548_v56  ;;  %v2023_v37 = vld [vmem:[#allocation8 + $0x68] sm:$0xff]  ;;  %v2021_v56 = vld [vmem:[#allocation8 + $0x58] sm:$0xff] }
 0x23d   : > { %v1667_v6 = vpop.f32.mrf.mxu1  ;;  %v1789_v15 = vpop.f32.mrf.mxu0  ;;  %v1845_v25 = vrot.slane %v1827_v26, 1  ;;  %v8311_v18 = vmov 0.0  }
 0x23e   : > { %v1822_v30 = vadd.f32 %v7459_v58, %v1802_v57  ;;  %v1803_v61 = vadd.f32 %v1789_v15, %v1675_v3  ;;  %v1829_v47 = vmax.f32 %v1821_v5, 0.0  ;;  %v1677_v62 = vadd.f32 %v1667_v6, %v1549_v59  ;;  %2043 = vmatprep.subr.mxu0 %v8311_v18  ;;  %v2020_v3 = vld [vmem:[#allocation8 + $0x50] sm:$0xff]  ;;  %v2019_v57 = vld [vmem:[#allocation8 + $0x48] sm:$0xff]  ;;  %v2014_v5 = vld [vmem:[#allocation8 + $0x20] sm:$0xff] }
 0x23f   : > { %v1793_v34 = vpop.f32.mrf.mxu0  ;;  %v1843_v32 = vrot.slane %v1828_v60, 1  ;;  %2044 = vmatpush1.msra.mxu0 %v2024_v39  ;;  %v2013_v6 = vld [vmem:[#allocation8 + $0x18] sm:$0xff]  ;;  %v2012_v15 = vld [vmem:[#allocation8 + $0x10] sm:$0xff]  ;;  %v2011_v59 = vld [vmem:[#allocation8 + $0x8] sm:$0xff] }
 0x240   : > { %v1830_v9 = vmax.f32 %v1822_v30, 0.0  ;;  %v1823_v10 = vadd.f32 %v1815_v43, %v1803_v61  ;;  %v1804_v17 = vadd.f32 %v1793_v34, %v1676_v0  ;;  %v1846_v21 = vrot.slane %v1829_v47, 1  ;;  %2045 = vmatprep.subr.mxu0 %v8311_v18  ;;  %v2010_v0 = vld [vmem:[#allocation8] sm:$0xff]  ;;  %v2029_v61 = vld [vmem:[#allocation8 + $0x98] sm:$0xff] }
 0x241   : > { %v1795_v22 = vpop.f32.mrf.mxu0  ;;  %v1844_v40 = vsel %vm694_vm0, %v1842_v51, %v1843_v32  ;;  %2046 = vmatpush1.msra.mxu0 %v2023_v37  ;;  %v2030_v30 = vld [vmem:[#allocation8 + $0xa0] sm:$0x7f]  ;;  %v2149_v51 = vld [vmem:[#allocation10 + $0x100] sm:$0xff]  ;;  %v2453_v39 = vld [vmem:[#allocation10 + $0x270] sm:$0xff] }
 0x242   : > { %v1848_v31 = vrot.slane %v1830_v9, 1  ;;  %v1831_v45 = vmax.f32 %v1823_v10, 0.0  ;;  %v1824_v4 = vadd.f32 %v7459_v58, %v1804_v17  ;;  %v1805_v46 = vadd.f32 %v1795_v22, %v1677_v62  ;;  %2047 = vmatprep.subr.mxu0 %v8311_v18 }
 0x243   : > { %v1847_v2 = vsel %vm694_vm0, %v1845_v25, %v1846_v21  ;;  %2048 = vmatpush1.msra.mxu0 %v2022_v29  ;;  %v2146_v25 = vld [vmem:[#allocation10 + $0xe8] sm:$0xff]  ;;  %v2450_v29 = vld [vmem:[#allocation10 + $0x258] sm:$0xff] }
 0x244   : > { %v1850_v24 = vrot.slane %v1831_v45, 1  ;;  %v1832_v38 = vmax.f32 %v1824_v4, 0.0  ;;  %v1825_v41 = vadd.f32 %v1815_v43, %v1805_v46  ;;  %v1849_v36 = vsel %vm694_vm0, %v1843_v32, %v1848_v31  ;;  %2049 = vmatprep.subr.mxu0 %v8311_v18 }
 0x245   : > { %v7486_v1 = vmax.f32 %v1828_v60, %v1849_v36  ;;  %v7515_v43 = vmax.f32 %v1826_v50, %v1844_v40  ;;  %v7520_v28 = vmax.f32 %v1827_v26, %v1847_v2  ;;  %2050 = vmatpush1.msra.mxu0 %v2021_v56  ;;  %v2015_v60 = vld [vmem:[#allocation8 + $0x28] sm:$0xff]  ;;  %v2454_v50 = vld [vmem:[#allocation10 + $0x278] sm:$0xff] }
 0x246   : > { %v1852_v49 = vrot.slane %v1832_v38, 1  ;;  %v1833_v19 = vmax.f32 %v1825_v41, 0.0  ;;  %v1851_v12 = vsel %vm694_vm0, %v1846_v21, %v1850_v24  ;;  %2051 = vmatprep.subr.mxu0 %v8311_v18  ;;  %v2152_v26 = vld [vmem:[#allocation10 + $0x118] sm:$0xff]  ;;  %v2145_v40 = vld [vmem:[#allocation10 + $0xe0] sm:$0xff] }
 0x247   : > { %1884 = vrot.lane.b32.xlu0 %v7486_v1, %s6934_s4  ;;  %v7491_v33 = vmax.f32 %v1829_v47, %v1851_v12  ;;  %2052 = vmatpush1.msra.mxu0 %v2020_v3  ;;  %v2156_v12 = vld [vmem:[#allocation10 + $0x138] sm:$0xff]  ;;  %v2449_v3 = vld [vmem:[#allocation10 + $0x250] sm:$0xff] }
 0x248   : > { %v1854_v58 = vrot.slane %v1833_v19, 1  ;;  %v7493_v23 = vmax.f32 %v1832_v38, %v1852_v49  ;;  %v1853_v14 = vsel %vm694_vm0, %v1848_v31, %v1852_v49  ;;  %2053 = vmatprep.subr.mxu0 %v8311_v18  ;;  %v1918_v49 = vld [vmem:[#allocation7 + $0x8] sm:$0x3f] }
 0x249   : > { %1886 = vrot.lane.b32.xlu1 %v7491_v33, %s6934_s4  ;;  %v7505_v63 = vmax.f32 %v1830_v9, %v1853_v14  ;;  %2054 = vmatpush1.msra.mxu0 %v2019_v57  ;;  %v2150_v14 = vld [vmem:[#allocation10 + $0x108] sm:$0xff] }
 0x24a   : > { %v7497_v35 = vmax.f32 %v1833_v19, %v1854_v58  ;;  %v1855_v16 = vsel %vm694_vm0, %v1850_v24, %v1854_v58  ;;  %2055 = vmatprep.subr.mxu0 %v8311_v18  ;;  %v2026_v19 = vld [vmem:[#allocation8 + $0x80] sm:$0xff]  ;;  %v2154_v58 = vld [vmem:[#allocation10 + $0x128] sm:$0xff] }
 0x24b   : > { %1892 = vrot.lane.b32.xlu0 %v7493_v23, %s6934_s4  ;;  %v7510_v55 = vmax.f32 %v1831_v45, %v1855_v16  ;;  %2056 = vmatpush1.msra.mxu0 %v2018_v42  ;;  %v2148_v16 = vld [vmem:[#allocation10 + $0xf8] sm:$0xff]  ;;  %v2448_v57 = vld [vmem:[#allocation10 + $0x248] sm:$0xff]  ;;  %v2447_v42 = vld [vmem:[#allocation10 + $0x240] sm:$0xff] }
 0x24c   : > { %2057 = vmatprep.subr.mxu0 %v8311_v18 }
 0x24d   : > { %1894 = vrot.lane.b32.xlu1 %v7497_v35, %s6934_s4  ;;  %2058 = vmatpush1.msra.mxu0 %v2017_v48  ;;  %v2446_v48 = vld [vmem:[#allocation10 + $0x238] sm:$0xff] }
 0x24e   : > { %2059 = vmatprep.subr.mxu0 %v8311_v18 }
 0x24f   : > { %1888 = vrot.lane.b32.xlu0 %v7505_v63, %s6934_s4  ;;  %2060 = vmatpush1.msra.mxu0 %v2016_v52  ;;  %v2445_v52 = vld [vmem:[#allocation10 + $0x230] sm:$0xff] }
 0x250   : > { %2061 = vmatprep.subr.mxu0 %v8311_v18 }
 0x251   : > { %1890 = vrot.lane.b32.xlu1 %v7510_v55, %s6934_s4  ;;  %2062 = vmatpush1.msra.mxu0 %v2015_v60  ;;  %v2444_v60 = vld [vmem:[#allocation10 + $0x228] sm:$0xff] }
 0x252   : > { %2063 = vmatprep.subr.mxu0 %v8311_v18 }
 0x253   : > { %1880 = vrot.lane.b32.xlu0 %v7515_v43, %s6934_s4  ;;  %2064 = vmatpush1.msra.mxu0 %v2014_v5  ;;  %v2443_v5 = vld [vmem:[#allocation10 + $0x220] sm:$0xff] }
 0x254   : > { %2065 = vmatprep.subr.mxu0 %v8311_v18 }
 0x255   : > { %1882 = vrot.lane.b32.xlu1 %v7520_v28, %s6934_s4  ;;  %2066 = vmatpush1.msra.mxu0 %v2013_v6  ;;  %v2143_v6 = vld [vmem:[#allocation10 + $0xd0] sm:$0xff] }
 0x256   : > { %2067 = vmatprep.subr.mxu0 %v8311_v18 }
 0x257   : > { %2068 = vmatpush1.msra.mxu0 %v2012_v15  ;;  %v2442_v15 = vld [vmem:[#allocation10 + $0x218] sm:$0xff] }
 0x258   : > { %2069 = vmatprep.subr.mxu0 %v8311_v18 }
 0x259   : > { %2070 = vmatpush1.msra.mxu0 %v2011_v59  ;;  %v2142_v59 = vld [vmem:[#allocation10 + $0xc8] sm:$0xff] }
 0x25a   : > { %2071 = vmatprep.subr.mxu0 %v8311_v18 }
 0x25b   : > { %2072 = vmatpush1.msra.mxu0 %v2010_v0  ;;  %v2441_v0 = vld [vmem:[#allocation10 + $0x210] sm:$0xff] }
 0x25c   : > { %2095 = vmatprep.subr.mxu0 %v8311_v18 }
 0x25d   : > { %5982 = vmatpush2.msk.msra.mxu0 %vm694_vm0, %v2030_v30  ;;  %v2141_v30 = vld [vmem:[#allocation10 + $0xc0] sm:$0xff] }
 0x25e   : > { %2097 = vmatprep.subr.mxu0 %v8311_v18 }
 0x25f   : > { %2098 = vmatpush2.msra.mxu0 %v2029_v61  ;;  %v2440_v61 = vld [vmem:[#allocation10 + $0x208] sm:$0xff] }
 0x260   : > { %2099 = vmatprep.subr.mxu0 %v8311_v18 }
 0x261   : > { %2100 = vmatpush2.msra.mxu0 %v2028_v7  ;;  %v2140_v7 = vld [vmem:[#allocation10 + $0xb8] sm:$0xff] }
 0x262   : > { %2101 = vmatprep.subr.mxu0 %v8311_v18 }
 0x2b9   : > { %v1885_v8 = vpop.permute.xlu0 %1884 }
 0x2bb   : > { %v1887_v47 = vpop.permute.xlu1 %1886 }
 0x2bc   : > { %v1898_v22 = vsel %vm1896_vm4, %v1885_v8, %v1887_v47  ;;  %v1912_v46 = vmax.f32 %v7491_v33, %v1887_v47  ;;  %v2155_v33 = vld [vmem:[#allocation10 + $0x130] sm:$0xff]  ;;  %v2439_v8 = vld [vmem:[#allocation10 + $0x200] sm:$0xff] }
 0x2bd   : > { %v1893_v34 = vpop.permute.xlu0 %1892  ;;  %v1911_v11 = vmax.f32 %v7486_v1, %v1898_v22  ;;  %v2027_v1 = vld [vmem:[#allocation8 + $0x88] sm:$0xff]  ;;  %v2139_v47 = vld [vmem:[#allocation10 + $0xb0] sm:$0xff]  ;;  %v2673_v22 = vld [vmem:[#allocation10 + $0x3b8] sm:$0xff] }
 0x2be   : > { %2102 = vmatpush2.msra.mxu0 %v2027_v1  ;;  %v2134_v1 = vld [vmem:[#allocation10 + $0x90] sm:$0xff] }
 0x2bf   : > { %v1895_v9 = vpop.permute.xlu1 %1894  ;;  %2103 = vmatprep.subr.mxu0 %v8311_v18 }
 0x2c0   : > { %v1900_v62 = vsel %vm1896_vm4, %v1893_v34, %v1895_v9  ;;  %v1916_v10 = vmax.f32 %v7497_v35, %v1895_v9  ;;  %2104 = vmatpush2.msra.mxu0 %v2026_v19  ;;  %v2151_v35 = vld [vmem:[#allocation10 + $0x110] sm:$0xff]  ;;  %v2438_v34 = vld [vmem:[#allocation10 + $0x1f8] sm:$0xff]  ;;  %v2138_v9 = vld [vmem:[#allocation10 + $0xa8] sm:$0xff] }
 0x2c1   : > { %v1915_v17 = vmax.f32 %v7493_v23, %v1900_v62  ;;  %v1889_v20 = vpop.permute.xlu0 %1888  ;;  %2475 = vmatprep.subr.mxu0 %v2454_v50  ;;  %v2153_v23 = vld [vmem:[#allocation10 + $0x120] sm:$0xff]  ;;  %v2437_v62 = vld [vmem:[#allocation10 + $0x1f0] sm:$0xff]  ;;  %v2131_v50 = vld [vmem:[#allocation10 + $0x78] sm:$0xff] }
 0x2c2   : > { %5978 = vmatprep.subr.msk.mxu1 %vm1926_vm5, %v1916_v10  ;;  %v2137_v10 = vld [vmem:[#allocation10 + $0xa0] sm:$0xff] }
 0x2c3   : > { %5979 = vmatpush1.msk.msra.mxu1 %vm1926_vm5, %v1915_v17  ;;  %v1891_v32 = vpop.permute.xlu1 %1890  ;;  %v2436_v17 = vld [vmem:[#allocation10 + $0x1e8] sm:$0xff] }
 0x2c4   : > { %v1899_v31 = vsel %vm1896_vm4, %v1889_v20, %v1891_v32  ;;  %v1914_v45 = vmax.f32 %v7510_v55, %v1891_v32  ;;  %v2144_v55 = vld [vmem:[#allocation10 + $0xd8] sm:$0xff]  ;;  %v2435_v32 = vld [vmem:[#allocation10 + $0x1e0] sm:$0xff] }
 0x2c5   : > { %v1913_v4 = vmax.f32 %v7505_v63, %v1899_v31  ;;  %v1881_v21 = vpop.permute.xlu0 %1880  ;;  %v2147_v63 = vld [vmem:[#allocation10 + $0xf0] sm:$0xff]  ;;  %v2135_v20 = vld [vmem:[#allocation10 + $0x98] sm:$0xff] }
 0x2c6   : > { %1959 = vmatprep.subr.mxu1 %v1914_v45 }
 0x2c7   : > { %1960 = vmatpush1.msra.mxu1 %v1913_v4  ;;  %v1883_v24 = vpop.permute.xlu1 %1882 }
 0x2c8   : > { %v1897_v38 = vsel %vm1896_vm4, %v1881_v21, %v1883_v24  ;;  %v1910_v41 = vmax.f32 %v7520_v28, %v1883_v24  ;;  %1961 = vmatprep.subr.mxu1 %v1912_v46  ;;  %v2451_v28 = vld [vmem:[#allocation10 + $0x260] sm:$0xff] }
 0x2c9   : > { %v1909_v36 = vmax.f32 %v7515_v43, %v1897_v38  ;;  %1962 = vmatpush1.msra.mxu1 %v1911_v11  ;;  %v2452_v43 = vld [vmem:[#allocation10 + $0x268] sm:$0xff] }
 0x2ca   : > { %1963 = vmatprep.subr.mxu1 %v1910_v41 }
 0x2cb   : > { %1964 = vmatpush1.msra.mxu1 %v1909_v36 }
 0x2cc   : > { %5980 = vmatmul.mubr.msk.f32.vlgmr.msra.gmra.mxu1 %vm1919_vm6, %v1917_v13  ;;  %2179 = vmatprep.subr.mxu1 %v2156_v12  ;;  %v2133_v12 = vld [vmem:[#allocation10 + $0x88] sm:$0xff] }
 0x2cd   : > { %2003 = vmatprep.mubr.f32.mxu1 %v8311_v18  ;;  %2180 = vmatpush1.msra.mxu1 %v2155_v33  ;;  %v2132_v33 = vld [vmem:[#allocation10 + $0x80] sm:$0xff] }
 0x2ce   : > { %2181 = vmatprep.subr.mxu1 %v2154_v58  ;;  %v2130_v58 = vld [vmem:[#allocation10 + $0x70] sm:$0xff] }
 0x2cf   : > { %2182 = vmatpush1.msra.mxu1 %v2153_v23  ;;  %v2129_v23 = vld [vmem:[#allocation10 + $0x68] sm:$0xff] }
 0x2d0   : > { %5981 = vmatmul.mubr.msk.f32.gmra.mxu1 %vm1919_vm6, %v1918_v49  ;;  %2183 = vmatprep.subr.mxu1 %v2152_v26 }
 0x2d1   : > { %2231 = vmatprep.mubr.f32.mxu1 %v8311_v18  ;;  %2184 = vmatpush1.msra.mxu1 %v2151_v35  ;;  %v2672_v35 = vld [vmem:[#allocation10 + $0x3b0] sm:$0xff] }
 0x2d2   : > { %2185 = vmatprep.subr.mxu1 %v2150_v14  ;;  %v2128_v14 = vld [vmem:[#allocation10 + $0x60] sm:$0xff] }
 0x2d3   : > { %2186 = vmatpush1.msra.mxu1 %v2149_v51  ;;  %v2127_v51 = vld [vmem:[#allocation10 + $0x58] sm:$0xff] }
 0x2d4   : > { %2187 = vmatprep.subr.mxu1 %v2148_v16 }
 0x2d5   : > { %2188 = vmatpush1.msra.mxu1 %v2147_v63  ;;  %v2126_v63 = vld [vmem:[#allocation10 + $0x50] sm:$0xff] }
 0x2d6   : > { %2189 = vmatprep.subr.mxu1 %v2146_v25  ;;  %v2671_v25 = vld [vmem:[#allocation10 + $0x3a8] sm:$0xff] }
 0x2d7   : > { %2190 = vmatpush1.msra.mxu1 %v2145_v40 }
 0x2d8   : > { %2191 = vmatprep.subr.mxu1 %v2144_v55  ;;  %v2125_v55 = vld [vmem:[#allocation10 + $0x48] sm:$0xff] }
 0x2d9   : > { %2192 = vmatpush1.msra.mxu1 %v2143_v6  ;;  %v2344_v6 = vld [vmem:[#allocation10 + $0x1d0] sm:$0xff] }
 0x2da   : > { %2193 = vmatprep.subr.mxu1 %v2142_v59  ;;  %v2342_v59 = vld [vmem:[#allocation10 + $0x1c0] sm:$0xff] }
 0x2db   : > { %2194 = vmatpush1.msra.mxu1 %v2141_v30  ;;  %v2340_v30 = vld [vmem:[#allocation10 + $0x1b0] sm:$0xff] }
 0x2dc   : > { %2195 = vmatprep.subr.mxu1 %v2140_v7  ;;  %v2338_v7 = vld [vmem:[#allocation10 + $0x1a0] sm:$0xff] }
 0x2dd   : > { %2196 = vmatpush1.msra.mxu1 %v2139_v47  ;;  %v2665_v47 = vld [vmem:[#allocation10 + $0x378] sm:$0xff] }
 0x2de   : > { %2197 = vmatprep.subr.mxu1 %v2138_v9  ;;  %v2335_v9 = vld [vmem:[#allocation10 + $0x188] sm:$0xff] }
 0x2df   : > { %2198 = vmatpush1.msra.mxu1 %v2137_v10  ;;  %v2334_v10 = vld [vmem:[#allocation10 + $0x180] sm:$0xff] }
 0x2e0   : > { %2260 = vmatprep.subr.mxu1 %v2135_v20  ;;  %v2663_v20 = vld [vmem:[#allocation10 + $0x368] sm:$0xff] }
 0x38c   : > { %v1999_v2 = vpop.f32.mrf.mxu1 }
 0x38e   : > { %v2001_v27 = vpop.f32.mrf.mxu1 }
 0x38f   : > { %5983 = vmatprep.mubr.msk.f32.mxu0 %vm2031_vm7, %v2001_v27  ;;  %v2124_v27 = vld [vmem:[#allocation10 + $0x40] sm:$0xff] }
 0x390   : > { %v2005_v37 = vpop.f32.mrf.mxu1  ;;  %2106 = vmatmul.mubr.f32.vlgmr.msra.gmra.mxu0 %v1999_v2  ;;  %v2670_v2 = vld [vmem:[#allocation10 + $0x3a0] sm:$0xff] }
 0x391   : > { %2476 = vmatpush1.msra.mxu0 %v2453_v39  ;;  %v2123_v39 = vld [vmem:[#allocation10 + $0x38] sm:$0xff] }
 0x392   : > { %v2007_v56 = vpop.f32.mrf.mxu1  ;;  %2477 = vmatprep.subr.mxu0 %v2452_v43  ;;  %v2122_v43 = vld [vmem:[#allocation10 + $0x30] sm:$0xff] }
 0x393   : > { %5984 = vmatprep.mubr.msk.f32.mxu0 %vm2031_vm7, %v2007_v56  ;;  %2478 = vmatpush1.msra.mxu0 %v2451_v28  ;;  %v2121_v28 = vld [vmem:[#allocation10 + $0x28] sm:$0xff]  ;;  %v2120_v56 = vld [vmem:[#allocation10 + $0x20] sm:$0xff] }
 0x394   : > { %2111 = vmatmul.mubr.f32.gmra.mxu0 %v2005_v37  ;;  %2479 = vmatprep.subr.mxu0 %v2450_v29  ;;  %v2669_v37 = vld [vmem:[#allocation10 + $0x398] sm:$0xff]  ;;  %v2668_v29 = vld [vmem:[#allocation10 + $0x390] sm:$0xff] }
 0x395   : > { %2480 = vmatpush1.msra.mxu0 %v2449_v3  ;;  %2527 = vmatprep.mubr.f32.mxu0 %v8311_v18  ;;  %v2119_v3 = vld [vmem:[#allocation10 + $0x18] sm:$0xff] }
 0x396   : > { %2481 = vmatprep.subr.mxu0 %v2448_v57  ;;  %v2118_v57 = vld [vmem:[#allocation10 + $0x10] sm:$0xff] }
 0x397   : > { %2482 = vmatpush1.msra.mxu0 %v2447_v42  ;;  %v2667_v42 = vld [vmem:[#allocation10 + $0x388] sm:$0xff] }
 0x398   : > { %2483 = vmatprep.subr.mxu0 %v2446_v48  ;;  %v2117_v48 = vld [vmem:[#allocation10 + $0x8] sm:$0xff] }
 0x399   : > { %2484 = vmatpush1.msra.mxu0 %v2445_v52  ;;  %v2666_v52 = vld [vmem:[#allocation10 + $0x380] sm:$0xff] }
 0x39a   : > { %2485 = vmatprep.subr.mxu0 %v2444_v60  ;;  %v2116_v60 = vld [vmem:[#allocation10] sm:$0xff] }
 0x39b   : > { %2486 = vmatpush1.msra.mxu0 %v2443_v5  ;;  %v2345_v5 = vld [vmem:[#allocation10 + $0x1d8] sm:$0xff] }
 0x39c   : > { %2487 = vmatprep.subr.mxu0 %v2442_v15  ;;  %v2343_v15 = vld [vmem:[#allocation10 + $0x1c8] sm:$0xff] }
 0x39d   : > { %2488 = vmatpush1.msra.mxu0 %v2441_v0  ;;  %v2341_v0 = vld [vmem:[#allocation10 + $0x1b8] sm:$0xff] }
 0x39e   : > { %2489 = vmatprep.subr.mxu0 %v2440_v61  ;;  %v2339_v61 = vld [vmem:[#allocation10 + $0x1a8] sm:$0xff] }
 0x39f   : > { %2490 = vmatpush1.msra.mxu0 %v2439_v8  ;;  %v2337_v8 = vld [vmem:[#allocation10 + $0x198] sm:$0xff] }
 0x3a0   : > { %2491 = vmatprep.subr.mxu0 %v2438_v34  ;;  %v2336_v34 = vld [vmem:[#allocation10 + $0x190] sm:$0xff] }
 0x3a1   : > { %2492 = vmatpush1.msra.mxu0 %v2437_v62  ;;  %v2664_v62 = vld [vmem:[#allocation10 + $0x370] sm:$0xff] }
 0x3a2   : > { %2493 = vmatprep.subr.mxu0 %v2436_v17  ;;  %v2333_v17 = vld [vmem:[#allocation10 + $0x178] sm:$0xff] }
 0x3a3   : > { %2494 = vmatpush1.msra.mxu0 %v2435_v32  ;;  %v2332_v32 = vld [vmem:[#allocation10 + $0x170] sm:$0xff] }
 0x3a4   : > { %2694 = vmatprep.subr.mxu0 %v2673_v22  ;;  %v2331_v22 = vld [vmem:[#allocation10 + $0x168] sm:$0xff] }
 0x450   : > { %v7559_v31 = vpop.f32.mrf.mxu0 }
 0x451   : > { %2674 = vrot.lane.b32.xlu0 %v7559_v31, %s6934_s4  ;;  %v2456_v46 = vrot.slane %v7559_v31, 3  ;;  %v2159_v11 = vrot.slane %v7559_v31, 1  ;;  %v2346_v38 = vrot.slane %v7559_v31, 2  ;;  %v2565_v16 = vrot.slane %v7559_v31, 4 }
 0x452   : > { %v2109_v45 = vpop.f32.mrf.mxu0 }
 0x453   : > { %v2662_v45 = vld [vmem:[#allocation10 + $0x360] sm:$0xff] }
 0x454   : > { %v7563_v4 = vpop.f32.mrf.mxu0 }
 0x455   : > { %v7568_v21 = vrot.slane %v7563_v4, 3  ;;  %2676 = vrot.lane.b32.xlu0 %v7563_v4, %s6934_s4  ;;  %v7573_v24 = vrot.slane %v7563_v4, 1  ;;  %v7577_v41 = vrot.slane %v7563_v4, 2  ;;  %v7605_v26 = vrot.slane %v7563_v4, 4 }
 0x456   : > { %v2114_v36 = vpop.f32.mrf.mxu0 }
 0x457   : > { %v7580_v13 = vsel %vm2455_vm9, %v2456_v46, %v7568_v21  ;;  %v7584_v49 = vsel %vm694_vm0, %v2159_v11, %v7573_v24  ;;  %v7588_v19 = vsel %vm919_vm2, %v2346_v38, %v7577_v41  ;;  %v7617_v40 = vsel %vm711_vm1, %v2565_v16, %v7605_v26  ;;  %v2330_v46 = vld [vmem:[#allocation10 + $0x160] sm:$0xff]  ;;  %v2329_v11 = vld [vmem:[#allocation10 + $0x158] sm:$0xff]  ;;  %v2328_v36 = vld [vmem:[#allocation10 + $0x150] sm:$0xff] }
 0x458   : > { %5991 = vmatmul.mubr.msk.f32.vlgmr.msra.gmra.mxu0 %vm2162_vm8, %v7580_v13  ;;  %2784 = vrot.lane.b32.xlu1 %v7584_v49, %s6934_s4  ;;  %v2661_v38 = vld [vmem:[#allocation10 + $0x358] sm:$0xff]  ;;  %v2558_v16 = vld [vmem:[#allocation10 + $0x2e8] sm:$0xff] }
 0x459   : > { %5985 = vmatmul.mubr.msk.f32.vlgmr.msra.gmra.mxu1 %vm2162_vm8, %v7584_v49  ;;  %2894 = vrot.lane.b32.xlu0 %v7588_v19, %s6934_s4 }
 0x45a   : > { %2261 = vmatpush1.msra.mxu1 %v2134_v1  ;;  %2237 = vmatprep.mubr.f32.mxu1 %v8311_v18  ;;  %v2327_v1 = vld [vmem:[#allocation10 + $0x148] sm:$0xff] }
 0x45b   : > { %2262 = vmatprep.subr.mxu1 %v2133_v12  ;;  %2533 = vmatprep.mubr.f32.mxu0 %v8311_v18  ;;  %v2660_v12 = vld [vmem:[#allocation10 + $0x350] sm:$0xff] }
 0x45c   : > { %2263 = vmatpush1.msra.mxu1 %v2132_v33  ;;  %5992 = vmatmul.mubr.msk.f32.gmra.mxu0 %vm2162_vm8, %v7568_v21  ;;  %v2326_v33 = vld [vmem:[#allocation10 + $0x140] sm:$0xff] }
 0x45d   : > { %2264 = vmatprep.subr.mxu1 %v2131_v50  ;;  %2786 = vrot.lane.b32.xlu1 %v7573_v24, %s6934_s4  ;;  %v2564_v50 = vld [vmem:[#allocation10 + $0x318] sm:$0xff] }
 0x45e   : > { %5986 = vmatmul.mubr.msk.f32.gmra.mxu1 %vm2162_vm8, %v7573_v24  ;;  %2896 = vrot.lane.b32.xlu0 %v7577_v41, %s6934_s4 }
 0x45f   : > { %2265 = vmatpush1.msra.mxu1 %v2130_v58  ;;  %2312 = vmatprep.mubr.f32.mxu1 %v8311_v18  ;;  %v2563_v58 = vld [vmem:[#allocation10 + $0x310] sm:$0xff] }
 0x460   : > { %2266 = vmatprep.subr.mxu1 %v2129_v23  ;;  %2695 = vmatpush1.msra.mxu0 %v2672_v35  ;;  %v2562_v23 = vld [vmem:[#allocation10 + $0x308] sm:$0xff]  ;;  %v2561_v35 = vld [vmem:[#allocation10 + $0x300] sm:$0xff] }
 0x461   : > { %2267 = vmatpush1.msra.mxu1 %v2128_v14  ;;  %3004 = vrot.lane.b32.xlu1 %v7580_v13, %s6934_s4  ;;  %v2560_v14 = vld [vmem:[#allocation10 + $0x2f8] sm:$0xff] }
 0x462   : > { %2268 = vmatprep.subr.mxu1 %v2127_v51  ;;  %3114 = vrot.lane.b32.xlu0 %v7617_v40, %s6934_s4  ;;  %v2559_v51 = vld [vmem:[#allocation10 + $0x2f0] sm:$0xff] }
 0x463   : > { %2269 = vmatpush1.msra.mxu1 %v2126_v63  ;;  %2696 = vmatprep.subr.mxu0 %v2671_v25  ;;  %v2557_v63 = vld [vmem:[#allocation10 + $0x2e0] sm:$0xff]  ;;  %v2556_v25 = vld [vmem:[#allocation10 + $0x2d8] sm:$0xff] }
 0x464   : > { %2270 = vmatprep.subr.mxu1 %v2125_v55  ;;  %2697 = vmatpush1.msra.mxu0 %v2670_v2  ;;  %v2659_v55 = vld [vmem:[#allocation10 + $0x348] sm:$0xff]  ;;  %v2555_v2 = vld [vmem:[#allocation10 + $0x2d0] sm:$0xff] }
 0x465   : > { %2271 = vmatpush1.msra.mxu1 %v2124_v27  ;;  %3006 = vrot.lane.b32.xlu1 %v7568_v21, %s6934_s4  ;;  %v2554_v27 = vld [vmem:[#allocation10 + $0x2c8] sm:$0xff] }
 0x466   : > { %2272 = vmatprep.subr.mxu1 %v2123_v39  ;;  %3116 = vrot.lane.b32.xlu0 %v7605_v26, %s6934_s4  ;;  %v2658_v39 = vld [vmem:[#allocation10 + $0x340] sm:$0xff] }
 0x467   : > { %2273 = vmatpush1.msra.mxu1 %v2122_v43  ;;  %2698 = vmatprep.subr.mxu0 %v2669_v37  ;;  %v2553_v43 = vld [vmem:[#allocation10 + $0x2c0] sm:$0xff]  ;;  %v2552_v37 = vld [vmem:[#allocation10 + $0x2b8] sm:$0xff] }
 0x468   : > { %2274 = vmatprep.subr.mxu1 %v2121_v28  ;;  %2699 = vmatpush1.msra.mxu0 %v2668_v29  ;;  %v2657_v28 = vld [vmem:[#allocation10 + $0x338] sm:$0xff]  ;;  %v2551_v29 = vld [vmem:[#allocation10 + $0x2b0] sm:$0xff] }
 0x469   : > { %2275 = vmatpush1.msra.mxu1 %v2120_v56  ;;  %3224 = vrot.lane.b32.xlu1 %v7559_v31, %s6935_s29  ;;  %v2550_v56 = vld [vmem:[#allocation10 + $0x2a8] sm:$0xff] }
 0x46a   : > { %2276 = vmatprep.subr.mxu1 %v2119_v3  ;;  %3334 = vrot.lane.b32.xlu0 %v7584_v49, %s6935_s29  ;;  %v2656_v3 = vld [vmem:[#allocation10 + $0x330] sm:$0xff] }
 0x46b   : > { %2277 = vmatpush1.msra.mxu1 %v2118_v57  ;;  %2700 = vmatprep.subr.mxu0 %v2667_v42  ;;  %v2549_v57 = vld [vmem:[#allocation10 + $0x2a0] sm:$0xff]  ;;  %v2548_v42 = vld [vmem:[#allocation10 + $0x298] sm:$0xff] }
 0x46c   : > { %2278 = vmatprep.subr.mxu1 %v2117_v48  ;;  %2701 = vmatpush1.msra.mxu0 %v2666_v52  ;;  %v2655_v48 = vld [vmem:[#allocation10 + $0x328] sm:$0xff]  ;;  %v2547_v52 = vld [vmem:[#allocation10 + $0x290] sm:$0xff] }
 0x46d   : > { %2279 = vmatpush1.msra.mxu1 %v2116_v60  ;;  %3226 = vrot.lane.b32.xlu1 %v7563_v4, %s6935_s29  ;;  %v2546_v60 = vld [vmem:[#allocation10 + $0x288] sm:$0xff] }
 0x46e   : > { %5987 = vmatmul.mubr.msk.f32.vlgmr.msra.gmra.mxu1 %vm2162_vm8, %v7559_v31  ;;  %2365 = vmatprep.subr.mxu1 %v2345_v5  ;;  %v2654_v5 = vld [vmem:[#allocation10 + $0x320] sm:$0xff] }
 0x46f   : > { %2366 = vmatpush1.msra.mxu1 %v2344_v6  ;;  %3336 = vrot.lane.b32.xlu0 %v7573_v24, %s6935_s29  ;;  %v2545_v6 = vld [vmem:[#allocation10 + $0x280] sm:$0xff] }
 0x470   : > { %2367 = vmatprep.subr.mxu1 %v2343_v15  ;;  %2318 = vmatprep.mubr.f32.mxu1 %v8311_v18  ;;  %v2783_v15 = vld [vmem:[#allocation10 + $0x458] sm:$0xff] }
 0x471   : > { %2368 = vmatpush1.msra.mxu1 %v2342_v59  ;;  %3444 = vrot.lane.b32.xlu1 %v7588_v19, %s6935_s29  ;;  %v2782_v59 = vld [vmem:[#allocation10 + $0x450] sm:$0xff] }
 0x472   : > { %5988 = vmatmul.mubr.msk.f32.gmra.mxu1 %vm2162_vm8, %v7563_v4  ;;  %2369 = vmatprep.subr.mxu1 %v2341_v0  ;;  %v2893_v0 = vld [vmem:[#allocation10 + $0x4f8] sm:$0xff] }
 0x473   : > { %2370 = vmatpush1.msra.mxu1 %v2340_v30  ;;  %3554 = vrot.lane.b32.xlu0 %v7580_v13, %s6935_s29  ;;  %v2778_v30 = vld [vmem:[#allocation10 + $0x430] sm:$0xff] }
 0x474   : > { %2371 = vmatprep.subr.mxu1 %v2339_v61  ;;  %2417 = vmatprep.mubr.f32.mxu1 %v8311_v18  ;;  %v2776_v61 = vld [vmem:[#allocation10 + $0x420] sm:$0xff] }
 0x475   : > { %2372 = vmatpush1.msra.mxu1 %v2338_v7  ;;  %3446 = vrot.lane.b32.xlu1 %v7577_v41, %s6935_s29  ;;  %v2774_v7 = vld [vmem:[#allocation10 + $0x410] sm:$0xff] }
 0x476   : > { %2373 = vmatprep.subr.mxu1 %v2337_v8  ;;  %2702 = vmatprep.subr.mxu0 %v2665_v47  ;;  %v2773_v8 = vld [vmem:[#allocation10 + $0x408] sm:$0xff]  ;;  %v2771_v47 = vld [vmem:[#allocation10 + $0x3f8] sm:$0xff] }
 0x477   : > { %2374 = vmatpush1.msra.mxu1 %v2336_v34  ;;  %3556 = vrot.lane.b32.xlu0 %v7568_v21, %s6935_s29  ;;  %v2770_v34 = vld [vmem:[#allocation10 + $0x3f0] sm:$0xff] }
 0x478   : > { %2375 = vmatprep.subr.mxu1 %v2335_v9  ;;  %2703 = vmatpush1.msra.mxu0 %v2664_v62  ;;  %v2768_v9 = vld [vmem:[#allocation10 + $0x3e0] sm:$0xff]  ;;  %v2766_v62 = vld [vmem:[#allocation10 + $0x3d0] sm:$0xff] }
 0x479   : > { %2376 = vmatpush1.msra.mxu1 %v2334_v10  ;;  %3664 = vrot.lane.b32.xlu1 %v7617_v40, %s6935_s29  ;;  %v2765_v10 = vld [vmem:[#allocation10 + $0x3c8] sm:$0xff] }
 0x47a   : > { %2377 = vmatprep.subr.mxu1 %v2333_v17  ;;  %2704 = vmatprep.subr.mxu0 %v2663_v20  ;;  %v2764_v17 = vld [vmem:[#allocation10 + $0x3c0] sm:$0xff]  ;;  %v2892_v20 = vld [vmem:[#allocation10 + $0x4f0] sm:$0xff] }
 0x47b   : > { %2378 = vmatpush1.msra.mxu1 %v2332_v32  ;;  %3774 = vrot.lane.b32.xlu0 %v7559_v31, %s6936_s25 }
 0x47c   : > { %2379 = vmatprep.subr.mxu1 %v2331_v22  ;;  %2705 = vmatpush1.msra.mxu0 %v2662_v45  ;;  %v2891_v22 = vld [vmem:[#allocation10 + $0x4e8] sm:$0xff]  ;;  %v2890_v45 = vld [vmem:[#allocation10 + $0x4e0] sm:$0xff] }
 0x47d   : > { %2380 = vmatpush1.msra.mxu1 %v2330_v46  ;;  %3666 = vrot.lane.b32.xlu1 %v7605_v26, %s6935_s29  ;;  %v2888_v46 = vld [vmem:[#allocation10 + $0x4d0] sm:$0xff] }
 0x47e   : > { %2381 = vmatprep.subr.mxu1 %v2329_v11  ;;  %2706 = vmatprep.subr.mxu0 %v2661_v38  ;;  %v2887_v38 = vld [vmem:[#allocation10 + $0x4c8] sm:$0xff] }
 0x47f   : > { %2382 = vmatpush1.msra.mxu1 %v2328_v36  ;;  %3776 = vrot.lane.b32.xlu0 %v7563_v4, %s6936_s25  ;;  %v2886_v36 = vld [vmem:[#allocation10 + $0x4c0] sm:$0xff] }
 0x480   : > { %2383 = vmatprep.subr.mxu1 %v2327_v1  ;;  %2707 = vmatpush1.msra.mxu0 %v2660_v12  ;;  %v2885_v1 = vld [vmem:[#allocation10 + $0x4b8] sm:$0xff]  ;;  %v3002_v12 = vld [vmem:[#allocation10 + $0x590] sm:$0xff] }
 0x481   : > { %2384 = vmatpush1.msra.mxu1 %v2326_v33  ;;  %3884 = vrot.lane.b32.xlu1 %v7584_v49, %s6936_s25 }
 0x482   : > { %5989 = vmatmul.mubr.msk.f32.vlgmr.msra.gmra.mxu1 %vm2162_vm8, %v7588_v19  ;;  %2584 = vmatprep.subr.mxu1 %v2564_v50  ;;  %v2884_v50 = vld [vmem:[#allocation10 + $0x4b0] sm:$0xff] }
 0x483   : > { %2585 = vmatpush1.msra.mxu1 %v2563_v58  ;;  %3994 = vrot.lane.b32.xlu0 %v7588_v19, %s6936_s25  ;;  %v3001_v58 = vld [vmem:[#allocation10 + $0x588] sm:$0xff] }
 0x484   : > { %2586 = vmatprep.subr.mxu1 %v2562_v23  ;;  %2423 = vmatprep.mubr.f32.mxu1 %v8311_v18  ;;  %v2883_v23 = vld [vmem:[#allocation10 + $0x4a8] sm:$0xff] }
 0x485   : > { %2587 = vmatpush1.msra.mxu1 %v2561_v35  ;;  %3886 = vrot.lane.b32.xlu1 %v7573_v24, %s6936_s25  ;;  %v3000_v35 = vld [vmem:[#allocation10 + $0x580] sm:$0xff] }
 0x486   : > { %5990 = vmatmul.mubr.msk.f32.gmra.mxu1 %vm2162_vm8, %v7577_v41  ;;  %2588 = vmatprep.subr.mxu1 %v2560_v14  ;;  %v2882_v14 = vld [vmem:[#allocation10 + $0x4a0] sm:$0xff] }
 0x487   : > { %2589 = vmatpush1.msra.mxu1 %v2559_v51  ;;  %3996 = vrot.lane.b32.xlu0 %v7577_v41, %s6936_s25  ;;  %v2999_v51 = vld [vmem:[#allocation10 + $0x578] sm:$0xff] }
 0x488   : > { %2590 = vmatprep.subr.mxu1 %v2558_v16  ;;  %2636 = vmatprep.mubr.f32.mxu1 %v8311_v18  ;;  %v2881_v16 = vld [vmem:[#allocation10 + $0x498] sm:$0xff] }
 0x489   : > { %2591 = vmatpush1.msra.mxu1 %v2557_v63  ;;  %4104 = vrot.lane.b32.xlu1 %v7580_v13, %s6936_s25  ;;  %v2880_v63 = vld [vmem:[#allocation10 + $0x490] sm:$0xff] }
 0x48a   : > { %2592 = vmatprep.subr.mxu1 %v2556_v25  ;;  %2708 = vmatprep.subr.mxu0 %v2659_v55  ;;  %v2998_v55 = vld [vmem:[#allocation10 + $0x570] sm:$0xff] }
 0x48b   : > { %2593 = vmatpush1.msra.mxu1 %v2555_v2  ;;  %4214 = vrot.lane.b32.xlu0 %v7617_v40, %s6936_s25  ;;  %v2879_v2 = vld [vmem:[#allocation10 + $0x488] sm:$0xff] }
 0x48c   : > { %2594 = vmatprep.subr.mxu1 %v2554_v27  ;;  %2709 = vmatpush1.msra.mxu0 %v2658_v39  ;;  %v2997_v27 = vld [vmem:[#allocation10 + $0x568] sm:$0xff]  ;;  %v2878_v39 = vld [vmem:[#allocation10 + $0x480] sm:$0xff] }
 0x48d   : > { %2595 = vmatpush1.msra.mxu1 %v2553_v43  ;;  %4106 = vrot.lane.b32.xlu1 %v7568_v21, %s6936_s25  ;;  %v2996_v43 = vld [vmem:[#allocation10 + $0x560] sm:$0xff] }
 0x48e   : > { %2596 = vmatprep.subr.mxu1 %v2552_v37  ;;  %2710 = vmatprep.subr.mxu0 %v2657_v28  ;;  %v2877_v37 = vld [vmem:[#allocation10 + $0x478] sm:$0xff] }
 0x48f   : > { %2597 = vmatpush1.msra.mxu1 %v2551_v29  ;;  %4216 = vrot.lane.b32.xlu0 %v7605_v26, %s6936_s25  ;;  %v2995_v28 = vld [vmem:[#allocation10 + $0x558] sm:$0xff]  ;;  %v2876_v29 = vld [vmem:[#allocation10 + $0x470] sm:$0xff]  ;;  %s662_s25 = sand.u32 1, %s6906_s19  }
 0x490   : > { %2598 = vmatprep.subr.mxu1 %v2550_v56  ;;  %2711 = vmatpush1.msra.mxu0 %v2656_v3  ;;  %v2994_v56 = vld [vmem:[#allocation10 + $0x550] sm:$0xff]  ;;  %v2875_v3 = vld [vmem:[#allocation10 + $0x468] sm:$0xff]  ;;  %s663_s26 = scalar_lea.vmem [#allocation23], %s662_s25  ;;  %s5699_s8 = scalar_lea.sflag [#allocation4], %s662_s25 }
 0x491   : > { %2599 = vmatpush1.msra.mxu1 %v2549_v57  ;;  %4324 = vrot.lane.b32.xlu1 %v7559_v31, %s6937_s6  ;;  %v2781_v31 = vld [vmem:[#allocation10 + $0x448] sm:$0xff]  ;;  %s5711_s20 = sshll.u32 %s663_s26, 4  ;;  %s5712_s20 = int_to_ptr.vmem [resolvable:$true] %s5711_s20 }
 0x492   : > { %2600 = vmatprep.subr.mxu1 %v2548_v42  ;;  %2712 = vmatprep.subr.mxu0 %v2655_v48  ;;  %v2993_v57 = vld [vmem:[#allocation10 + $0x548] sm:$0xff]  ;;  %v2874_v42 = vld [vmem:[#allocation10 + $0x460] sm:$0xff]  ;;  %s6826_s1 = scalar_lea.vmem %s5712_s20, 16 }
 0x493   : > { %2601 = vmatpush1.msra.mxu1 %v2547_v52  ;;  %4434 = vrot.lane.b32.xlu0 %v7584_v49, %s6937_s6  ;;  %v2780_v49 = vld [vmem:[#allocation10 + $0x440] sm:$0xff]  ;;  %v2991_v52 = vld [vmem:[#allocation10 + $0x538] sm:$0xff]  ;;  %p6827_p13 = scmp.ne.s32.totalorder %s5712_s20, %s6826_s1 }
 0x494   : > { %2602 = vmatprep.subr.mxu1 %v2546_v60  ;;  %2713 = vmatpush1.msra.mxu0 %v2654_v5  ;;  %v2992_v48 = vld [vmem:[#allocation10 + $0x540] sm:$0xff]  ;;  %v3113_v60 = vld [vmem:[#allocation10 + $0x638] sm:$0xff] }
 0x495   : > { %2603 = vmatpush1.msra.mxu1 %v2545_v6  ;;  %4326 = vrot.lane.b32.xlu1 %v7563_v4, %s6937_s6  ;;  %v2779_v4 = vld [vmem:[#allocation10 + $0x438] sm:$0xff]  ;;  %v2990_v6 = vld [vmem:[#allocation10 + $0x530] sm:$0xff]  ;;  %p6828_p8 = pnand %p6827_p13, %p8342_p7 }
 0x496   : > { %5993 = vmatmul.mubr.msk.f32.vlgmr.msra.gmra.mxu1 %vm2162_vm8, %v7617_v40  ;;  %2804 = vmatprep.subr.mxu1 %v2783_v15  ;;  %v3112_v15 = vld [vmem:[#allocation10 + $0x630] sm:$0xff] }
 0x497   : > { %4436 = vrot.lane.b32.xlu0 %v7573_v24, %s6937_s6  ;;  %2642 = vmatprep.mubr.f32.mxu1 %v8311_v18  ;;  %v2777_v24 = vld [vmem:[#allocation10 + $0x428] sm:$0xff]  ;;  %p6829_p11 = pneg %p6828_p8 }
 0x498   : > { %2805 = vmatpush1.msra.mxu1 %v2782_v59  ;;  %2746 = vmatprep.mubr.f32.mxu0 %v8311_v18  ;;  %v2989_v59 = vld [vmem:[#allocation10 + $0x528] sm:$0xff] }
 0x499   : > { %4544 = vrot.lane.b32.xlu1 %v7588_v19, %s6937_s6  ;;  %2806 = vmatprep.subr.mxu1 %v2781_v31  ;;  %v2775_v19 = vld [vmem:[#allocation10 + $0x418] sm:$0xff]  ;;  %v3111_v31 = vld [vmem:[#allocation10 + $0x628] sm:$0xff] }
 0x49a   : > { %5994 = vmatmul.mubr.msk.f32.gmra.mxu1 %vm2162_vm8, %v7605_v26  ;;  %2914 = vmatprep.subr.mxu0 %v2893_v0  ;;  %v2988_v0 = vld [vmem:[#allocation10 + $0x520] sm:$0xff] }
 0x49b   : > { %4654 = vrot.lane.b32.xlu0 %v7580_v13, %s6937_s6  ;;  %2807 = vmatpush1.msra.mxu1 %v2780_v49  ;;  %v2772_v13 = vld [vmem:[#allocation10 + $0x400] sm:$0xff] }
 0x49c   : > { %2808 = vmatprep.subr.mxu1 %v2779_v4  ;;  %2856 = vmatprep.mubr.f32.mxu1 %v8311_v18  ;;  %v3110_v49 = vld [vmem:[#allocation10 + $0x620] sm:$0xff]  ;;  %v2987_v4 = vld [vmem:[#allocation10 + $0x518] sm:$0xff] }
 0x49d   : > { %4546 = vrot.lane.b32.xlu1 %v7577_v41, %s6937_s6  ;;  %2809 = vmatpush1.msra.mxu1 %v2778_v30  ;;  %v2769_v41 = vld [vmem:[#allocation10 + $0x3e8] sm:$0xff]  ;;  %v3109_v30 = vld [vmem:[#allocation10 + $0x618] sm:$0xff] }
 0x49e   : > { %2810 = vmatprep.subr.mxu1 %v2777_v24  ;;  %v2986_v24 = vld [vmem:[#allocation10 + $0x510] sm:$0xff] }
 0x49f   : > { %4656 = vrot.lane.b32.xlu0 %v7568_v21, %s6937_s6  ;;  %2811 = vmatpush1.msra.mxu1 %v2776_v61  ;;  %v2767_v21 = vld [vmem:[#allocation10 + $0x3d8] sm:$0xff]  ;;  %v3108_v61 = vld [vmem:[#allocation10 + $0x610] sm:$0xff] }
 0x4a0   : > { %2812 = vmatprep.subr.mxu1 %v2775_v19 }
 0x4a1   : > { %4764 = vrot.lane.b32.xlu1 %v7617_v40, %s6937_s6  ;;  %2813 = vmatpush1.msra.mxu1 %v2774_v7  ;;  %v3003_v40 = vld [vmem:[#allocation10 + $0x598] sm:$0xff]  ;;  %v2985_v7 = vld [vmem:[#allocation10 + $0x508] sm:$0xff] }
 0x4a2   : > { %2814 = vmatprep.subr.mxu1 %v2773_v8  ;;  %v2984_v8 = vld [vmem:[#allocation10 + $0x500] sm:$0xff] }
 0x4a3   : > { %2815 = vmatpush1.msra.mxu1 %v2772_v13  ;;  %v3107_v13 = vld [vmem:[#allocation10 + $0x608] sm:$0xff] }
 0x4a4   : > { %2816 = vmatprep.subr.mxu1 %v2771_v47  ;;  %v3106_v47 = vld [vmem:[#allocation10 + $0x600] sm:$0xff] }
 0x4a5   : > { %4766 = vrot.lane.b32.xlu1 %v7605_v26, %s6937_s6  ;;  %2817 = vmatpush1.msra.mxu1 %v2770_v34  ;;  %v2889_v26 = vld [vmem:[#allocation10 + $0x4d8] sm:$0xff]  ;;  %s6048_s6 = sshll.u32 %s7041_s22, 4  ;;  %s6830_s22 = sshll.u32 %s6939_s24, 4  ;;  %s6831_s22 = int_to_ptr.vmem [resolvable:$false] %s6830_s22 }
 0x4a6   : > { %2818 = vmatprep.subr.mxu1 %v2769_v41  ;;  %v3223_v41 = vld [vmem:[#allocation10 + $0x6d8] sm:$0xff]  ;;  %s8197_s17 = scalar_lea.hbm %s8247_s15, %s6048_s6  ;;  %s6832_s30 = scalar_lea.vmem %s6831_s22, 32 }
 0x4a7   : > { %2819 = vmatpush1.msra.mxu1 %v2768_v9  ;;  %v3105_v9 = vld [vmem:[#allocation10 + $0x5f8] sm:$0xff]  ;;  %p6833_p12 = scmp.lt.s32.totalorder %s5712_s20, %s6831_s22  ;;  %p6834_p0 = scmp.lt.s32.totalorder %s6832_s30, %s6826_s1 }
 0x4a8   : > { %2820 = vmatprep.subr.mxu1 %v2767_v21  ;;  %v3222_v21 = vld [vmem:[#allocation10 + $0x6d0] sm:$0xff] }
 0x4a9   : > { %2821 = vmatpush1.msra.mxu1 %v2766_v62  ;;  %v3104_v62 = vld [vmem:[#allocation10 + $0x5f0] sm:$0xff]  ;;  %p6835_p1 = por %p6834_p0, %p6833_p12 }
 0x4aa   : > { %2822 = vmatprep.subr.mxu1 %v2765_v10  ;;  %v3221_v10 = vld [vmem:[#allocation10 + $0x6c8] sm:$0xff] }
 0x4ab   : > { %2823 = vmatpush1.msra.mxu1 %v2764_v17  ;;  %v3103_v17 = vld [vmem:[#allocation10 + $0x5e8] sm:$0xff]  ;;  %p6836_p9 = pnand %p6835_p1, %p6829_p11 }
 0x4ac   : > { %3024 = vmatprep.subr.mxu1 %v3003_v40  ;;  %v3220_v40 = vld [vmem:[#allocation10 + $0x6c0] sm:$0xff] }
 0x4c3   : > { %v2675_v32 = vpop.permute.xlu0 %2674 }
 0x4c4   : > { %5995 = vmatmul.mubr.msk.f32.vlgmr.msra.gmra.mxu0 %vm2162_vm8, %v2675_v32  ;;  %v3219_v32 = vld [vmem:[#allocation10 + $0x6b8] sm:$0xff] }
 0x4c5   : > { %2915 = vmatpush1.msra.mxu0 %v2892_v20  ;;  %2752 = vmatprep.mubr.f32.mxu0 %v8311_v18  ;;  %v3102_v20 = vld [vmem:[#allocation10 + $0x5e0] sm:$0xff] }
 0x4c6   : > { %2916 = vmatprep.subr.mxu0 %v2891_v22  ;;  %v3101_v22 = vld [vmem:[#allocation10 + $0x5d8] sm:$0xff] }
 0x4c7   : > { %2917 = vmatpush1.msra.mxu0 %v2890_v45  ;;  %v2677_v11 = vpop.permute.xlu0 %2676 }
 0x4c8   : > { %2918 = vmatprep.subr.mxu0 %v2889_v26  ;;  %5996 = vmatmul.mubr.msk.f32.gmra.mxu0 %vm2162_vm8, %v2677_v11  ;;  %v3218_v26 = vld [vmem:[#allocation10 + $0x6b0] sm:$0xff]  ;;  %v3217_v11 = vld [vmem:[#allocation10 + $0x6a8] sm:$0xff] }
 0x4c9   : > { %2919 = vmatpush1.msra.mxu0 %v2888_v46  ;;  %2966 = vmatprep.mubr.f32.mxu0 %v8311_v18  ;;  %v3100_v46 = vld [vmem:[#allocation10 + $0x5d0] sm:$0xff] }
 0x4ca   : > { %2920 = vmatprep.subr.mxu0 %v2887_v38  ;;  %v2785_v33 = vpop.permute.xlu1 %2784  ;;  %v3099_v38 = vld [vmem:[#allocation10 + $0x5c8] sm:$0xff] }
 0x4cb   : > { %2921 = vmatpush1.msra.mxu0 %v2886_v36  ;;  %5997 = vmatmul.mubr.msk.f32.vlgmr.msra.gmra.mxu1 %vm2162_vm8, %v2785_v33  ;;  %v2895_v5 = vpop.permute.xlu0 %2894  ;;  %v3216_v36 = vld [vmem:[#allocation10 + $0x6a0] sm:$0xff]  ;;  %v3097_v33 = vld [vmem:[#allocation10 + $0x5b8] sm:$0xff] }
 0x4cc   : > { %2922 = vmatprep.subr.mxu0 %v2885_v1  ;;  %3025 = vmatpush1.msra.mxu1 %v3002_v12  ;;  %v3098_v1 = vld [vmem:[#allocation10 + $0x5c0] sm:$0xff]  ;;  %v3215_v12 = vld [vmem:[#allocation10 + $0x698] sm:$0xff] }
 0x4cd   : > { %2923 = vmatpush1.msra.mxu0 %v2884_v50  ;;  %3026 = vmatprep.subr.mxu1 %v3001_v58  ;;  %v3214_v50 = vld [vmem:[#allocation10 + $0x690] sm:$0xff] }
 0x4ce   : > { %2924 = vmatprep.subr.mxu0 %v2883_v23  ;;  %3027 = vmatpush1.msra.mxu1 %v3000_v35  ;;  %v3096_v58 = vld [vmem:[#allocation10 + $0x5b0] sm:$0xff]  ;;  %v3213_v23 = vld [vmem:[#allocation10 + $0x688] sm:$0xff] }
 0x4cf   : > { %2925 = vmatpush1.msra.mxu0 %v2882_v14  ;;  %v2787_v25 = vpop.permute.xlu1 %2786  ;;  %2862 = vmatprep.mubr.f32.mxu1 %v8311_v18  ;;  %v3095_v35 = vld [vmem:[#allocation10 + $0x5a8] sm:$0xff]  ;;  %v3212_v14 = vld [vmem:[#allocation10 + $0x680] sm:$0xff] }
 0x4d0   : > { %3028 = vmatprep.subr.mxu1 %v2999_v51  ;;  %2926 = vmatprep.subr.mxu0 %v2881_v16  ;;  %v2897_v19 = vpop.permute.xlu0 %2896  ;;  %v3094_v51 = vld [vmem:[#allocation10 + $0x5a0] sm:$0xff]  ;;  %v3211_v16 = vld [vmem:[#allocation10 + $0x678] sm:$0xff] }
 0x4d1   : > { %5998 = vmatmul.mubr.msk.f32.gmra.mxu1 %vm2162_vm8, %v2787_v25  ;;  %2927 = vmatpush1.msra.mxu0 %v2880_v63  ;;  %v3333_v63 = vld [vmem:[#allocation10 + $0x778] sm:$0xff] }
 0x4d2   : > { %3029 = vmatpush1.msra.mxu1 %v2998_v55  ;;  %2928 = vmatprep.subr.mxu0 %v2879_v2  ;;  %v3210_v55 = vld [vmem:[#allocation10 + $0x670] sm:$0xff] }
 0x4d3   : > { %3030 = vmatprep.subr.mxu1 %v2997_v27  ;;  %2929 = vmatpush1.msra.mxu0 %v2878_v39  ;;  %v3005_v34 = vpop.permute.xlu1 %3004  ;;  %v3332_v2 = vld [vmem:[#allocation10 + $0x770] sm:$0xff]  ;;  %v3209_v27 = vld [vmem:[#allocation10 + $0x668] sm:$0xff] }
 0x4d4   : > { %3031 = vmatpush1.msra.mxu1 %v2996_v43  ;;  %2930 = vmatprep.subr.mxu0 %v2877_v37  ;;  %v3115_v25 = vpop.permute.xlu0 %3114  ;;  %v3331_v39 = vld [vmem:[#allocation10 + $0x768] sm:$0xff]  ;;  %v3208_v43 = vld [vmem:[#allocation10 + $0x660] sm:$0xff] }
 0x4d5   : > { %3032 = vmatprep.subr.mxu1 %v2995_v28  ;;  %2931 = vmatpush1.msra.mxu0 %v2876_v29  ;;  %v3330_v37 = vld [vmem:[#allocation10 + $0x760] sm:$0xff]  ;;  %v3207_v28 = vld [vmem:[#allocation10 + $0x658] sm:$0xff] }
 0x4d6   : > { %3033 = vmatpush1.msra.mxu1 %v2994_v56  ;;  %2932 = vmatprep.subr.mxu0 %v2875_v3  ;;  %v3329_v29 = vld [vmem:[#allocation10 + $0x758] sm:$0xff]  ;;  %v3206_v56 = vld [vmem:[#allocation10 + $0x650] sm:$0xff] }
 0x4d7   : > { %3034 = vmatprep.subr.mxu1 %v2993_v57  ;;  %2933 = vmatpush1.msra.mxu0 %v2874_v42  ;;  %v3007_v45 = vpop.permute.xlu1 %3006  ;;  %v3328_v3 = vld [vmem:[#allocation10 + $0x750] sm:$0xff]  ;;  %v3205_v42 = vld [vmem:[#allocation10 + $0x648] sm:$0xff] }
 0x4d8   : > { %3035 = vmatpush1.msra.mxu1 %v2992_v48  ;;  %5999 = vmatmul.mubr.msk.f32.vlgmr.msra.gmra.mxu0 %vm2162_vm8, %v2895_v5  ;;  %v3117_v57 = vpop.permute.xlu0 %3116  ;;  %v3204_v48 = vld [vmem:[#allocation10 + $0x640] sm:$0xff] }
 0x4d9   : > { %3036 = vmatprep.subr.mxu1 %v2991_v52  ;;  %3134 = vmatprep.subr.mxu0 %v3113_v60  ;;  %v3327_v52 = vld [vmem:[#allocation10 + $0x748] sm:$0xff]  ;;  %v3326_v60 = vld [vmem:[#allocation10 + $0x740] sm:$0xff] }
 0x4da   : > { %3037 = vmatpush1.msra.mxu1 %v2990_v6  ;;  %3135 = vmatpush1.msra.mxu0 %v3112_v15  ;;  %v3443_v6 = vld [vmem:[#allocation10 + $0x818] sm:$0xff] }
 0x4db   : > { %3038 = vmatprep.subr.mxu1 %v2989_v59  ;;  %3136 = vmatprep.subr.mxu0 %v3111_v31  ;;  %v3225_v5 = vpop.permute.xlu1 %3224  ;;  %v3325_v15 = vld [vmem:[#allocation10 + $0x738] sm:$0xff]  ;;  %v3442_v59 = vld [vmem:[#allocation10 + $0x810] sm:$0xff] }
 0x4dc   : > { %3039 = vmatpush1.msra.mxu1 %v2988_v0  ;;  %2972 = vmatprep.mubr.f32.mxu0 %v8311_v18  ;;  %v3324_v31 = vld [vmem:[#allocation10 + $0x730] sm:$0xff]  ;;  %v3441_v0 = vld [vmem:[#allocation10 + $0x808] sm:$0xff] }
 0x4dd   : > { %3137 = vmatpush1.msra.mxu0 %v3110_v49  ;;  %3040 = vmatprep.subr.mxu1 %v2987_v4  ;;  %v3323_v49 = vld [vmem:[#allocation10 + $0x728] sm:$0xff]  ;;  %v3440_v4 = vld [vmem:[#allocation10 + $0x800] sm:$0xff] }
 0x4de   : > { %6000 = vmatmul.mubr.msk.f32.gmra.mxu0 %vm2162_vm8, %v2897_v19  ;;  %3138 = vmatprep.subr.mxu0 %v3109_v30  ;;  %v3322_v30 = vld [vmem:[#allocation10 + $0x720] sm:$0xff] }
 0x4df   : > { %3041 = vmatpush1.msra.mxu1 %v2986_v24  ;;  %3139 = vmatpush1.msra.mxu0 %v3108_v61  ;;  %v3439_v24 = vld [vmem:[#allocation10 + $0x7f8] sm:$0xff]  ;;  %v3227_v19 = vpop.permute.xlu1 %3226 }
 0x4e0   : > { %3042 = vmatprep.subr.mxu1 %v2985_v7  ;;  %3076 = vmatprep.mubr.f32.mxu1 %v8311_v18  ;;  %v3321_v61 = vld [vmem:[#allocation10 + $0x718] sm:$0xff]  ;;  %v3438_v7 = vld [vmem:[#allocation10 + $0x7f0] sm:$0xff] }
 0x4e1   : > { %3043 = vmatpush1.msra.mxu1 %v2984_v8  ;;  %3140 = vmatprep.subr.mxu0 %v3107_v13  ;;  %v3320_v8 = vld [vmem:[#allocation10 + $0x710] sm:$0xff]  ;;  %v3437_v13 = vld [vmem:[#allocation10 + $0x7e8] sm:$0xff] }
 0x4e2   : > { %3141 = vmatpush1.msra.mxu0 %v3106_v47  ;;  %6001 = vmatmul.mubr.msk.f32.vlgmr.msra.gmra.mxu1 %vm2162_vm8, %v3005_v34  ;;  %v3319_v47 = vld [vmem:[#allocation10 + $0x708] sm:$0xff]  ;;  %v3436_v34 = vld [vmem:[#allocation10 + $0x7e0] sm:$0xff] }
 0x4e3   : > { %3244 = vmatprep.subr.mxu1 %v3223_v41  ;;  %3142 = vmatprep.subr.mxu0 %v3105_v9  ;;  %v3318_v41 = vld [vmem:[#allocation10 + $0x700] sm:$0xff]  ;;  %v3435_v9 = vld [vmem:[#allocation10 + $0x7d8] sm:$0xff] }
 0x4e4   : > { %3245 = vmatpush1.msra.mxu1 %v3222_v21  ;;  %3143 = vmatpush1.msra.mxu0 %v3104_v62  ;;  %v3317_v21 = vld [vmem:[#allocation10 + $0x6f8] sm:$0xff]  ;;  %v3434_v62 = vld [vmem:[#allocation10 + $0x7d0] sm:$0xff] }
 0x4e5   : > { %3246 = vmatprep.subr.mxu1 %v3221_v10  ;;  %3082 = vmatprep.mubr.f32.mxu1 %v8311_v18  ;;  %v3316_v10 = vld [vmem:[#allocation10 + $0x6f0] sm:$0xff] }
 0x4e6   : > { %3144 = vmatprep.subr.mxu0 %v3103_v17  ;;  %3247 = vmatpush1.msra.mxu1 %v3220_v40  ;;  %v3433_v17 = vld [vmem:[#allocation10 + $0x7c8] sm:$0xff] }
 0x4e7   : > { %3145 = vmatpush1.msra.mxu0 %v3102_v20  ;;  %6002 = vmatmul.mubr.msk.f32.gmra.mxu1 %vm2162_vm8, %v3007_v45  ;;  %v3315_v40 = vld [vmem:[#allocation10 + $0x6e8] sm:$0xff]  ;;  %v3432_v20 = vld [vmem:[#allocation10 + $0x7c0] sm:$0xff]  ;;  %v3553_v45 = vld [vmem:[#allocation10 + $0x8b8] sm:$0xff] }
 0x4e8   : > { %3248 = vmatprep.subr.mxu1 %v3219_v32  ;;  %3146 = vmatprep.subr.mxu0 %v3101_v22  ;;  %v3314_v32 = vld [vmem:[#allocation10 + $0x6e0] sm:$0xff]  ;;  %v3431_v22 = vld [vmem:[#allocation10 + $0x7b8] sm:$0xff] }
 0x4e9   : > { %3249 = vmatpush1.msra.mxu1 %v3218_v26  ;;  %3147 = vmatpush1.msra.mxu0 %v3100_v46  ;;  %v3335_v26 = vpop.permute.xlu0 %3334  ;;  %v3430_v46 = vld [vmem:[#allocation10 + $0x7b0] sm:$0xff] }
 0x4ea   : > { %3250 = vmatprep.subr.mxu1 %v3217_v11  ;;  %3148 = vmatprep.subr.mxu0 %v3099_v38  ;;  %v3552_v11 = vld [vmem:[#allocation10 + $0x8b0] sm:$0xff]  ;;  %v3429_v38 = vld [vmem:[#allocation10 + $0x7a8] sm:$0xff] }
 0x4eb   : > { %3251 = vmatpush1.msra.mxu1 %v3216_v36  ;;  %3149 = vmatpush1.msra.mxu0 %v3098_v1  ;;  %v3551_v36 = vld [vmem:[#allocation10 + $0x8a8] sm:$0xff]  ;;  %v3428_v1 = vld [vmem:[#allocation10 + $0x7a0] sm:$0xff] }
 0x4ec   : > { %3252 = vmatprep.subr.mxu1 %v3215_v12  ;;  %3150 = vmatprep.subr.mxu0 %v3097_v33  ;;  %v3550_v12 = vld [vmem:[#allocation10 + $0x8a0] sm:$0xff]  ;;  %v3427_v33 = vld [vmem:[#allocation10 + $0x798] sm:$0xff] }
 0x4ed   : > { %3253 = vmatpush1.msra.mxu1 %v3214_v50  ;;  %3151 = vmatpush1.msra.mxu0 %v3096_v58  ;;  %v3549_v50 = vld [vmem:[#allocation10 + $0x898] sm:$0xff]  ;;  %v3426_v58 = vld [vmem:[#allocation10 + $0x790] sm:$0xff] }
 0x4ee   : > { %3254 = vmatprep.subr.mxu1 %v3213_v23  ;;  %3152 = vmatprep.subr.mxu0 %v3095_v35  ;;  %v3548_v23 = vld [vmem:[#allocation10 + $0x890] sm:$0xff]  ;;  %v3337_v35 = vpop.permute.xlu0 %3336 }
 0x4ef   : > { %3255 = vmatpush1.msra.mxu1 %v3212_v14  ;;  %3153 = vmatpush1.msra.mxu0 %v3094_v51  ;;  %v3425_v14 = vld [vmem:[#allocation10 + $0x788] sm:$0xff]  ;;  %v3424_v51 = vld [vmem:[#allocation10 + $0x780] sm:$0xff] }
 0x4f0   : > { %3186 = vmatprep.mubr.f32.mxu0 %v8311_v18  ;;  %3256 = vmatprep.subr.mxu1 %v3211_v16  ;;  %v3547_v16 = vld [vmem:[#allocation10 + $0x888] sm:$0xff] }
 0x4f1   : > { %6003 = vmatmul.mubr.msk.f32.vlgmr.msra.gmra.mxu0 %vm2162_vm8, %v3115_v25  ;;  %3354 = vmatprep.subr.mxu0 %v3333_v63  ;;  %v3546_v63 = vld [vmem:[#allocation10 + $0x880] sm:$0xff]  ;;  %v3445_v25 = vpop.permute.xlu1 %3444 }
 0x4f2   : > { %3257 = vmatpush1.msra.mxu1 %v3210_v55  ;;  %3355 = vmatpush1.msra.mxu0 %v3332_v2  ;;  %v3663_v55 = vld [vmem:[#allocation10 + $0x958] sm:$0xff] }
 0x4f3   : > { %3258 = vmatprep.subr.mxu1 %v3209_v27  ;;  %3356 = vmatprep.subr.mxu0 %v3331_v39  ;;  %v3545_v2 = vld [vmem:[#allocation10 + $0x878] sm:$0xff]  ;;  %v3662_v27 = vld [vmem:[#allocation10 + $0x950] sm:$0xff] }
 0x4f4   : > { %3259 = vmatpush1.msra.mxu1 %v3208_v43  ;;  %3192 = vmatprep.mubr.f32.mxu0 %v8311_v18  ;;  %v3544_v39 = vld [vmem:[#allocation10 + $0x870] sm:$0xff]  ;;  %v3661_v43 = vld [vmem:[#allocation10 + $0x948] sm:$0xff] }
 0x4f5   : > { %3357 = vmatpush1.msra.mxu0 %v3330_v37  ;;  %3260 = vmatprep.subr.mxu1 %v3207_v28  ;;  %v3543_v37 = vld [vmem:[#allocation10 + $0x868] sm:$0xff]  ;;  %v3660_v28 = vld [vmem:[#allocation10 + $0x940] sm:$0xff] }
 0x4f6   : > { %6004 = vmatmul.mubr.msk.f32.gmra.mxu0 %vm2162_vm8, %v3117_v57  ;;  %3358 = vmatprep.subr.mxu0 %v3329_v29  ;;  %v3542_v29 = vld [vmem:[#allocation10 + $0x860] sm:$0xff]  ;;  %v3447_v57 = vpop.permute.xlu1 %3446 }
 0x4f7   : > { %3261 = vmatpush1.msra.mxu1 %v3206_v56  ;;  %3359 = vmatpush1.msra.mxu0 %v3328_v3  ;;  %v3659_v56 = vld [vmem:[#allocation10 + $0x938] sm:$0xff] }
 0x4f8   : > { %3262 = vmatprep.subr.mxu1 %v3205_v42  ;;  %3296 = vmatprep.mubr.f32.mxu1 %v8311_v18  ;;  %v3541_v3 = vld [vmem:[#allocation10 + $0x858] sm:$0xff]  ;;  %v3658_v42 = vld [vmem:[#allocation10 + $0x930] sm:$0xff] }
 0x4f9   : > { %3263 = vmatpush1.msra.mxu1 %v3204_v48  ;;  %3360 = vmatprep.subr.mxu0 %v3327_v52  ;;  %v3540_v48 = vld [vmem:[#allocation10 + $0x850] sm:$0xff]  ;;  %v3657_v52 = vld [vmem:[#allocation10 + $0x928] sm:$0xff] }
 0x4fa   : > { %3361 = vmatpush1.msra.mxu0 %v3326_v60  ;;  %6005 = vmatmul.mubr.msk.f32.vlgmr.msra.gmra.mxu1 %vm2162_vm8, %v3225_v5  ;;  %v3539_v60 = vld [vmem:[#allocation10 + $0x848] sm:$0xff]  ;;  %v3656_v5 = vld [vmem:[#allocation10 + $0x920] sm:$0xff] }
 0x4fb   : > { %3464 = vmatprep.subr.mxu1 %v3443_v6  ;;  %3362 = vmatprep.subr.mxu0 %v3325_v15  ;;  %v3538_v6 = vld [vmem:[#allocation10 + $0x840] sm:$0xff]  ;;  %v3655_v15 = vld [vmem:[#allocation10 + $0x918] sm:$0xff] }
 0x4fc   : > { %3465 = vmatpush1.msra.mxu1 %v3442_v59  ;;  %3363 = vmatpush1.msra.mxu0 %v3324_v31  ;;  %v3537_v59 = vld [vmem:[#allocation10 + $0x838] sm:$0xff]  ;;  %v3654_v31 = vld [vmem:[#allocation10 + $0x910] sm:$0xff] }
 0x4fd   : > { %3466 = vmatprep.subr.mxu1 %v3441_v0  ;;  %3302 = vmatprep.mubr.f32.mxu1 %v8311_v18  ;;  %v3536_v0 = vld [vmem:[#allocation10 + $0x830] sm:$0xff] }
 0x4fe   : > { %3364 = vmatprep.subr.mxu0 %v3323_v49  ;;  %3467 = vmatpush1.msra.mxu1 %v3440_v4  ;;  %v3653_v49 = vld [vmem:[#allocation10 + $0x908] sm:$0xff] }
 0x4ff   : > { %3365 = vmatpush1.msra.mxu0 %v3322_v30  ;;  %6006 = vmatmul.mubr.msk.f32.gmra.mxu1 %vm2162_vm8, %v3227_v19  ;;  %v3535_v4 = vld [vmem:[#allocation10 + $0x828] sm:$0xff]  ;;  %v3652_v30 = vld [vmem:[#allocation10 + $0x900] sm:$0xff]  ;;  %v3650_v19 = vld [vmem:[#allocation10 + $0x8f0] sm:$0xff] }
 0x500   : > { %3468 = vmatprep.subr.mxu1 %v3439_v24  ;;  %3366 = vmatprep.subr.mxu0 %v3321_v61  ;;  %v3534_v24 = vld [vmem:[#allocation10 + $0x820] sm:$0xff]  ;;  %v3651_v61 = vld [vmem:[#allocation10 + $0x8f8] sm:$0xff] }
 0x501   : > { %3469 = vmatpush1.msra.mxu1 %v3438_v7  ;;  %3367 = vmatpush1.msra.mxu0 %v3320_v8  ;;  %v3555_v7 = vpop.permute.xlu0 %3554  ;;  %v3773_v8 = vld [vmem:[#allocation10 + $0x9f8] sm:$0xff] }
 0x502   : > { %3470 = vmatprep.subr.mxu1 %v3437_v13  ;;  %3368 = vmatprep.subr.mxu0 %v3319_v47  ;;  %v3649_v13 = vld [vmem:[#allocation10 + $0x8e8] sm:$0xff]  ;;  %v3772_v47 = vld [vmem:[#allocation10 + $0x9f0] sm:$0xff] }
 0x503   : > { %3471 = vmatpush1.msra.mxu1 %v3436_v34  ;;  %3369 = vmatpush1.msra.mxu0 %v3318_v41  ;;  %v3648_v34 = vld [vmem:[#allocation10 + $0x8e0] sm:$0xff]  ;;  %v3771_v41 = vld [vmem:[#allocation10 + $0x9e8] sm:$0xff] }
 0x504   : > { %3472 = vmatprep.subr.mxu1 %v3435_v9  ;;  %3370 = vmatprep.subr.mxu0 %v3317_v21  ;;  %v3770_v9 = vld [vmem:[#allocation10 + $0x9e0] sm:$0xff]  ;;  %v3647_v21 = vld [vmem:[#allocation10 + $0x8d8] sm:$0xff] }
 0x505   : > { %3473 = vmatpush1.msra.mxu1 %v3434_v62  ;;  %3371 = vmatpush1.msra.mxu0 %v3316_v10  ;;  %v3646_v62 = vld [vmem:[#allocation10 + $0x8d0] sm:$0xff]  ;;  %v3769_v10 = vld [vmem:[#allocation10 + $0x9d8] sm:$0xff] }
 0x506   : > { %3474 = vmatprep.subr.mxu1 %v3433_v17  ;;  %3372 = vmatprep.subr.mxu0 %v3315_v40  ;;  %v3645_v17 = vld [vmem:[#allocation10 + $0x8c8] sm:$0xff]  ;;  %v3557_v40 = vpop.permute.xlu0 %3556 }
 0x507   : > { %3475 = vmatpush1.msra.mxu1 %v3432_v20  ;;  %3373 = vmatpush1.msra.mxu0 %v3314_v32  ;;  %v3768_v20 = vld [vmem:[#allocation10 + $0x9d0] sm:$0xff]  ;;  %v3644_v32 = vld [vmem:[#allocation10 + $0x8c0] sm:$0xff] }
 0x508   : > { %3406 = vmatprep.mubr.f32.mxu0 %v8311_v18  ;;  %3476 = vmatprep.subr.mxu1 %v3431_v22  ;;  %v3767_v22 = vld [vmem:[#allocation10 + $0x9c8] sm:$0xff] }
 0x509   : > { %6007 = vmatmul.mubr.msk.f32.vlgmr.msra.gmra.mxu0 %vm2162_vm8, %v3335_v26  ;;  %3574 = vmatprep.subr.mxu0 %v3553_v45  ;;  %v3766_v45 = vld [vmem:[#allocation10 + $0x9c0] sm:$0xff]  ;;  %v3665_v26 = vpop.permute.xlu1 %3664 }
 0x50a   : > { %3477 = vmatpush1.msra.mxu1 %v3430_v46  ;;  %3575 = vmatpush1.msra.mxu0 %v3552_v11  ;;  %v3883_v46 = vld [vmem:[#allocation10 + $0xa98] sm:$0xff] }
 0x50b   : > { %3478 = vmatprep.subr.mxu1 %v3429_v38  ;;  %3576 = vmatprep.subr.mxu0 %v3551_v36  ;;  %v3765_v11 = vld [vmem:[#allocation10 + $0x9b8] sm:$0xff]  ;;  %v3882_v38 = vld [vmem:[#allocation10 + $0xa90] sm:$0xff] }
 0x50c   : > { %3479 = vmatpush1.msra.mxu1 %v3428_v1  ;;  %3412 = vmatprep.mubr.f32.mxu0 %v8311_v18  ;;  %v3764_v36 = vld [vmem:[#allocation10 + $0x9b0] sm:$0xff]  ;;  %v3881_v1 = vld [vmem:[#allocation10 + $0xa88] sm:$0xff] }
 0x50d   : > { %3577 = vmatpush1.msra.mxu0 %v3550_v12  ;;  %3480 = vmatprep.subr.mxu1 %v3427_v33  ;;  %v3763_v12 = vld [vmem:[#allocation10 + $0x9a8] sm:$0xff]  ;;  %v3880_v33 = vld [vmem:[#allocation10 + $0xa80] sm:$0xff] }
 0x50e   : > { %6008 = vmatmul.mubr.msk.f32.gmra.mxu0 %vm2162_vm8, %v3337_v35  ;;  %3578 = vmatprep.subr.mxu0 %v3549_v50  ;;  %v3762_v50 = vld [vmem:[#allocation10 + $0x9a0] sm:$0xff]  ;;  %v3667_v35 = vpop.permute.xlu1 %3666 }
 0x50f   : > { %3481 = vmatpush1.msra.mxu1 %v3426_v58  ;;  %3579 = vmatpush1.msra.mxu0 %v3548_v23  ;;  %v3879_v58 = vld [vmem:[#allocation10 + $0xa78] sm:$0xff] }
 0x510   : > { %3482 = vmatprep.subr.mxu1 %v3425_v14  ;;  %3516 = vmatprep.mubr.f32.mxu1 %v8311_v18  ;;  %v3761_v23 = vld [vmem:[#allocation10 + $0x998] sm:$0xff]  ;;  %v3878_v14 = vld [vmem:[#allocation10 + $0xa70] sm:$0xff] }
 0x511   : > { %3483 = vmatpush1.msra.mxu1 %v3424_v51  ;;  %3580 = vmatprep.subr.mxu0 %v3547_v16  ;;  %v3760_v51 = vld [vmem:[#allocation10 + $0x990] sm:$0xff]  ;;  %v3877_v16 = vld [vmem:[#allocation10 + $0xa68] sm:$0xff] }
 0x512   : > { %3581 = vmatpush1.msra.mxu0 %v3546_v63  ;;  %6009 = vmatmul.mubr.msk.f32.vlgmr.msra.gmra.mxu1 %vm2162_vm8, %v3445_v25  ;;  %v3759_v63 = vld [vmem:[#allocation10 + $0x988] sm:$0xff]  ;;  %v3876_v25 = vld [vmem:[#allocation10 + $0xa60] sm:$0xff] }
 0x513   : > { %3684 = vmatprep.subr.mxu1 %v3663_v55  ;;  %3582 = vmatprep.subr.mxu0 %v3545_v2  ;;  %v3758_v55 = vld [vmem:[#allocation10 + $0x980] sm:$0xff]  ;;  %v3875_v2 = vld [vmem:[#allocation10 + $0xa58] sm:$0xff] }
 0x514   : > { %3685 = vmatpush1.msra.mxu1 %v3662_v27  ;;  %3583 = vmatpush1.msra.mxu0 %v3544_v39  ;;  %v3757_v27 = vld [vmem:[#allocation10 + $0x978] sm:$0xff]  ;;  %v3874_v39 = vld [vmem:[#allocation10 + $0xa50] sm:$0xff] }
 0x515   : > { %3686 = vmatprep.subr.mxu1 %v3661_v43  ;;  %3522 = vmatprep.mubr.f32.mxu1 %v8311_v18  ;;  %v3756_v43 = vld [vmem:[#allocation10 + $0x970] sm:$0xff] }
 0x516   : > { %3584 = vmatprep.subr.mxu0 %v3543_v37  ;;  %3687 = vmatpush1.msra.mxu1 %v3660_v28  ;;  %v3873_v37 = vld [vmem:[#allocation10 + $0xa48] sm:$0xff] }
 0x517   : > { %3585 = vmatpush1.msra.mxu0 %v3542_v29  ;;  %6010 = vmatmul.mubr.msk.f32.gmra.mxu1 %vm2162_vm8, %v3447_v57  ;;  %v3755_v28 = vld [vmem:[#allocation10 + $0x968] sm:$0xff]  ;;  %v3872_v29 = vld [vmem:[#allocation10 + $0xa40] sm:$0xff]  ;;  %v3870_v57 = vld [vmem:[#allocation10 + $0xa30] sm:$0xff] }
 0x518   : > { %3688 = vmatprep.subr.mxu1 %v3659_v56  ;;  %3586 = vmatprep.subr.mxu0 %v3541_v3  ;;  %v3754_v56 = vld [vmem:[#allocation10 + $0x960] sm:$0xff]  ;;  %v3871_v3 = vld [vmem:[#allocation10 + $0xa38] sm:$0xff] }
 0x519   : > { %3689 = vmatpush1.msra.mxu1 %v3658_v42  ;;  %3587 = vmatpush1.msra.mxu0 %v3540_v48  ;;  %v3775_v42 = vpop.permute.xlu0 %3774  ;;  %v3993_v48 = vld [vmem:[#allocation10 + $0xb38] sm:$0xff] }
 0x51a   : > { %3690 = vmatprep.subr.mxu1 %v3657_v52  ;;  %3588 = vmatprep.subr.mxu0 %v3539_v60  ;;  %v3869_v52 = vld [vmem:[#allocation10 + $0xa28] sm:$0xff]  ;;  %v3992_v60 = vld [vmem:[#allocation10 + $0xb30] sm:$0xff] }
 0x51b   : > { %3691 = vmatpush1.msra.mxu1 %v3656_v5  ;;  %3589 = vmatpush1.msra.mxu0 %v3538_v6  ;;  %v3868_v5 = vld [vmem:[#allocation10 + $0xa20] sm:$0xff]  ;;  %v3991_v6 = vld [vmem:[#allocation10 + $0xb28] sm:$0xff] }
 0x51c   : > { %3692 = vmatprep.subr.mxu1 %v3655_v15  ;;  %3590 = vmatprep.subr.mxu0 %v3537_v59  ;;  %v3867_v15 = vld [vmem:[#allocation10 + $0xa18] sm:$0xff]  ;;  %v3990_v59 = vld [vmem:[#allocation10 + $0xb20] sm:$0xff] }
 0x51d   : > { %3693 = vmatpush1.msra.mxu1 %v3654_v31  ;;  %3591 = vmatpush1.msra.mxu0 %v3536_v0  ;;  %v3866_v31 = vld [vmem:[#allocation10 + $0xa10] sm:$0xff]  ;;  %v3989_v0 = vld [vmem:[#allocation10 + $0xb18] sm:$0xff] }
 0x51e   : > { %3694 = vmatprep.subr.mxu1 %v3653_v49  ;;  %3592 = vmatprep.subr.mxu0 %v3535_v4  ;;  %v3865_v49 = vld [vmem:[#allocation10 + $0xa08] sm:$0xff]  ;;  %v3777_v4 = vpop.permute.xlu0 %3776 }
 0x51f   : > { %3695 = vmatpush1.msra.mxu1 %v3652_v30  ;;  %3593 = vmatpush1.msra.mxu0 %v3534_v24  ;;  %v3988_v30 = vld [vmem:[#allocation10 + $0xb10] sm:$0xff]  ;;  %v3864_v24 = vld [vmem:[#allocation10 + $0xa00] sm:$0xff] }
 0x520   : > { %3626 = vmatprep.mubr.f32.mxu0 %v8311_v18  ;;  %3696 = vmatprep.subr.mxu1 %v3651_v61  ;;  %v3987_v61 = vld [vmem:[#allocation10 + $0xb08] sm:$0xff] }
 0x521   : > { %6011 = vmatmul.mubr.msk.f32.vlgmr.msra.gmra.mxu0 %vm2162_vm8, %v3555_v7  ;;  %3697 = vmatpush1.msra.mxu1 %v3650_v19  ;;  %v3986_v19 = vld [vmem:[#allocation10 + $0xb00] sm:$0xff]  ;;  %v3885_v7 = vpop.permute.xlu1 %3884 }
 0x522   : > { %3794 = vmatprep.subr.mxu0 %v3773_v8  ;;  %3698 = vmatprep.subr.mxu1 %v3649_v13  ;;  %v4103_v8 = vld [vmem:[#allocation10 + $0xbd8] sm:$0xff] }
 0x523   : > { %3795 = vmatpush1.msra.mxu0 %v3772_v47  ;;  %3699 = vmatpush1.msra.mxu1 %v3648_v34  ;;  %v3985_v13 = vld [vmem:[#allocation10 + $0xaf8] sm:$0xff]  ;;  %v4102_v47 = vld [vmem:[#allocation10 + $0xbd0] sm:$0xff] }
 0x524   : > { %3796 = vmatprep.subr.mxu0 %v3771_v41  ;;  %3632 = vmatprep.mubr.f32.mxu0 %v8311_v18  ;;  %v3984_v34 = vld [vmem:[#allocation10 + $0xaf0] sm:$0xff]  ;;  %v4101_v41 = vld [vmem:[#allocation10 + $0xbc8] sm:$0xff] }
 0x525   : > { %3797 = vmatpush1.msra.mxu0 %v3770_v9  ;;  %3700 = vmatprep.subr.mxu1 %v3647_v21  ;;  %v3983_v9 = vld [vmem:[#allocation10 + $0xae8] sm:$0xff]  ;;  %v4100_v21 = vld [vmem:[#allocation10 + $0xbc0] sm:$0xff] }
 0x526   : > { %6012 = vmatmul.mubr.msk.f32.gmra.mxu0 %vm2162_vm8, %v3557_v40  ;;  %3701 = vmatpush1.msra.mxu1 %v3646_v62  ;;  %v3982_v62 = vld [vmem:[#allocation10 + $0xae0] sm:$0xff]  ;;  %v3887_v40 = vpop.permute.xlu1 %3886 }
 0x527   : > { %3798 = vmatprep.subr.mxu0 %v3769_v10  ;;  %3702 = vmatprep.subr.mxu1 %v3645_v17  ;;  %v4099_v10 = vld [vmem:[#allocation10 + $0xbb8] sm:$0xff] }
 0x528   : > { %3799 = vmatpush1.msra.mxu0 %v3768_v20  ;;  %3703 = vmatpush1.msra.mxu1 %v3644_v32  ;;  %v3981_v17 = vld [vmem:[#allocation10 + $0xad8] sm:$0xff]  ;;  %v4098_v20 = vld [vmem:[#allocation10 + $0xbb0] sm:$0xff] }
 0x529   : > { %3736 = vmatprep.mubr.f32.mxu1 %v8311_v18  ;;  %3800 = vmatprep.subr.mxu0 %v3767_v22  ;;  %v3980_v32 = vld [vmem:[#allocation10 + $0xad0] sm:$0xff]  ;;  %v4097_v22 = vld [vmem:[#allocation10 + $0xba8] sm:$0xff] }
 0x52a   : > { %6013 = vmatmul.mubr.msk.f32.vlgmr.msra.gmra.mxu1 %vm2162_vm8, %v3665_v26  ;;  %3801 = vmatpush1.msra.mxu0 %v3766_v45  ;;  %v3979_v45 = vld [vmem:[#allocation10 + $0xac8] sm:$0xff]  ;;  %v4096_v26 = vld [vmem:[#allocation10 + $0xba0] sm:$0xff] }
 0x52b   : > { %3904 = vmatprep.subr.mxu1 %v3883_v46  ;;  %3802 = vmatprep.subr.mxu0 %v3765_v11  ;;  %v3978_v46 = vld [vmem:[#allocation10 + $0xac0] sm:$0xff]  ;;  %v4095_v11 = vld [vmem:[#allocation10 + $0xb98] sm:$0xff] }
 0x52c   : > { %3905 = vmatpush1.msra.mxu1 %v3882_v38  ;;  %3803 = vmatpush1.msra.mxu0 %v3764_v36  ;;  %v3977_v38 = vld [vmem:[#allocation10 + $0xab8] sm:$0xff]  ;;  %v4094_v36 = vld [vmem:[#allocation10 + $0xb90] sm:$0xff] }
 0x52d   : > { %3906 = vmatprep.subr.mxu1 %v3881_v1  ;;  %3742 = vmatprep.mubr.f32.mxu1 %v8311_v18  ;;  %v3976_v1 = vld [vmem:[#allocation10 + $0xab0] sm:$0xff] }
 0x52e   : > { %3804 = vmatprep.subr.mxu0 %v3763_v12  ;;  %3907 = vmatpush1.msra.mxu1 %v3880_v33  ;;  %v4093_v12 = vld [vmem:[#allocation10 + $0xb88] sm:$0xff] }
 0x52f   : > { %6014 = vmatmul.mubr.msk.f32.gmra.mxu1 %vm2162_vm8, %v3667_v35  ;;  %3805 = vmatpush1.msra.mxu0 %v3762_v50  ;;  %v3975_v33 = vld [vmem:[#allocation10 + $0xaa8] sm:$0xff]  ;;  %v4092_v50 = vld [vmem:[#allocation10 + $0xb80] sm:$0xff]  ;;  %v4090_v35 = vld [vmem:[#allocation10 + $0xb70] sm:$0xff] }
 0x530   : > { %3908 = vmatprep.subr.mxu1 %v3879_v58  ;;  %3806 = vmatprep.subr.mxu0 %v3761_v23  ;;  %v3974_v58 = vld [vmem:[#allocation10 + $0xaa0] sm:$0xff]  ;;  %v4091_v23 = vld [vmem:[#allocation10 + $0xb78] sm:$0xff] }
 0x531   : > { %3909 = vmatpush1.msra.mxu1 %v3878_v14  ;;  %3807 = vmatpush1.msra.mxu0 %v3760_v51  ;;  %v3995_v14 = vpop.permute.xlu0 %3994  ;;  %v4213_v51 = vld [vmem:[#allocation10 + $0xc78] sm:$0xff] }
 0x532   : > { %3910 = vmatprep.subr.mxu1 %v3877_v16  ;;  %3808 = vmatprep.subr.mxu0 %v3759_v63  ;;  %v4089_v16 = vld [vmem:[#allocation10 + $0xb68] sm:$0xff]  ;;  %v4212_v63 = vld [vmem:[#allocation10 + $0xc70] sm:$0xff] }
 0x533   : > { %3911 = vmatpush1.msra.mxu1 %v3876_v25  ;;  %3809 = vmatpush1.msra.mxu0 %v3758_v55  ;;  %v4088_v25 = vld [vmem:[#allocation10 + $0xb60] sm:$0xff]  ;;  %v4211_v55 = vld [vmem:[#allocation10 + $0xc68] sm:$0xff] }
 0x534   : > { %3912 = vmatprep.subr.mxu1 %v3875_v2  ;;  %3810 = vmatprep.subr.mxu0 %v3757_v27  ;;  %v4087_v2 = vld [vmem:[#allocation10 + $0xb58] sm:$0xff]  ;;  %v4210_v27 = vld [vmem:[#allocation10 + $0xc60] sm:$0xff] }
 0x535   : > { %3913 = vmatpush1.msra.mxu1 %v3874_v39  ;;  %3811 = vmatpush1.msra.mxu0 %v3756_v43  ;;  %v4086_v39 = vld [vmem:[#allocation10 + $0xb50] sm:$0xff]  ;;  %v4209_v43 = vld [vmem:[#allocation10 + $0xc58] sm:$0xff] }
 0x536   : > { %3914 = vmatprep.subr.mxu1 %v3873_v37  ;;  %3812 = vmatprep.subr.mxu0 %v3755_v28  ;;  %v4085_v37 = vld [vmem:[#allocation10 + $0xb48] sm:$0xff]  ;;  %v3997_v28 = vpop.permute.xlu0 %3996 }
 0x537   : > { %3915 = vmatpush1.msra.mxu1 %v3872_v29  ;;  %3813 = vmatpush1.msra.mxu0 %v3754_v56  ;;  %v4208_v29 = vld [vmem:[#allocation10 + $0xc50] sm:$0xff]  ;;  %v4084_v56 = vld [vmem:[#allocation10 + $0xb40] sm:$0xff] }
 0x538   : > { %3846 = vmatprep.mubr.f32.mxu0 %v8311_v18  ;;  %3916 = vmatprep.subr.mxu1 %v3871_v3  ;;  %v4207_v3 = vld [vmem:[#allocation10 + $0xc48] sm:$0xff] }
 0x539   : > { %6015 = vmatmul.mubr.msk.f32.vlgmr.msra.gmra.mxu0 %vm2162_vm8, %v3775_v42  ;;  %3917 = vmatpush1.msra.mxu1 %v3870_v57  ;;  %v4206_v57 = vld [vmem:[#allocation10 + $0xc40] sm:$0xff]  ;;  %v4105_v42 = vpop.permute.xlu1 %4104 }
 0x53a   : > { %4014 = vmatprep.subr.mxu0 %v3993_v48  ;;  %3918 = vmatprep.subr.mxu1 %v3869_v52  ;;  %v4323_v48 = vld [vmem:[#allocation10 + $0xd18] sm:$0xff] }
 0x53b   : > { %4015 = vmatpush1.msra.mxu0 %v3992_v60  ;;  %3919 = vmatpush1.msra.mxu1 %v3868_v5  ;;  %v4205_v52 = vld [vmem:[#allocation10 + $0xc38] sm:$0xff]  ;;  %v4322_v60 = vld [vmem:[#allocation10 + $0xd10] sm:$0xff] }
 0x53c   : > { %4016 = vmatprep.subr.mxu0 %v3991_v6  ;;  %3852 = vmatprep.mubr.f32.mxu0 %v8311_v18  ;;  %v4204_v5 = vld [vmem:[#allocation10 + $0xc30] sm:$0xff]  ;;  %v4321_v6 = vld [vmem:[#allocation10 + $0xd08] sm:$0xff] }
 0x53d   : > { %3920 = vmatprep.subr.mxu1 %v3867_v15  ;;  %4017 = vmatpush1.msra.mxu0 %v3990_v59  ;;  %v4203_v15 = vld [vmem:[#allocation10 + $0xc28] sm:$0xff]  ;;  %v4320_v59 = vld [vmem:[#allocation10 + $0xd00] sm:$0xff] }
 0x53e   : > { %6016 = vmatmul.mubr.msk.f32.gmra.mxu0 %vm2162_vm8, %v3777_v4  ;;  %3921 = vmatpush1.msra.mxu1 %v3866_v31  ;;  %v4202_v31 = vld [vmem:[#allocation10 + $0xc20] sm:$0xff]  ;;  %v4107_v4 = vpop.permute.xlu1 %4106 }
 0x53f   : > { %4018 = vmatprep.subr.mxu0 %v3989_v0  ;;  %3922 = vmatprep.subr.mxu1 %v3865_v49  ;;  %v4319_v0 = vld [vmem:[#allocation10 + $0xcf8] sm:$0xff] }
 0x540   : > { %4019 = vmatpush1.msra.mxu0 %v3988_v30  ;;  %3923 = vmatpush1.msra.mxu1 %v3864_v24  ;;  %v4201_v49 = vld [vmem:[#allocation10 + $0xc18] sm:$0xff]  ;;  %v4318_v30 = vld [vmem:[#allocation10 + $0xcf0] sm:$0xff] }
 0x541   : > { %3956 = vmatprep.mubr.f32.mxu1 %v8311_v18  ;;  %4020 = vmatprep.subr.mxu0 %v3987_v61  ;;  %v4200_v24 = vld [vmem:[#allocation10 + $0xc10] sm:$0xff]  ;;  %v4317_v61 = vld [vmem:[#allocation10 + $0xce8] sm:$0xff] }
 0x542   : > { %6017 = vmatmul.mubr.msk.f32.vlgmr.msra.gmra.mxu1 %vm2162_vm8, %v3885_v7  ;;  %4021 = vmatpush1.msra.mxu0 %v3986_v19  ;;  %v4199_v19 = vld [vmem:[#allocation10 + $0xc08] sm:$0xff]  ;;  %v4316_v7 = vld [vmem:[#allocation10 + $0xce0] sm:$0xff] }
 0x543   : > { %4124 = vmatprep.subr.mxu1 %v4103_v8  ;;  %4022 = vmatprep.subr.mxu0 %v3985_v13  ;;  %v4198_v8 = vld [vmem:[#allocation10 + $0xc00] sm:$0xff]  ;;  %v4315_v13 = vld [vmem:[#allocation10 + $0xcd8] sm:$0xff] }
 0x544   : > { %4125 = vmatpush1.msra.mxu1 %v4102_v47  ;;  %4023 = vmatpush1.msra.mxu0 %v3984_v34  ;;  %v4197_v47 = vld [vmem:[#allocation10 + $0xbf8] sm:$0xff]  ;;  %v4314_v34 = vld [vmem:[#allocation10 + $0xcd0] sm:$0xff] }
 0x545   : > { %4126 = vmatprep.subr.mxu1 %v4101_v41  ;;  %3962 = vmatprep.mubr.f32.mxu1 %v8311_v18  ;;  %v4196_v41 = vld [vmem:[#allocation10 + $0xbf0] sm:$0xff] }
 0x546   : > { %4024 = vmatprep.subr.mxu0 %v3983_v9  ;;  %4127 = vmatpush1.msra.mxu1 %v4100_v21  ;;  %v4313_v9 = vld [vmem:[#allocation10 + $0xcc8] sm:$0xff] }
 0x547   : > { %6018 = vmatmul.mubr.msk.f32.gmra.mxu1 %vm2162_vm8, %v3887_v40  ;;  %4025 = vmatpush1.msra.mxu0 %v3982_v62  ;;  %v4195_v21 = vld [vmem:[#allocation10 + $0xbe8] sm:$0xff]  ;;  %v4312_v62 = vld [vmem:[#allocation10 + $0xcc0] sm:$0xff]  ;;  %v4310_v40 = vld [vmem:[#allocation10 + $0xcb0] sm:$0xff] }
 0x548   : > { %4128 = vmatprep.subr.mxu1 %v4099_v10  ;;  %4026 = vmatprep.subr.mxu0 %v3981_v17  ;;  %v4194_v10 = vld [vmem:[#allocation10 + $0xbe0] sm:$0xff]  ;;  %v4311_v17 = vld [vmem:[#allocation10 + $0xcb8] sm:$0xff] }
 0x549   : > { %4129 = vmatpush1.msra.mxu1 %v4098_v20  ;;  %4027 = vmatpush1.msra.mxu0 %v3980_v32  ;;  %v4215_v20 = vpop.permute.xlu0 %4214  ;;  %v4433_v32 = vld [vmem:[#allocation10 + $0xdb8] sm:$0xff] }
 0x54a   : > { %4130 = vmatprep.subr.mxu1 %v4097_v22  ;;  %4028 = vmatprep.subr.mxu0 %v3979_v45  ;;  %v4309_v22 = vld [vmem:[#allocation10 + $0xca8] sm:$0xff]  ;;  %v4432_v45 = vld [vmem:[#allocation10 + $0xdb0] sm:$0xff] }
 0x54b   : > { %4131 = vmatpush1.msra.mxu1 %v4096_v26  ;;  %4029 = vmatpush1.msra.mxu0 %v3978_v46  ;;  %v4308_v26 = vld [vmem:[#allocation10 + $0xca0] sm:$0xff]  ;;  %v4431_v46 = vld [vmem:[#allocation10 + $0xda8] sm:$0xff] }
 0x54c   : > { %4132 = vmatprep.subr.mxu1 %v4095_v11  ;;  %4030 = vmatprep.subr.mxu0 %v3977_v38  ;;  %v4307_v11 = vld [vmem:[#allocation10 + $0xc98] sm:$0xff]  ;;  %v4430_v38 = vld [vmem:[#allocation10 + $0xda0] sm:$0xff] }
 0x54d   : > { %4133 = vmatpush1.msra.mxu1 %v4094_v36  ;;  %4031 = vmatpush1.msra.mxu0 %v3976_v1  ;;  %v4306_v36 = vld [vmem:[#allocation10 + $0xc90] sm:$0xff]  ;;  %v4429_v1 = vld [vmem:[#allocation10 + $0xd98] sm:$0xff] }
 0x54e   : > { %4134 = vmatprep.subr.mxu1 %v4093_v12  ;;  %4032 = vmatprep.subr.mxu0 %v3975_v33  ;;  %v4305_v12 = vld [vmem:[#allocation10 + $0xc88] sm:$0xff]  ;;  %v4217_v33 = vpop.permute.xlu0 %4216 }
 0x54f   : > { %4135 = vmatpush1.msra.mxu1 %v4092_v50  ;;  %4033 = vmatpush1.msra.mxu0 %v3974_v58  ;;  %v4428_v50 = vld [vmem:[#allocation10 + $0xd90] sm:$0xff]  ;;  %v4304_v58 = vld [vmem:[#allocation10 + $0xc80] sm:$0xff] }
 0x550   : > { %4066 = vmatprep.mubr.f32.mxu0 %v8311_v18  ;;  %4136 = vmatprep.subr.mxu1 %v4091_v23  ;;  %v4427_v23 = vld [vmem:[#allocation10 + $0xd88] sm:$0xff] }
 0x551   : > { %6019 = vmatmul.mubr.msk.f32.vlgmr.msra.gmra.mxu0 %vm2162_vm8, %v3995_v14  ;;  %4137 = vmatpush1.msra.mxu1 %v4090_v35  ;;  %v4426_v35 = vld [vmem:[#allocation10 + $0xd80] sm:$0xff]  ;;  %v4325_v14 = vpop.permute.xlu1 %4324 }
 0x552   : > { %4234 = vmatprep.subr.mxu0 %v4213_v51  ;;  %4138 = vmatprep.subr.mxu1 %v4089_v16  ;;  %v4543_v51 = vld [vmem:[#allocation10 + $0xe58] sm:$0xff] }
 0x553   : > { %4235 = vmatpush1.msra.mxu0 %v4212_v63  ;;  %4139 = vmatpush1.msra.mxu1 %v4088_v25  ;;  %v4425_v16 = vld [vmem:[#allocation10 + $0xd78] sm:$0xff]  ;;  %v4542_v63 = vld [vmem:[#allocation10 + $0xe50] sm:$0xff] }
 0x554   : > { %4236 = vmatprep.subr.mxu0 %v4211_v55  ;;  %4072 = vmatprep.mubr.f32.mxu0 %v8311_v18  ;;  %v4424_v25 = vld [vmem:[#allocation10 + $0xd70] sm:$0xff]  ;;  %v4541_v55 = vld [vmem:[#allocation10 + $0xe48] sm:$0xff] }
 0x555   : > { %4140 = vmatprep.subr.mxu1 %v4087_v2  ;;  %4237 = vmatpush1.msra.mxu0 %v4210_v27  ;;  %v4423_v2 = vld [vmem:[#allocation10 + $0xd68] sm:$0xff]  ;;  %v4540_v27 = vld [vmem:[#allocation10 + $0xe40] sm:$0xff] }
 0x556   : > { %6020 = vmatmul.mubr.msk.f32.gmra.mxu0 %vm2162_vm8, %v3997_v28  ;;  %4141 = vmatpush1.msra.mxu1 %v4086_v39  ;;  %v4422_v39 = vld [vmem:[#allocation10 + $0xd60] sm:$0xff]  ;;  %v4327_v28 = vpop.permute.xlu1 %4326 }
 0x557   : > { %4238 = vmatprep.subr.mxu0 %v4209_v43  ;;  %4142 = vmatprep.subr.mxu1 %v4085_v37  ;;  %v4539_v43 = vld [vmem:[#allocation10 + $0xe38] sm:$0xff] }
 0x558   : > { %4239 = vmatpush1.msra.mxu0 %v4208_v29  ;;  %4143 = vmatpush1.msra.mxu1 %v4084_v56  ;;  %v4421_v37 = vld [vmem:[#allocation10 + $0xd58] sm:$0xff]  ;;  %v4538_v29 = vld [vmem:[#allocation10 + $0xe30] sm:$0xff] }
 0x559   : > { %4176 = vmatprep.mubr.f32.mxu1 %v8311_v18  ;;  %4240 = vmatprep.subr.mxu0 %v4207_v3  ;;  %v4420_v56 = vld [vmem:[#allocation10 + $0xd50] sm:$0xff]  ;;  %v4537_v3 = vld [vmem:[#allocation10 + $0xe28] sm:$0xff] }
 0x55a   : > { %6021 = vmatmul.mubr.msk.f32.vlgmr.msra.gmra.mxu1 %vm2162_vm8, %v4105_v42  ;;  %4241 = vmatpush1.msra.mxu0 %v4206_v57  ;;  %v4419_v57 = vld [vmem:[#allocation10 + $0xd48] sm:$0xff]  ;;  %v4536_v42 = vld [vmem:[#allocation10 + $0xe20] sm:$0xff] }
 0x55b   : > { %4344 = vmatprep.subr.mxu1 %v4323_v48  ;;  %4242 = vmatprep.subr.mxu0 %v4205_v52  ;;  %v4418_v48 = vld [vmem:[#allocation10 + $0xd40] sm:$0xff]  ;;  %v4535_v52 = vld [vmem:[#allocation10 + $0xe18] sm:$0xff] }
 0x55c   : > { %4345 = vmatpush1.msra.mxu1 %v4322_v60  ;;  %4243 = vmatpush1.msra.mxu0 %v4204_v5  ;;  %v4417_v60 = vld [vmem:[#allocation10 + $0xd38] sm:$0xff]  ;;  %v4534_v5 = vld [vmem:[#allocation10 + $0xe10] sm:$0xff] }
 0x55d   : > { %4346 = vmatprep.subr.mxu1 %v4321_v6  ;;  %4182 = vmatprep.mubr.f32.mxu1 %v8311_v18  ;;  %v4416_v6 = vld [vmem:[#allocation10 + $0xd30] sm:$0xff] }
 0x55e   : > { %4244 = vmatprep.subr.mxu0 %v4203_v15  ;;  %4347 = vmatpush1.msra.mxu1 %v4320_v59  ;;  %v4533_v15 = vld [vmem:[#allocation10 + $0xe08] sm:$0xff] }
 0x55f   : > { %6022 = vmatmul.mubr.msk.f32.gmra.mxu1 %vm2162_vm8, %v4107_v4  ;;  %4245 = vmatpush1.msra.mxu0 %v4202_v31  ;;  %v4415_v59 = vld [vmem:[#allocation10 + $0xd28] sm:$0xff]  ;;  %v4532_v31 = vld [vmem:[#allocation10 + $0xe00] sm:$0xff]  ;;  %v4530_v4 = vld [vmem:[#allocation10 + $0xdf0] sm:$0xff] }
 0x560   : > { %4348 = vmatprep.subr.mxu1 %v4319_v0  ;;  %4246 = vmatprep.subr.mxu0 %v4201_v49  ;;  %v4414_v0 = vld [vmem:[#allocation10 + $0xd20] sm:$0xff]  ;;  %v4531_v49 = vld [vmem:[#allocation10 + $0xdf8] sm:$0xff] }
 0x561   : > { %4349 = vmatpush1.msra.mxu1 %v4318_v30  ;;  %4247 = vmatpush1.msra.mxu0 %v4200_v24  ;;  %v4435_v30 = vpop.permute.xlu0 %4434  ;;  %v4653_v24 = vld [vmem:[#allocation10 + $0xef8] sm:$0xff] }
 0x562   : > { %4350 = vmatprep.subr.mxu1 %v4317_v61  ;;  %4248 = vmatprep.subr.mxu0 %v4199_v19  ;;  %v4529_v61 = vld [vmem:[#allocation10 + $0xde8] sm:$0xff]  ;;  %v4652_v19 = vld [vmem:[#allocation10 + $0xef0] sm:$0xff] }
 0x563   : > { %4351 = vmatpush1.msra.mxu1 %v4316_v7  ;;  %4249 = vmatpush1.msra.mxu0 %v4198_v8  ;;  %v4528_v7 = vld [vmem:[#allocation10 + $0xde0] sm:$0xff]  ;;  %v4651_v8 = vld [vmem:[#allocation10 + $0xee8] sm:$0xff] }
 0x564   : > { %4352 = vmatprep.subr.mxu1 %v4315_v13  ;;  %4250 = vmatprep.subr.mxu0 %v4197_v47  ;;  %v4527_v13 = vld [vmem:[#allocation10 + $0xdd8] sm:$0xff]  ;;  %v4650_v47 = vld [vmem:[#allocation10 + $0xee0] sm:$0xff] }
 0x565   : > { %4353 = vmatpush1.msra.mxu1 %v4314_v34  ;;  %4251 = vmatpush1.msra.mxu0 %v4196_v41  ;;  %v4526_v34 = vld [vmem:[#allocation10 + $0xdd0] sm:$0xff]  ;;  %v4649_v41 = vld [vmem:[#allocation10 + $0xed8] sm:$0xff] }
 0x566   : > { %4354 = vmatprep.subr.mxu1 %v4313_v9  ;;  %4252 = vmatprep.subr.mxu0 %v4195_v21  ;;  %v4525_v9 = vld [vmem:[#allocation10 + $0xdc8] sm:$0xff]  ;;  %v4437_v21 = vpop.permute.xlu0 %4436 }
 0x567   : > { %4355 = vmatpush1.msra.mxu1 %v4312_v62  ;;  %4253 = vmatpush1.msra.mxu0 %v4194_v10  ;;  %v4648_v62 = vld [vmem:[#allocation10 + $0xed0] sm:$0xff]  ;;  %v4524_v10 = vld [vmem:[#allocation10 + $0xdc0] sm:$0xff] }
 0x568   : > { %4286 = vmatprep.mubr.f32.mxu0 %v8311_v18  ;;  %4356 = vmatprep.subr.mxu1 %v4311_v17  ;;  %v4647_v17 = vld [vmem:[#allocation10 + $0xec8] sm:$0xff] }
 0x569   : > { %6023 = vmatmul.mubr.msk.f32.vlgmr.msra.gmra.mxu0 %vm2162_vm8, %v4215_v20  ;;  %4357 = vmatpush1.msra.mxu1 %v4310_v40  ;;  %v4646_v40 = vld [vmem:[#allocation10 + $0xec0] sm:$0xff]  ;;  %v4545_v20 = vpop.permute.xlu1 %4544 }
 0x56a   : > { %4454 = vmatprep.subr.mxu0 %v4433_v32  ;;  %4358 = vmatprep.subr.mxu1 %v4309_v22  ;;  %v4763_v32 = vld [vmem:[#allocation10 + $0xf98] sm:$0xff] }
 0x56b   : > { %4455 = vmatpush1.msra.mxu0 %v4432_v45  ;;  %4359 = vmatpush1.msra.mxu1 %v4308_v26  ;;  %v4645_v22 = vld [vmem:[#allocation10 + $0xeb8] sm:$0xff]  ;;  %v4762_v45 = vld [vmem:[#allocation10 + $0xf90] sm:$0xff] }
 0x56c   : > { %4456 = vmatprep.subr.mxu0 %v4431_v46  ;;  %4292 = vmatprep.mubr.f32.mxu0 %v8311_v18  ;;  %v4644_v26 = vld [vmem:[#allocation10 + $0xeb0] sm:$0xff]  ;;  %v4761_v46 = vld [vmem:[#allocation10 + $0xf88] sm:$0xff] }
 0x56d   : > { %4360 = vmatprep.subr.mxu1 %v4307_v11  ;;  %4457 = vmatpush1.msra.mxu0 %v4430_v38  ;;  %v4643_v11 = vld [vmem:[#allocation10 + $0xea8] sm:$0xff]  ;;  %v4760_v38 = vld [vmem:[#allocation10 + $0xf80] sm:$0xff] }
 0x56e   : > { %6024 = vmatmul.mubr.msk.f32.gmra.mxu0 %vm2162_vm8, %v4217_v33  ;;  %4361 = vmatpush1.msra.mxu1 %v4306_v36  ;;  %v4642_v36 = vld [vmem:[#allocation10 + $0xea0] sm:$0xff]  ;;  %v4547_v33 = vpop.permute.xlu1 %4546 }
 0x56f   : > { %4458 = vmatprep.subr.mxu0 %v4429_v1  ;;  %4362 = vmatprep.subr.mxu1 %v4305_v12  ;;  %v4759_v1 = vld [vmem:[#allocation10 + $0xf78] sm:$0xff] }
 0x570   : > { %4459 = vmatpush1.msra.mxu0 %v4428_v50  ;;  %4363 = vmatpush1.msra.mxu1 %v4304_v58  ;;  %v4641_v12 = vld [vmem:[#allocation10 + $0xe98] sm:$0xff]  ;;  %v4758_v50 = vld [vmem:[#allocation10 + $0xf70] sm:$0xff] }
 0x571   : > { %4396 = vmatprep.mubr.f32.mxu1 %v8311_v18  ;;  %4460 = vmatprep.subr.mxu0 %v4427_v23  ;;  %v4640_v58 = vld [vmem:[#allocation10 + $0xe90] sm:$0xff]  ;;  %v4757_v23 = vld [vmem:[#allocation10 + $0xf68] sm:$0xff] }
 0x572   : > { %6025 = vmatmul.mubr.msk.f32.vlgmr.msra.gmra.mxu1 %vm2162_vm8, %v4325_v14  ;;  %4461 = vmatpush1.msra.mxu0 %v4426_v35  ;;  %v4639_v35 = vld [vmem:[#allocation10 + $0xe88] sm:$0xff]  ;;  %v4756_v14 = vld [vmem:[#allocation10 + $0xf60] sm:$0xff] }
 0x573   : > { %4564 = vmatprep.subr.mxu1 %v4543_v51  ;;  %4462 = vmatprep.subr.mxu0 %v4425_v16  ;;  %v4638_v51 = vld [vmem:[#allocation10 + $0xe80] sm:$0xff]  ;;  %v4755_v16 = vld [vmem:[#allocation10 + $0xf58] sm:$0xff] }
 0x574   : > { %4565 = vmatpush1.msra.mxu1 %v4542_v63  ;;  %4463 = vmatpush1.msra.mxu0 %v4424_v25  ;;  %v4637_v63 = vld [vmem:[#allocation10 + $0xe78] sm:$0xff]  ;;  %v4754_v25 = vld [vmem:[#allocation10 + $0xf50] sm:$0xff] }
 0x575   : > { %4566 = vmatprep.subr.mxu1 %v4541_v55  ;;  %4402 = vmatprep.mubr.f32.mxu1 %v8311_v18  ;;  %v4636_v55 = vld [vmem:[#allocation10 + $0xe70] sm:$0xff] }
 0x576   : > { %4464 = vmatprep.subr.mxu0 %v4423_v2  ;;  %4567 = vmatpush1.msra.mxu1 %v4540_v27  ;;  %v4753_v2 = vld [vmem:[#allocation10 + $0xf48] sm:$0xff] }
 0x577   : > { %6026 = vmatmul.mubr.msk.f32.gmra.mxu1 %vm2162_vm8, %v4327_v28  ;;  %4465 = vmatpush1.msra.mxu0 %v4422_v39  ;;  %v4635_v27 = vld [vmem:[#allocation10 + $0xe68] sm:$0xff]  ;;  %v4752_v39 = vld [vmem:[#allocation10 + $0xf40] sm:$0xff]  ;;  %v4655_v28 = vpop.permute.xlu0 %4654 }
 0x578   : > { %4568 = vmatprep.subr.mxu1 %v4539_v43  ;;  %4466 = vmatprep.subr.mxu0 %v4421_v37  ;;  %v4634_v43 = vld [vmem:[#allocation10 + $0xe60] sm:$0xff]  ;;  %v4751_v37 = vld [vmem:[#allocation10 + $0xf38] sm:$0xff] }
 0x579   : > { %4569 = vmatpush1.msra.mxu1 %v4538_v29  ;;  %4467 = vmatpush1.msra.mxu0 %v4420_v56  ;;  %v4750_v29 = vld [vmem:[#allocation10 + $0xf30] sm:$0xff]  ;;  %v4749_v56 = vld [vmem:[#allocation10 + $0xf28] sm:$0xff] }
 0x57a   : > { %4570 = vmatprep.subr.mxu1 %v4537_v3  ;;  %4468 = vmatprep.subr.mxu0 %v4419_v57  ;;  %v4748_v3 = vld [vmem:[#allocation10 + $0xf20] sm:$0xff]  ;;  %v4747_v57 = vld [vmem:[#allocation10 + $0xf18] sm:$0xff] }
 0x57b   : > { %4571 = vmatpush1.msra.mxu1 %v4536_v42  ;;  %4469 = vmatpush1.msra.mxu0 %v4418_v48  ;;  %v4746_v42 = vld [vmem:[#allocation10 + $0xf10] sm:$0xff]  ;;  %v4745_v48 = vld [vmem:[#allocation10 + $0xf08] sm:$0xff] }
 0x57c   : > { %4572 = vmatprep.subr.mxu1 %v4535_v52  ;;  %4470 = vmatprep.subr.mxu0 %v4417_v60  ;;  %v4657_v52 = vpop.permute.xlu0 %4656  ;;  %v4744_v60 = vld [vmem:[#allocation10 + $0xf00] sm:$0xff] }
 0x57d   : > { %4573 = vmatpush1.msra.mxu1 %v4534_v5  ;;  %4471 = vmatpush1.msra.mxu0 %v4416_v6  ;;  %v4765_v5 = vpop.permute.xlu1 %4764 }
 0x57e   : > { %4574 = vmatprep.subr.mxu1 %v4533_v15  ;;  %4472 = vmatprep.subr.mxu0 %v4415_v59  ;;  %v7784_v15 = vpop.f32.mrf.mxu1 }
 0x57f   : > { %4575 = vmatpush1.msra.mxu1 %v4532_v31  ;;  %4473 = vmatpush1.msra.mxu0 %v4414_v0 }
 0x580   : > { %4506 = vmatprep.mubr.f32.mxu0 %v8311_v18  ;;  %4576 = vmatprep.subr.mxu1 %v4531_v49  ;;  %v7786_v59 = vpop.f32.mrf.mxu1 }
 0x581   : > { %6027 = vmatmul.mubr.msk.f32.vlgmr.msra.gmra.mxu0 %vm2162_vm8, %v4435_v30  ;;  %4577 = vmatpush1.msra.mxu1 %v4530_v4  ;;  %v4767_v6 = vpop.permute.xlu1 %4766 }
 0x582   : > { %4674 = vmatprep.subr.mxu0 %v4653_v24  ;;  %4578 = vmatprep.subr.mxu1 %v4529_v61  ;;  %v7788_v31 = vpop.f32.mrf.mxu1 }
 0x583   : > { %4675 = vmatpush1.msra.mxu0 %v4652_v19  ;;  %4579 = vmatpush1.msra.mxu1 %v4528_v7  ;;  %v7802_v7 = vpop.f32.mrf.mxu0 }
 0x584   : > { %4676 = vmatprep.subr.mxu0 %v4651_v8  ;;  %4512 = vmatprep.mubr.f32.mxu0 %v8311_v18  ;;  %v7790_v0 = vpop.f32.mrf.mxu1 }
 0x585   : > { %4580 = vmatprep.subr.mxu1 %v4527_v13  ;;  %4677 = vmatpush1.msra.mxu0 %v4650_v47  ;;  %v7806_v13 = vpop.f32.mrf.mxu0 }
 0x586   : > { %6028 = vmatmul.mubr.msk.f32.gmra.mxu0 %vm2162_vm8, %v4437_v21  ;;  %4581 = vmatpush1.msra.mxu1 %v4526_v34  ;;  %v7792_v49 = vpop.f32.mrf.mxu1 }
 0x587   : > { %4678 = vmatprep.subr.mxu0 %v4649_v41  ;;  %4582 = vmatprep.subr.mxu1 %v4525_v9  ;;  %v7812_v41 = vpop.f32.mrf.mxu0 }
 0x588   : > { %4679 = vmatpush1.msra.mxu0 %v4648_v62  ;;  %4583 = vmatpush1.msra.mxu1 %v4524_v10  ;;  %v7794_v4 = vpop.f32.mrf.mxu1 }
 0x589   : > { %4616 = vmatprep.mubr.f32.mxu1 %v8311_v18  ;;  %4680 = vmatprep.subr.mxu0 %v4647_v17  ;;  %v7816_v21 = vpop.f32.mrf.mxu0 }
 0x58a   : > { %6029 = vmatmul.mubr.msk.f32.vlgmr.msra.gmra.mxu1 %vm2162_vm8, %v4545_v20  ;;  %4681 = vmatpush1.msra.mxu0 %v4646_v40  ;;  %v7796_v30 = vpop.f32.mrf.mxu1 }
 0x58b   : > { %4784 = vmatprep.subr.mxu1 %v4763_v32  ;;  %4682 = vmatprep.subr.mxu0 %v4645_v22  ;;  %v7818_v62 = vpop.f32.mrf.mxu0 }
 0x58c   : > { %4785 = vmatpush1.msra.mxu1 %v4762_v45  ;;  %4683 = vmatpush1.msra.mxu0 %v4644_v26  ;;  %v7798_v24 = vpop.f32.mrf.mxu1 }
 0x58d   : > { %4786 = vmatprep.subr.mxu1 %v4761_v46  ;;  %4622 = vmatprep.mubr.f32.mxu1 %v8311_v18  ;;  %v7822_v17 = vpop.f32.mrf.mxu0 }
 0x58e   : > { %4684 = vmatprep.subr.mxu0 %v4643_v11  ;;  %4787 = vmatpush1.msra.mxu1 %v4760_v38  ;;  %v2419_v61 = vpop.f32.mrf.mxu1 }
 0x58f   : > { %6030 = vmatmul.mubr.msk.f32.gmra.mxu1 %vm2162_vm8, %v4547_v33  ;;  %4685 = vmatpush1.msra.mxu0 %v4642_v36  ;;  %v7828_v32 = vpop.f32.mrf.mxu0 }
 0x590   : > { %4788 = vmatprep.subr.mxu1 %v4759_v1  ;;  %4686 = vmatprep.subr.mxu0 %v4641_v12  ;;  %v7800_v19 = vpop.f32.mrf.mxu1 }
 0x591   : > { %4789 = vmatpush1.msra.mxu1 %v4758_v50  ;;  %4687 = vmatpush1.msra.mxu0 %v4640_v58  ;;  %v7832_v45 = vpop.f32.mrf.mxu0 }
 0x592   : > { %4790 = vmatprep.subr.mxu1 %v4757_v23  ;;  %4688 = vmatprep.subr.mxu0 %v4639_v35  ;;  %v7804_v8 = vpop.f32.mrf.mxu1 }
 0x593   : > { %4791 = vmatpush1.msra.mxu1 %v4756_v14  ;;  %4689 = vmatpush1.msra.mxu0 %v4638_v51 }
 0x594   : > { %4792 = vmatprep.subr.mxu1 %v4755_v16  ;;  %4690 = vmatprep.subr.mxu0 %v4637_v63  ;;  %v7808_v47 = vpop.f32.mrf.mxu1 }
 0x595   : > { %4793 = vmatpush1.msra.mxu1 %v4754_v25  ;;  %4691 = vmatpush1.msra.mxu0 %v4636_v55 }
 0x596   : > { %4794 = vmatprep.subr.mxu1 %v4753_v2  ;;  %4692 = vmatprep.subr.mxu0 %v4635_v27  ;;  %v7810_v34 = vpop.f32.mrf.mxu1 }
 0x597   : > { %4795 = vmatpush1.msra.mxu1 %v4752_v39  ;;  %4693 = vmatpush1.msra.mxu0 %v4634_v43 }
 0x598   : > { %4726 = vmatprep.mubr.f32.mxu0 %v8311_v18  ;;  %4796 = vmatprep.subr.mxu1 %v4751_v37  ;;  %v7814_v9 = vpop.f32.mrf.mxu1  ;;  %v7834_v26 = vpop.f32.mrf.mxu0 }
 0x599   : > { %6031 = vmatmul.mubr.msk.f32.vlgmr.msra.gmra.mxu0 %vm2162_vm8, %v4655_v28  ;;  %4797 = vmatpush1.msra.mxu1 %v4750_v29 }
 0x59a   : > { %4798 = vmatprep.subr.mxu1 %v4749_v56  ;;  %4732 = vmatprep.mubr.f32.mxu0 %v8311_v18  ;;  %v7820_v10 = vpop.f32.mrf.mxu1  ;;  %v7838_v11 = vpop.f32.mrf.mxu0 }
 0x59b   : > { %4799 = vmatpush1.msra.mxu1 %v4748_v3  ;;  %4836 = vmatprep.mubr.f32.mxu1 %v8311_v18 }
 0x59c   : > { %4800 = vmatprep.subr.mxu1 %v4747_v57  ;;  %v7824_v40 = vpop.f32.mrf.mxu1 }
 0x59d   : > { %6032 = vmatmul.mubr.msk.f32.gmra.mxu0 %vm2162_vm8, %v4657_v52  ;;  %4801 = vmatpush1.msra.mxu1 %v4746_v42 }
 0x59e   : > { %4802 = vmatprep.subr.mxu1 %v4745_v48  ;;  %4989 = vmatprep.mubr.f32.mxu0 %v8311_v18  ;;  %v7826_v20 = vpop.f32.mrf.mxu1  ;;  %v7844_v1 = vpop.f32.mrf.mxu0 }
 0x59f   : > { %4803 = vmatpush1.msra.mxu1 %v4744_v60 }
 0x5a0   : > { %6033 = vmatmul.mubr.msk.f32.vlgmr.msra.gmra.mxu1 %vm2162_vm8, %v4765_v5  ;;  %6135 = vmatprep.subr.mxu1 %v8311_v18  ;;  %v7830_v22 = vpop.f32.mrf.mxu1  ;;  %v7848_v33 = vpop.f32.mrf.mxu0 }
 0x5a1   : > { %4842 = vmatprep.mubr.f32.mxu1 %v8311_v18 }
 0x5a2   : > { %v7836_v46 = vpop.f32.mrf.mxu1 }
 0x5a4   : > { %6034 = vmatmul.mubr.msk.f32.gmra.mxu1 %vm2162_vm8, %v4767_v6  ;;  %v7840_v38 = vpop.f32.mrf.mxu1 }
 0x5a6   : > { %v7842_v36 = vpop.f32.mrf.mxu1 }
 0x5a8   : > { %v7846_v12 = vpop.f32.mrf.mxu1 }
 0x5aa   : > { %v7852_v58 = vpop.f32.mrf.mxu1 }
 0x5ac   : > { %v7856_v35 = vpop.f32.mrf.mxu1 }
 0x5b1   : > { %v7850_v50 = vpop.f32.mrf.mxu0 }
 0x5b3   : > { %v7854_v23 = vpop.f32.mrf.mxu0 }
 0x5b6   : > { %v7860_v51 = vpop.f32.mrf.mxu0 }
 0x5b8   : > { %v7864_v63 = vpop.f32.mrf.mxu0 }
 0x5ba   : > { %v7858_v14 = vpop.f32.mrf.mxu1 }
 0x5bc   : > { %v7862_v16 = vpop.f32.mrf.mxu1 }
 0x5bf   : > { %v7868_v55 = vpop.f32.mrf.mxu1 }
 0x5c1   : > { %v7872_v27 = vpop.f32.mrf.mxu1 }
 0x5c9   : > { %v7866_v25 = vpop.f32.mrf.mxu0 }
 0x5cb   : > { %v7870_v2 = vpop.f32.mrf.mxu0 }
 0x5ce   : > { %v7876_v43 = vpop.f32.mrf.mxu0 }
 0x5d0   : > { %v7880_v28 = vpop.f32.mrf.mxu0 }
 0x5d2   : > { %v7874_v39 = vpop.f32.mrf.mxu1 }
 0x5d4   : > { %v7878_v37 = vpop.f32.mrf.mxu1 }
 0x5d7   : > { %v7884_v56 = vpop.f32.mrf.mxu1 }
 0x5d9   : > { %v7888_v57 = vpop.f32.mrf.mxu1 }
 0x5da   : > { %8312 = vst [vmem:[#allocation37_spill] sm:$0xff] %v7888_v57 }
 0x5e1   : > { %v7882_v29 = vpop.f32.mrf.mxu0 }
 0x5e3   : > { %v7886_v3 = vpop.f32.mrf.mxu0 }
 0x5e6   : > { %v7892_v48 = vpop.f32.mrf.mxu0 }
 0x5e7   : > { %8314 = vst [vmem:[#allocation39_spill] sm:$0xff] %v7892_v48 }
 0x5e8   : > { %v7896_v60 = vpop.f32.mrf.mxu0 }
 0x5e9   : > { %8316 = vst [vmem:[#allocation42_spill] sm:$0xff] %v7896_v60  ;;  %v2315_v60 = vadd.f32 %v7792_v49, %v7784_v15 }
 0x5ea   : > { %v7890_v42 = vpop.f32.mrf.mxu1 }
 0x5eb   : > { %8313 = vst [vmem:[#allocation38_spill] sm:$0xff] %v7890_v42 }
 0x5ec   : > { %v7894_v52 = vpop.f32.mrf.mxu1 }
 0x5ed   : > { %8315 = vst [vmem:[#allocation41_spill] sm:$0xff] %v7894_v52 }
 0x5ef   : > { %v7900_v6 = vpop.f32.mrf.mxu1 }
 0x5f0   : > { %8317 = vst [vmem:[#allocation43_spill] sm:$0xff] %v7900_v6  ;;  %v2430_v6 = vadd.f32 %v2419_v61, %v2315_v60 }
 0x5f1   : > { %v7904_v54 = vpop.f32.mrf.mxu1 }
 0x5f2   : > { %8319 = vst [vmem:[#allocation45_spill] sm:$0xff] %v7904_v54  ;;  %v2540_v49 = vadd.f32 %v7802_v7, %v2430_v6 }
 0x5f4   : > { %v2649_v61 = vadd.f32 %v7810_v34, %v2540_v49 }
 0x5f9   : > { %v7898_v5 = vpop.f32.mrf.mxu0 }
 0x5fb   : > { %v7902_v53 = vpop.f32.mrf.mxu0 }
 0x5fc   : > { %8318 = vst [vmem:[#allocation44_spill] sm:$0xff] %v7902_v53  ;;  %v2317_v53 = vadd.f32 %v7794_v4, %v7786_v59 }
 0x5fe   : > { %v7908_v44 = vpop.f32.mrf.mxu0 }
 0x5ff   : > { %8321 = vst [vmem:[#allocation47_spill] sm:$0xff] %v7908_v44 }
 0x600   : > { %v7912_v42 = vpop.f32.mrf.mxu0 }
 0x601   : > { %8323 = vst [vmem:[#allocation49_spill] sm:$0xff] %v7912_v42  ;;  %v2431_v42 = vadd.f32 %v7800_v19, %v2317_v53 }
 0x602   : > { %v7906_v18 = vpop.f32.mrf.mxu1 }
 0x603   : > { %8320 = vst [vmem:[#allocation46_spill] sm:$0xff] %v7906_v18  ;;  %v2541_v60 = vadd.f32 %v7806_v13, %v2431_v42 }
 0x604   : > { %v7910_v57 = vpop.f32.mrf.mxu1 }
 0x605   : > { %8322 = vst [vmem:[#allocation48_spill] sm:$0xff] %v7910_v57  ;;  %v2321_v57 = vadd.f32 %v7796_v30, %v7788_v31  ;;  %v2650_v53 = vadd.f32 %v7814_v9, %v2541_v60 }
 0x607   : > { %v7916_v52 = vpop.f32.mrf.mxu1  ;;  %v2432_v15 = vadd.f32 %v7804_v8, %v2321_v57  ;;  %v2760_v8 = vadd.f32 %v7822_v17, %v2650_v53 }
 0x608   : > { %8324 = vst [vmem:[#allocation50_spill] sm:$0xff] %v7916_v52  ;;  %v2323_v52 = vadd.f32 %v7798_v24, %v7790_v0  ;;  %v2759_v0 = vadd.f32 %v7818_v62, %v2649_v61 }
 0x609   : > { %v7924_v18 = vpop.f32.mrf.mxu1  ;;  %v2542_v30 = vadd.f32 %v7812_v41, %v2432_v15  ;;  %v2870_v62 = vadd.f32 %v7830_v22, %v2760_v8 }
 0x60a   : > { %v2433_v4 = vadd.f32 %v7808_v47, %v2323_v52  ;;  %v2869_v47 = vadd.f32 %v7826_v20, %v2759_v0 }
 0x60b   : > { %v2651_v19 = vadd.f32 %v7820_v10, %v2542_v30  ;;  %v2980_v17 = vadd.f32 %v7838_v11, %v2870_v62  ;;  %v8331_v62 = vld [vmem:[#allocation44_spill] sm:$0xff] }
 0x60c   : > { %v2543_v7 = vadd.f32 %v7816_v21, %v2433_v4  ;;  %v2979_v57 = vadd.f32 %v7834_v26, %v2869_v47  ;;  %v8329_v47 = vld [vmem:[#allocation42_spill] sm:$0xff] }
 0x60d   : > { %v2761_v41 = vadd.f32 %v7828_v32, %v2651_v19  ;;  %v3090_v32 = vadd.f32 %v7846_v12, %v2980_v17  ;;  %v8327_v19 = vld [vmem:[#allocation39_spill] sm:$0xff] }
 0x60e   : > { %v2652_v9 = vadd.f32 %v7824_v40, %v2543_v7  ;;  %v3089_v20 = vadd.f32 %v7842_v36, %v2979_v57  ;;  %v8328_v7 = vld [vmem:[#allocation41_spill] sm:$0xff]  ;;  %v8332_v57 = vld [vmem:[#allocation46_spill] sm:$0xff] }
 0x60f   : > { %v2871_v21 = vadd.f32 %v7836_v46, %v2761_v41  ;;  %v3200_v11 = vadd.f32 %v7854_v23, %v3090_v32  ;;  %v8330_v41 = vld [vmem:[#allocation43_spill] sm:$0xff] }
 0x610   : > { %v2762_v10 = vadd.f32 %v7832_v45, %v2652_v9  ;;  %v3199_v22 = vadd.f32 %v7850_v50, %v3089_v20  ;;  %v8334_v20 = vld [vmem:[#allocation47_spill] sm:$0xff] }
 0x611   : > { %v7914_v48 = vpop.f32.mrf.mxu0  ;;  %v2981_v40 = vadd.f32 %v7844_v1, %v2871_v21  ;;  %v3310_v1 = vadd.f32 %v7862_v16, %v3200_v11  ;;  %v8333_v21 = vld [vmem:[#allocation45_spill] sm:$0xff]  ;;  %v8337_v11 = vld [vmem:[#allocation50_spill] sm:$0xff] }
 0x612   : > { %v2872_v6 = vadd.f32 %v7840_v38, %v2762_v10  ;;  %v3309_v36 = vadd.f32 %v7858_v14, %v3199_v22 }
 0x613   : > { %v7922_v54 = vpop.f32.mrf.mxu0  ;;  %v3091_v46 = vadd.f32 %v7852_v58, %v2981_v40  ;;  %v3420_v58 = vadd.f32 %v7870_v2, %v3310_v1  ;;  %v8325_v2 = vld [vmem:[#allocation38_spill] sm:$0xff]  ;;  %v8335_v40 = vld [vmem:[#allocation48_spill] sm:$0xff] }
 0x614   : > { %v2982_v45 = vadd.f32 %v7848_v33, %v2872_v6  ;;  %v3419_v12 = vadd.f32 %v7866_v25, %v3309_v36 }
 0x615   : > { %v3201_v38 = vadd.f32 %v7860_v51, %v3091_v46  ;;  %v3530_v51 = vadd.f32 %v7878_v37, %v3420_v58 }
 0x616   : > { %v7935_v59 = vpop.f32.mrf.mxu0  ;;  %v3092_v49 = vadd.f32 %v7856_v35, %v2982_v45  ;;  %v3529_v23 = vadd.f32 %v7874_v39, %v3419_v12  ;;  %v8326_v39 = vld [vmem:[#allocation37_spill] sm:$0xff] }
 0x617   : > { %v3311_v33 = vadd.f32 %v7868_v55, %v3201_v38  ;;  %v3640_v55 = vadd.f32 %v7886_v3, %v3530_v51  ;;  %v8336_v45 = vld [vmem:[#allocation49_spill] sm:$0xff] }
 0x618   : > { %v7945_v24 = vpop.f32.mrf.mxu0  ;;  %v3202_v50 = vadd.f32 %v7864_v63, %v3092_v49  ;;  %v3639_v16 = vadd.f32 %v7882_v29, %v3529_v23 }
 0x619   : > { %v3421_v35 = vadd.f32 %v7876_v43, %v3311_v33  ;;  %v3750_v43 = vadd.f32 %v8328_v7, %v3640_v55 }
 0x61a   : > { %v7929_v44 = vpop.f32.mrf.mxu1  ;;  %v3312_v14 = vadd.f32 %v7872_v27, %v3202_v50  ;;  %v3749_v30 = vadd.f32 %v8325_v2, %v3639_v16 }
 0x61b   : > { %v3531_v63 = vadd.f32 %v7884_v56, %v3421_v35  ;;  %v3860_v56 = vadd.f32 %v8331_v62, %v3750_v43 }
 0x61c   : > { %v7940_v31 = vpop.f32.mrf.mxu1  ;;  %v3422_v53 = vadd.f32 %v7880_v28, %v3312_v14  ;;  %v3859_v37 = vadd.f32 %v7898_v5, %v3749_v30 }
 0x61d   : > { %v3641_v27 = vadd.f32 %v8327_v19, %v3531_v63  ;;  %v3970_v32 = vadd.f32 %v8335_v40, %v3860_v56 }
 0x61e   : > { %v3532_v0 = vadd.f32 %v8326_v39, %v3422_v53  ;;  %v3969_v3 = vadd.f32 %v8332_v57, %v3859_v37 }
 0x61f   : > { %v7953_v13 = vpop.f32.mrf.mxu1  ;;  %v3751_v28 = vadd.f32 %v8330_v41, %v3641_v27  ;;  %v4080_v49 = vadd.f32 %v7922_v54, %v3970_v32  ;;  %v8338_v27 = vld [vmem:[#allocation40_spill] sm:$0xff] }
 0x620   : > { %v3642_v9 = vadd.f32 %v8329_v47, %v3532_v0  ;;  %v4079_v22 = vadd.f32 %v7914_v48, %v3969_v3  ;;  %v8339_v7 = vsub.s32 0, %v8338_v27 }
 0x621   : > { %v7963_v52 = vpop.f32.mrf.mxu1  ;;  %v3861_v6 = vadd.f32 %v8334_v20, %v3751_v28  ;;  %v4190_v33 = vadd.f32 %v7940_v31, %v4080_v49 }
 0x622   : > { %v3752_v17 = vadd.f32 %v8333_v21, %v3642_v9  ;;  %v4189_v38 = vadd.f32 %v7929_v44, %v4079_v22 }
 0x623   : > { %v3971_v36 = vadd.f32 %v8337_v11, %v3861_v6 }
 0x624   : > { %v3862_v46 = vadd.f32 %v8336_v45, %v3752_v17 }
 0x625   : > { %v4081_v50 = vadd.f32 %v7935_v59, %v3971_v36 }
 0x626   : > { %v3972_v12 = vadd.f32 %v7924_v18, %v3862_v46 }
 0x627   : > { %v4191_v14 = vadd.f32 %v7953_v13, %v4081_v50 }
 0x628   : > { %v4082_v48 = vadd.f32 %v7945_v24, %v3972_v12 }
 0x629   : > { %v7951_v34 = vpop.f32.mrf.mxu0 }
 0x62a   : > { %v4299_v58 = vadd.f32 %v7951_v34, %v4189_v38  ;;  %v4192_v44 = vadd.f32 %v7963_v52, %v4082_v48  ;;  %v4853_v34 = vld [vmem:[#allocation11] sm:$0x3] }
 0x62b   : > { %v4290_v42 = vpop.f32.mrf.mxu0  ;;  %v4858_v43 = vrot.slane %v4853_v34, %v8339_v7  ;;  %v5015_v7 = vld [vmem:[#allocation14 + $0x98] sm:$0x7f] }
 0x62c   : > { %v4300_v35 = vadd.f32 %v4290_v42, %v4190_v33 }
 0x62e   : > { %v4294_v15 = vpop.f32.mrf.mxu0 }
 0x62f   : > { %v4301_v53 = vadd.f32 %v4294_v15, %v4191_v14 }
 0x630   : > { %v4296_v61 = vpop.f32.mrf.mxu0 }
 0x631   : > { %v4302_v59 = vadd.f32 %v4296_v61, %v4192_v44  ;;  %v4913_v44 = vld [vmem:[#allocation13] sm:$0x1f] }
 0x632   : > { %v4398_v26 = vpop.f32.mrf.mxu1 }
 0x633   : > { %v4409_v51 = vadd.f32 %v4398_v26, %v4299_v58 }
 0x634   : > { %v4400_v4 = vpop.f32.mrf.mxu1 }
 0x635   : > { %v4410_v63 = vadd.f32 %v4400_v4, %v4300_v35 }
 0x637   : > { %v4404_v25 = vpop.f32.mrf.mxu1 }
 0x638   : > { %v4411_v2 = vadd.f32 %v4404_v25, %v4301_v53  ;;  %v8340_v25 = vsub.s32 1, %v8338_v27  ;;  %v5011_v53 = vld [vmem:[#allocation14 + $0x78] sm:$0xff]  ;;  %v4996_v27 = vld [vmem:[#allocation14] sm:$0xff] }
 0x639   : > { %v4406_v29 = vpop.f32.mrf.mxu1 }
 0x63a   : > { %v4412_v24 = vadd.f32 %v4406_v29, %v4302_v59  ;;  %v5008_v59 = vld [vmem:[#allocation14 + $0x60] sm:$0xff] }
 0x641   : > { %v4508_v60 = vpop.f32.mrf.mxu0 }
 0x642   : > { %v4519_v18 = vadd.f32 %v4508_v60, %v4409_v51 }
 0x643   : > { %v4510_v8 = vpop.f32.mrf.mxu0 }
 0x644   : > { %v4520_v31 = vadd.f32 %v4510_v8, %v4410_v63  ;;  %v4862_v8 = vrot.slane %v4853_v34, %v8340_v25  ;;  %v8341_v63 = vmov 0.0   ;;  %v5004_v34 = vld [vmem:[#allocation14 + $0x40] sm:$0xff]  ;;  %v5099_v25 = vld [vmem:[#allocation16 + $0x28] sm:$0xff] }
 0x645   : > { %6155 = vmatprep.mubr.msk.f32.mxu1 %vm6938_vm13, %v8341_v63 }
 0x646   : > { %v4514_v5 = vpop.f32.mrf.mxu0 }
 0x647   : > { %v4521_v19 = vadd.f32 %v4514_v5, %v4411_v2  ;;  %v5007_v2 = vld [vmem:[#allocation14 + $0x58] sm:$0xff] }
 0x648   : > { %v4516_v23 = vpop.f32.mrf.mxu0 }
 0x649   : > { %v4522_v52 = vadd.f32 %v4516_v23, %v4412_v24  ;;  %v5001_v24 = vld [vmem:[#allocation14 + $0x28] sm:$0xff] }
 0x64a   : > { %v4618_v10 = vpop.f32.mrf.mxu1 }
 0x64b   : > { %v4629_v30 = vadd.f32 %v4618_v10, %v4519_v18  ;;  %v5010_v18 = vld [vmem:[#allocation14 + $0x70] sm:$0xff] }
 0x64c   : > { %v4620_v1 = vpop.f32.mrf.mxu1 }
 0x64d   : > { %v4630_v13 = vadd.f32 %v4620_v1, %v4520_v31  ;;  %v5006_v31 = vld [vmem:[#allocation14 + $0x50] sm:$0xff] }
 0x64f   : > { %v4624_v54 = vpop.f32.mrf.mxu1 }
 0x650   : > { %v4631_v15 = vadd.f32 %v4624_v54, %v4521_v19  ;;  %v5000_v19 = vld [vmem:[#allocation14 + $0x20] sm:$0xff] }
 0x651   : > { %v4626_v39 = vpop.f32.mrf.mxu1 }
 0x652   : > { %v4632_v47 = vadd.f32 %v4626_v39, %v4522_v52  ;;  %v5003_v39 = vld [vmem:[#allocation14 + $0x38] sm:$0xff]  ;;  %v5013_v52 = vld [vmem:[#allocation14 + $0x88] sm:$0xff] }
 0x659   : > { %v4728_v16 = vpop.f32.mrf.mxu0 }
 0x65a   : > { %v4739_v42 = vadd.f32 %v4728_v16, %v4629_v30  ;;  %v5005_v30 = vld [vmem:[#allocation14 + $0x48] sm:$0xff] }
 0x65b   : > { %v4730_v55 = vpop.f32.mrf.mxu0 }
 0x65c   : > { %v4740_v4 = vadd.f32 %v4730_v55, %v4630_v13  ;;  %v5009_v55 = vld [vmem:[#allocation14 + $0x68] sm:$0xff]  ;;  %v4999_v13 = vld [vmem:[#allocation14 + $0x18] sm:$0xff] }
 0x65d   : > { %v4734_v0 = vpop.f32.mrf.mxu0 }
 0x65e   : > { %v4741_v9 = vadd.f32 %v4734_v0, %v4631_v15  ;;  %v5002_v0 = vld [vmem:[#allocation14 + $0x30] sm:$0xff]  ;;  %v5012_v15 = vld [vmem:[#allocation14 + $0x80] sm:$0xff] }
 0x65f   : > { %v4736_v37 = vpop.f32.mrf.mxu0 }
 0x660   : > { %v4838_v26 = vpop.f32.mrf.mxu1  ;;  %v4742_v62 = vadd.f32 %v4736_v37, %v4632_v47  ;;  %v5101_v37 = vld [vmem:[#allocation16 + $0x38] sm:$0xff] }
 0x661   : > { %v4849_v60 = vadd.f32 %v4838_v26, %v4739_v42  ;;  %v4998_v42 = vld [vmem:[#allocation14 + $0x10] sm:$0xff]  ;;  %v4997_v26 = vld [vmem:[#allocation14 + $0x8] sm:$0xff]  ;;  %v5097_v47 = vld [vmem:[#allocation16 + $0x18] sm:$0xff] }
 0x662   : > { %v4840_v61 = vpop.f32.mrf.mxu1 }
 0x663   : > { %v4850_v41 = vadd.f32 %v4840_v61, %v4740_v4  ;;  %v4865_v29 = vadd.f32 %v4858_v43, %v4849_v60  ;;  %v5103_v4 = vld [vmem:[#allocation16 + $0x48] sm:$0xff]  ;;  %v5102_v60 = vld [vmem:[#allocation16 + $0x40] sm:$0xff]  ;;  %v5100_v61 = vld [vmem:[#allocation16 + $0x30] sm:$0xff] }
 0x664   : > { %v4844_v28 = vpop.f32.mrf.mxu1  ;;  %6136 = vmatpush3.msra.mxu1 %v5103_v4  ;;  %v5527_v4 = vld [vmem:[%s8243_s11 + $0x48] sm:$0xff] }
 0x665   : > { %v4851_v56 = vadd.f32 %v4844_v28, %v4741_v9  ;;  %v4866_v57 = vadd.f32 %v4862_v8, %v4850_v41  ;;  %v4869_v17 = vmax.f32 %v4865_v29, 0.0  ;;  %6137 = vmatprep.subr.mxu1 %v8341_v63  ;;  %v5096_v9 = vld [vmem:[#allocation16 + $0x10] sm:$0xff]  ;;  %v5095_v41 = vld [vmem:[#allocation16 + $0x8] sm:$0xff]  ;;  %v5094_v29 = vld [vmem:[#allocation16] sm:$0xff] }
 0x666   : > { %v4846_v3 = vpop.f32.mrf.mxu1  ;;  %6138 = vmatpush3.msra.mxu1 %v5102_v60  ;;  %v5526_v60 = vld [vmem:[%s8243_s11 + $0x40] sm:$0xff] }
 0x667   : > { %v4867_v10 = vadd.f32 %v4858_v43, %v4851_v56  ;;  %v4852_v21 = vadd.f32 %v4846_v3, %v4742_v62  ;;  %v4870_v40 = vmax.f32 %v4866_v57, 0.0  ;;  %v4877_v5 = vrot.slane %v4869_v17, 1  ;;  %v5014_v43 = vld [vmem:[#allocation14 + $0x90] sm:$0xff]  ;;  %6139 = vmatprep.subr.mxu1 %v8341_v63  ;;  %v5273_v56 = vld [vmem:[#allocation16 + $0xe8] sm:$0xff]  ;;  %v5272_v57 = vld [vmem:[#allocation16 + $0xe0] sm:$0xff] }
 0x668   : > { %6140 = vmatpush3.msra.mxu1 %v5101_v37  ;;  %v5271_v3 = vld [vmem:[#allocation16 + $0xd8] sm:$0xff] }
 0x669   : > { %v4871_v20 = vmax.f32 %v4867_v10, 0.0  ;;  %v4868_v6 = vadd.f32 %v4862_v8, %v4852_v21  ;;  %v4880_v11 = vrot.slane %v4870_v40, 1  ;;  %6141 = vmatprep.subr.mxu1 %v8341_v63  ;;  %v5098_v8 = vld [vmem:[#allocation16 + $0x20] sm:$0xff]  ;;  %v5270_v10 = vld [vmem:[#allocation16 + $0xd0] sm:$0xff]  ;;  %v5269_v21 = vld [vmem:[#allocation16 + $0xc8] sm:$0xff] }
 0x66a   : > { %6142 = vmatpush3.msra.mxu1 %v5100_v61  ;;  %v5525_v37 = vld [vmem:[%s8243_s11 + $0x38] sm:$0xff]  ;;  %v5524_v61 = vld [vmem:[%s8243_s11 + $0x30] sm:$0xff] }
 0x66b   : > { %v4878_v32 = vrot.slane %v4871_v20, 1  ;;  %v4872_v22 = vmax.f32 %v4868_v6, 0.0  ;;  %6143 = vmatprep.subr.mxu1 %v8341_v63  ;;  %v5266_v6 = vld [vmem:[#allocation16 + $0xb0] sm:$0xff] }
 0x66c   : > { %6144 = vmatpush3.msra.mxu1 %v5099_v25  ;;  %v5523_v25 = vld [vmem:[%s8243_s11 + $0x28] sm:$0xff] }
 0x66d   : > { %v4881_v45 = vrot.slane %v4872_v22, 1  ;;  %v4889_v46 = vmax.f32 %v4871_v20, %v4878_v32  ;;  %v4879_v36 = vsel %vm694_vm0, %v4877_v5, %v4878_v32  ;;  %6145 = vmatprep.subr.mxu1 %v8341_v63  ;;  %v5267_v20 = vld [vmem:[#allocation16 + $0xb8] sm:$0xff]  ;;  %v5264_v32 = vld [vmem:[#allocation16 + $0xa0] sm:$0xff] }
 0x66e   : > { %v4887_v1 = vmax.f32 %v4869_v17, %v4879_v36  ;;  %6146 = vmatpush3.msra.mxu1 %v5098_v8  ;;  %v5268_v17 = vld [vmem:[#allocation16 + $0xc0] sm:$0xff] }
 0x66f   : > { %4899 = vrot.lane.b32.xlu0 %v4889_v46, %s6934_s4  ;;  %v4890_v49 = vmax.f32 %v4872_v22, %v4881_v45  ;;  %v4882_v38 = vsel %vm694_vm0, %v4880_v11, %v4881_v45  ;;  %6147 = vmatprep.subr.mxu1 %v8341_v63  ;;  %v5188_v22 = vld [vmem:[#allocation16 + $0x98] sm:$0xff]  ;;  %v5443_v11 = vld [vmem:[#allocation16 + $0x188] sm:$0xff] }
 0x670   : > { %v4888_v12 = vmax.f32 %v4870_v40, %v4882_v38  ;;  %6148 = vmatpush3.msra.mxu1 %v5097_v47  ;;  %v5265_v40 = vld [vmem:[#allocation16 + $0xa8] sm:$0xff]  ;;  %v5442_v38 = vld [vmem:[#allocation16 + $0x180] sm:$0xff]  ;;  %v5521_v47 = vld [vmem:[%s8243_s11 + $0x18] sm:$0xff] }
 0x671   : > { %4901 = vrot.lane.b32.xlu1 %v4890_v49, %s6934_s4  ;;  %6149 = vmatprep.subr.mxu1 %v8341_v63  ;;  %v5522_v8 = vld [vmem:[%s8243_s11 + $0x20] sm:$0xff] }
 0x672   : > { %6150 = vmatpush3.msra.mxu1 %v5096_v9  ;;  %v5520_v9 = vld [vmem:[%s8243_s11 + $0x10] sm:$0xff] }
 0x673   : > { %4895 = vrot.lane.b32.xlu0 %v4887_v1, %s6934_s4  ;;  %6151 = vmatprep.subr.mxu1 %v8341_v63 }
 0x674   : > { %6152 = vmatpush3.msra.mxu1 %v5095_v41  ;;  %v5519_v41 = vld [vmem:[%s8243_s11 + $0x8] sm:$0xff] }
 0x675   : > { %4897 = vrot.lane.b32.xlu1 %v4888_v12, %s6934_s4  ;;  %6153 = vmatprep.subr.mxu1 %v8341_v63 }
 0x676   : > { %6154 = vmatpush3.msra.mxu1 %v5094_v29  ;;  %v5518_v29 = vld [vmem:[%s8243_s11] sm:$0xff] }
 0x677   : > { %6158 = vmatprep.subr.mxu1 %v8341_v63 }
 0x6e1   : > { %v4900_v50 = vpop.permute.xlu0 %4899 }
 0x6e3   : > { %v4902_v33 = vpop.permute.xlu1 %4901 }
 0x6e4   : > { %v4904_v58 = vsel %vm1896_vm4, %v4900_v50, %v4902_v33  ;;  %v4912_v23 = vmax.f32 %v4890_v49, %v4902_v33  ;;  %v5186_v49 = vld [vmem:[#allocation16 + $0x88] sm:$0xff]  ;;  %v5184_v50 = vld [vmem:[#allocation16 + $0x78] sm:$0xff]  ;;  %v5440_v33 = vld [vmem:[#allocation16 + $0x170] sm:$0xff] }
 0x6e5   : > { %v4911_v48 = vmax.f32 %v4889_v46, %v4904_v58  ;;  %v4896_v14 = vpop.permute.xlu0 %4895  ;;  %v5187_v46 = vld [vmem:[#allocation16 + $0x90] sm:$0xff] }
 0x6e6   : > { %6035 = vmatprep.subr.msk.mxu0 %vm4918_vm10, %v4912_v23  ;;  %v5183_v58 = vld [vmem:[#allocation16 + $0x70] sm:$0xff]  ;;  %v5439_v23 = vld [vmem:[#allocation16 + $0x168] sm:$0xff] }
 0x6e7   : > { %6036 = vmatpush1.msk.msra.mxu0 %vm4918_vm10, %v4911_v48  ;;  %v4898_v35 = vpop.permute.xlu1 %4897  ;;  %v5182_v48 = vld [vmem:[#allocation16 + $0x68] sm:$0xff] }
 0x6e8   : > { %v4903_v51 = vsel %vm1896_vm4, %v4896_v14, %v4898_v35  ;;  %v4910_v16 = vmax.f32 %v4888_v12, %v4898_v35  ;;  %v5441_v12 = vld [vmem:[#allocation16 + $0x178] sm:$0xff]  ;;  %v5438_v14 = vld [vmem:[#allocation16 + $0x160] sm:$0xff] }
 0x6e9   : > { %v4909_v54 = vmax.f32 %v4887_v1, %v4903_v51  ;;  %v5185_v1 = vld [vmem:[#allocation16 + $0x80] sm:$0xff]  ;;  %v5437_v51 = vld [vmem:[#allocation16 + $0x158] sm:$0xff] }
 0x6ea   : > { %4955 = vmatprep.subr.mxu0 %v4910_v16  ;;  %v5181_v35 = vld [vmem:[#allocation16 + $0x60] sm:$0xff]  ;;  %v5180_v16 = vld [vmem:[#allocation16 + $0x58] sm:$0xff] }
 0x6eb   : > { %4956 = vmatpush1.msra.mxu0 %v4909_v54  ;;  %v5436_v54 = vld [vmem:[#allocation16 + $0x150] sm:$0xff] }
 0x6ec   : > { %6037 = vmatmul.mubr.msk.f32.vlgmr.msra.gmra.mxu0 %vm4914_vm11, %v4913_v44  ;;  %5023 = vmatprep.subr.mxu0 %v8341_v63  ;;  %v5179_v44 = vld [vmem:[#allocation16 + $0x50] sm:$0xff] }
 0x6ed   : > { %5024 = vmatpush1.msra.mxu0 %v5011_v53  ;;  %v5435_v53 = vld [vmem:[#allocation16 + $0x148] sm:$0xff] }
 0x6ee   : > { %5025 = vmatprep.subr.mxu0 %v8341_v63 }
 0x6ef   : > { %5026 = vmatpush1.msra.mxu0 %v5010_v18 }
 0x6f0   : > { %5027 = vmatprep.subr.mxu0 %v8341_v63 }
 0x6f1   : > { %5028 = vmatpush1.msra.mxu0 %v5009_v55  ;;  %v5358_v55 = vld [vmem:[#allocation16 + $0x138] sm:$0xff] }
 0x6f2   : > { %5029 = vmatprep.subr.mxu0 %v8341_v63 }
 0x6f3   : > { %5030 = vmatpush1.msra.mxu0 %v5008_v59  ;;  %v5434_v59 = vld [vmem:[#allocation16 + $0x140] sm:$0xff] }
 0x6f4   : > { %5031 = vmatprep.subr.mxu0 %v8341_v63 }
 0x6f5   : > { %5032 = vmatpush1.msra.mxu0 %v5007_v2 }
 0x6f6   : > { %5033 = vmatprep.subr.mxu0 %v8341_v63 }
 0x6f7   : > { %5034 = vmatpush1.msra.mxu0 %v5006_v31  ;;  %v5357_v31 = vld [vmem:[#allocation16 + $0x130] sm:$0xff] }
 0x6f8   : > { %5035 = vmatprep.subr.mxu0 %v8341_v63 }
 0x6f9   : > { %5036 = vmatpush1.msra.mxu0 %v5005_v30  ;;  %v5356_v30 = vld [vmem:[#allocation16 + $0x128] sm:$0xff] }
 0x6fa   : > { %5037 = vmatprep.subr.mxu0 %v8341_v63 }
 0x6fb   : > { %5038 = vmatpush1.msra.mxu0 %v5004_v34  ;;  %v5355_v34 = vld [vmem:[#allocation16 + $0x120] sm:$0xff] }
 0x6fc   : > { %5039 = vmatprep.subr.mxu0 %v8341_v63 }
 0x6fd   : > { %5040 = vmatpush1.msra.mxu0 %v5003_v39  ;;  %v5354_v39 = vld [vmem:[#allocation16 + $0x118] sm:$0xff] }
 0x6fe   : > { %5041 = vmatprep.subr.mxu0 %v8341_v63 }
 0x6ff   : > { %5042 = vmatpush1.msra.mxu0 %v5002_v0  ;;  %v5353_v0 = vld [vmem:[#allocation16 + $0x110] sm:$0xff] }
 0x700   : > { %5043 = vmatprep.subr.mxu0 %v8341_v63 }
 0x701   : > { %5044 = vmatpush1.msra.mxu0 %v5001_v24  ;;  %v5352_v24 = vld [vmem:[#allocation16 + $0x108] sm:$0xff] }
 0x702   : > { %5045 = vmatprep.subr.mxu0 %v8341_v63 }
 0x703   : > { %5046 = vmatpush1.msra.mxu0 %v5000_v19  ;;  %v5351_v19 = vld [vmem:[#allocation16 + $0x100] sm:$0xff] }
 0x704   : > { %5047 = vmatprep.subr.mxu0 %v8341_v63 }
 0x705   : > { %5048 = vmatpush1.msra.mxu0 %v4999_v13  ;;  %v5350_v13 = vld [vmem:[#allocation16 + $0xf8] sm:$0xff] }
 0x706   : > { %5049 = vmatprep.subr.mxu0 %v8341_v63 }
 0x707   : > { %5050 = vmatpush1.msra.mxu0 %v4998_v42  ;;  %v5349_v42 = vld [vmem:[#allocation16 + $0xf0] sm:$0xff] }
 0x708   : > { %5051 = vmatprep.subr.mxu0 %v8341_v63 }
 0x709   : > { %5052 = vmatpush1.msra.mxu0 %v4997_v26 }
 0x70a   : > { %5053 = vmatprep.subr.mxu0 %v8341_v63 }
 0x70b   : > { %5054 = vmatpush1.msra.mxu0 %v4996_v27  ;;  %v5532_v27 = vld [vmem:[%s8243_s11 + $0x70] sm:$0xff] }
 0x70c   : > { %5079 = vmatprep.subr.mxu0 %v8341_v63 }
 0x70d   : > { %6038 = vmatpush2.msk.msra.mxu0 %vm694_vm0, %v5015_v7  ;;  %v5531_v7 = vld [vmem:[%s8243_s11 + $0x68] sm:$0xff] }
 0x70e   : > { %5081 = vmatprep.subr.mxu0 %v8341_v63 }
 0x70f   : > { %5082 = vmatpush2.msra.mxu0 %v5014_v43  ;;  %v5530_v43 = vld [vmem:[%s8243_s11 + $0x60] sm:$0xff] }
 0x710   : > { %5083 = vmatprep.subr.mxu0 %v8341_v63 }
 0x711   : > { %5084 = vmatpush2.msra.mxu0 %v5013_v52  ;;  %v5529_v52 = vld [vmem:[%s8243_s11 + $0x58] sm:$0xff] }
 0x712   : > { %5085 = vmatprep.subr.mxu0 %v8341_v63 }
 0x713   : > { %5086 = vmatpush2.msra.mxu0 %v5012_v15  ;;  %v5528_v15 = vld [vmem:[%s8243_s11 + $0x50] sm:$0xff] }
 0x714   : > { %6181 = vmatprep.subr.mxu0 %v8341_v63 }
 0x7ac   : > { %v4991_v28 = vpop.f32.mrf.mxu0 }
 0x7ae   : > { %v4993_v62 = vpop.f32.mrf.mxu0 }
 0x7af   : > { %6039 = vmatprep.mubr.msk.f32.mxu0 %vm5016_vm12, %v4993_v62  ;;  %v5617_v62 = vld [vmem:[#allocation20 + $0x48] sm:$0xff] }
 0x7b0   : > { %5088 = vmatmul.mubr.f32.vlgmr.msra.gmra.mxu0 %v4991_v28  ;;  %v5618_v28 = vld [vmem:[#allocation20 + $0x50] sm:$0xf] }
 0x7b1   : > { %6182 = vmatpush3.msra.mxu0 %v5273_v56  ;;  %6201 = vmatprep.mubr.msk.f32.mxu0 %vm6938_vm13, %v8341_v63  ;;  %v5616_v56 = vld [vmem:[#allocation20 + $0x40] sm:$0xff] }
 0x7b2   : > { %6183 = vmatprep.subr.mxu0 %v8341_v63 }
 0x7b3   : > { %6184 = vmatpush3.msra.mxu0 %v5272_v57  ;;  %v5615_v57 = vld [vmem:[#allocation20 + $0x38] sm:$0xff] }
 0x7b4   : > { %6185 = vmatprep.subr.mxu0 %v8341_v63 }
 0x7b5   : > { %6186 = vmatpush3.msra.mxu0 %v5271_v3  ;;  %v5614_v3 = vld [vmem:[#allocation20 + $0x30] sm:$0xff] }
 0x7b6   : > { %6187 = vmatprep.subr.mxu0 %v8341_v63 }
 0x7b7   : > { %6188 = vmatpush3.msra.mxu0 %v5270_v10  ;;  %v5613_v10 = vld [vmem:[#allocation20 + $0x28] sm:$0xff] }
 0x7b8   : > { %6189 = vmatprep.subr.mxu0 %v8341_v63 }
 0x7b9   : > { %6190 = vmatpush3.msra.mxu0 %v5269_v21  ;;  %v5612_v21 = vld [vmem:[#allocation20 + $0x20] sm:$0xff] }
 0x7ba   : > { %6191 = vmatprep.subr.mxu0 %v8341_v63 }
 0x7bb   : > { %6192 = vmatpush3.msra.mxu0 %v5268_v17  ;;  %v5611_v17 = vld [vmem:[#allocation20 + $0x18] sm:$0xff] }
 0x7bc   : > { %6193 = vmatprep.subr.mxu0 %v8341_v63 }
 0x7bd   : > { %6194 = vmatpush3.msra.mxu0 %v5267_v20  ;;  %v5610_v20 = vld [vmem:[#allocation20 + $0x10] sm:$0xff] }
 0x7be   : > { %6195 = vmatprep.subr.mxu0 %v8341_v63 }
 0x7bf   : > { %6196 = vmatpush3.msra.mxu0 %v5266_v6 }
 0x7c0   : > { %6197 = vmatprep.subr.mxu0 %v8341_v63 }
 0x7c1   : > { %6198 = vmatpush3.msra.mxu0 %v5265_v40 }
 0x7c2   : > { %6199 = vmatprep.subr.mxu0 %v8341_v63 }
 0x7c3   : > { %6200 = vmatpush3.msra.mxu0 %v5264_v32 }
 0x7c4   : > { %6227 = vmatprep.subr.mxu0 %v8341_v63 }
 0x870   : > { %v8070_v5 = vpop.f32.mrf.mxu0 }
 0x871   : > { %v5274_v45 = vrot.slane %v8070_v5, 2  ;;  %6156 = vmatmul.mubr.msk.f32.vlgmr.msra.gmra.mxu1 %vm2162_vm8, %v8070_v5  ;;  %v5189_v18 = vrot.slane %v8070_v5, 1  ;;  %v5444_v2 = vrot.slane %v8070_v5, 4  ;;  %v5359_v26 = vrot.slane %v8070_v5, 3 }
 0x872   : > { %6159 = vmatpush3.msra.mxu1 %v5188_v22  ;;  %v5091_v36 = vpop.f32.mrf.mxu0  ;;  %6178 = vmatprep.mubr.msk.f32.mxu1 %vm6938_vm13, %v8341_v63 }
 0x873   : > { %6160 = vmatprep.subr.mxu1 %v8341_v63  ;;  %6202 = vmatmul.mubr.msk.f32.vlgmr.msra.gmra.mxu0 %vm2162_vm8, %v5274_v45  ;;  %v5093_v36 = vld [vmem:[#allocation17] sm:$0x1] }
 0x874   : > { %6161 = vmatpush3.msra.mxu1 %v5187_v46  ;;  %6228 = vmatpush3.msra.mxu0 %v5443_v11 }
 0x875   : > { %6162 = vmatprep.subr.mxu1 %v8341_v63  ;;  %6229 = vmatprep.subr.mxu0 %v8341_v63 }
 0x876   : > { %6163 = vmatpush3.msra.mxu1 %v5186_v49  ;;  %6230 = vmatpush3.msra.mxu0 %v5442_v38 }
 0x877   : > { %6164 = vmatprep.subr.mxu1 %v8341_v63  ;;  %6231 = vmatprep.subr.mxu0 %v8341_v63 }
 0x878   : > { %6165 = vmatpush3.msra.mxu1 %v5185_v1  ;;  %6232 = vmatpush3.msra.mxu0 %v5441_v12 }
 0x879   : > { %6166 = vmatprep.subr.mxu1 %v8341_v63  ;;  %6233 = vmatprep.subr.mxu0 %v8341_v63 }
 0x87a   : > { %6167 = vmatpush3.msra.mxu1 %v5184_v50  ;;  %6234 = vmatpush3.msra.mxu0 %v5440_v33 }
 0x87b   : > { %6168 = vmatprep.subr.mxu1 %v8341_v63  ;;  %6235 = vmatprep.subr.mxu0 %v8341_v63 }
 0x87c   : > { %6169 = vmatpush3.msra.mxu1 %v5183_v58  ;;  %6236 = vmatpush3.msra.mxu0 %v5439_v23  ;;  %v5609_v23 = vld [vmem:[#allocation20 + $0x8] sm:$0xff] }
 0x87d   : > { %6170 = vmatprep.subr.mxu1 %v8341_v63  ;;  %6237 = vmatprep.subr.mxu0 %v8341_v63 }
 0x87e   : > { %6171 = vmatpush3.msra.mxu1 %v5182_v48  ;;  %6238 = vmatpush3.msra.mxu0 %v5438_v14  ;;  %v5608_v48 = vld [vmem:[#allocation20] sm:$0xff]  ;;  %v5533_v14 = vld [vmem:[#allocation19] sm:$0x1] }
 0x87f   : > { %6172 = vmatprep.subr.mxu1 %v8341_v63  ;;  %6239 = vmatprep.subr.mxu0 %v8341_v63 }
 0x880   : > { %6173 = vmatpush3.msra.mxu1 %v5181_v35  ;;  %6240 = vmatpush3.msra.mxu0 %v5437_v51 }
 0x881   : > { %6174 = vmatprep.subr.mxu1 %v8341_v63  ;;  %6241 = vmatprep.subr.mxu0 %v8341_v63 }
 0x882   : > { %6175 = vmatpush3.msra.mxu1 %v5180_v16  ;;  %6242 = vmatpush3.msra.mxu0 %v5436_v54  ;;  %v5619_v54 = vld [vmem:[#allocation22] sm:$0x1] }
 0x883   : > { %6176 = vmatprep.subr.mxu1 %v8341_v63  ;;  %6243 = vmatprep.subr.mxu0 %v8341_v63 }
 0x884   : > { %6177 = vmatpush3.msra.mxu1 %v5179_v44  ;;  %6244 = vmatpush3.msra.mxu0 %v5435_v53 }
 0x885   : > { %6179 = vmatmul.mubr.msk.f32.vlgmr.msra.gmra.mxu1 %vm2162_vm8, %v5189_v18  ;;  %6204 = vmatprep.subr.mxu1 %v8341_v63 }
 0x886   : > { %6245 = vmatprep.subr.mxu0 %v8341_v63  ;;  %6205 = vmatpush3.msra.mxu1 %v5358_v55 }
 0x887   : > { %6246 = vmatpush3.msra.mxu0 %v5434_v59  ;;  %6247 = vmatprep.mubr.msk.f32.mxu0 %vm6938_vm13, %v8341_v63 }
 0x888   : > { %6206 = vmatprep.subr.mxu1 %v8341_v63  ;;  %6248 = vmatmul.mubr.msk.f32.vlgmr.msra.gmra.mxu0 %vm2162_vm8, %v5444_v2 }
 0x889   : > { %6207 = vmatpush3.msra.mxu1 %v5357_v31  ;;  %6224 = vmatprep.mubr.msk.f32.mxu1 %vm6938_vm13, %v8341_v63 }
 0x88a   : > { %6208 = vmatprep.subr.mxu1 %v8341_v63  ;;  %6283 = vmatprep.subr.mxu0 %v8341_v63 }
 0x88b   : > { %6209 = vmatpush3.msra.mxu1 %v5356_v30  ;;  %6305 = vmatprep.mubr.msk.f32.mxu0 %vm6938_vm13, %v8341_v63 }
 0x88c   : > { %6210 = vmatprep.subr.mxu1 %v8341_v63  ;;  %6284 = vmatpush3.msk.msra.mxu0 %vm711_vm1, %v5618_v28 }
 0x88d   : > { %6211 = vmatpush3.msra.mxu1 %v5355_v34  ;;  %6285 = vmatprep.subr.mxu0 %v8341_v63 }
 0x88e   : > { %6212 = vmatprep.subr.mxu1 %v8341_v63  ;;  %6286 = vmatpush3.msra.mxu0 %v5617_v62 }
 0x88f   : > { %6213 = vmatpush3.msra.mxu1 %v5354_v39  ;;  %6287 = vmatprep.subr.mxu0 %v8341_v63 }
 0x890   : > { %6214 = vmatprep.subr.mxu1 %v8341_v63  ;;  %6288 = vmatpush3.msra.mxu0 %v5616_v56 }
 0x891   : > { %6215 = vmatpush3.msra.mxu1 %v5353_v0  ;;  %6289 = vmatprep.subr.mxu0 %v8341_v63 }
 0x892   : > { %6216 = vmatprep.subr.mxu1 %v8341_v63  ;;  %6290 = vmatpush3.msra.mxu0 %v5615_v57 }
 0x893   : > { %6217 = vmatpush3.msra.mxu1 %v5352_v24  ;;  %6291 = vmatprep.subr.mxu0 %v8341_v63 }
 0x894   : > { %6218 = vmatprep.subr.mxu1 %v8341_v63  ;;  %6292 = vmatpush3.msra.mxu0 %v5614_v3 }
 0x895   : > { %6219 = vmatpush3.msra.mxu1 %v5351_v19  ;;  %6293 = vmatprep.subr.mxu0 %v8341_v63 }
 0x896   : > { %6220 = vmatprep.subr.mxu1 %v8341_v63  ;;  %6294 = vmatpush3.msra.mxu0 %v5613_v10 }
 0x897   : > { %6221 = vmatpush3.msra.mxu1 %v5350_v13  ;;  %6295 = vmatprep.subr.mxu0 %v8341_v63 }
 0x898   : > { %6222 = vmatprep.subr.mxu1 %v8341_v63  ;;  %6296 = vmatpush3.msra.mxu0 %v5612_v21 }
 0x899   : > { %6223 = vmatpush3.msra.mxu1 %v5349_v42  ;;  %6297 = vmatprep.subr.mxu0 %v8341_v63 }
 0x89a   : > { %6225 = vmatmul.mubr.msk.f32.vlgmr.msra.gmra.mxu1 %vm2162_vm8, %v5359_v26  ;;  %6250 = vmatprep.subr.mxu1 %v8341_v63 }
 0x89b   : > { %6280 = vmatprep.mubr.msk.f32.mxu1 %vm6938_vm13, %v8341_v63  ;;  %6251 = vmatpush3.msra.mxu1 %v5532_v27 }
 0x89c   : > { %6252 = vmatprep.subr.mxu1 %v8341_v63  ;;  %6298 = vmatpush3.msra.mxu0 %v5611_v17 }
 0x89d   : > { %6253 = vmatpush3.msra.mxu1 %v5531_v7  ;;  %6299 = vmatprep.subr.mxu0 %v8341_v63 }
 0x89e   : > { %6254 = vmatprep.subr.mxu1 %v8341_v63  ;;  %6300 = vmatpush3.msra.mxu0 %v5610_v20 }
 0x89f   : > { %6255 = vmatpush3.msra.mxu1 %v5530_v43  ;;  %6301 = vmatprep.subr.mxu0 %v8341_v63 }
 0x8a0   : > { %6256 = vmatprep.subr.mxu1 %v8341_v63  ;;  %6302 = vmatpush3.msra.mxu0 %v5609_v23 }
 0x8a1   : > { %6257 = vmatpush3.msra.mxu1 %v5529_v52  ;;  %6303 = vmatprep.subr.mxu0 %v8341_v63 }
 0x8a2   : > { %6258 = vmatprep.subr.mxu1 %v8341_v63  ;;  %6304 = vmatpush3.msra.mxu0 %v5608_v48 }
 0x8a3   : > { %6259 = vmatpush3.msra.mxu1 %v5528_v15 }
 0x8a4   : > { %6260 = vmatprep.subr.mxu1 %v8341_v63 }
 0x8a5   : > { %6261 = vmatpush3.msra.mxu1 %v5527_v4 }
 0x8a6   : > { %6262 = vmatprep.subr.mxu1 %v8341_v63 }
 0x8a7   : > { %6263 = vmatpush3.msra.mxu1 %v5526_v60 }
 0x8a8   : > { %6264 = vmatprep.subr.mxu1 %v8341_v63 }
 0x8a9   : > { %6265 = vmatpush3.msra.mxu1 %v5525_v37 }
 0x8aa   : > { %6266 = vmatprep.subr.mxu1 %v8341_v63 }
 0x8ab   : > { %6267 = vmatpush3.msra.mxu1 %v5524_v61 }
 0x8ac   : > { %6268 = vmatprep.subr.mxu1 %v8341_v63 }
 0x8ad   : > { %6269 = vmatpush3.msra.mxu1 %v5523_v25 }
 0x8ae   : > { %6270 = vmatprep.subr.mxu1 %v8341_v63 }
 0x8af   : > { %6271 = vmatpush3.msra.mxu1 %v5522_v8 }
 0x8b0   : > { %6272 = vmatprep.subr.mxu1 %v8341_v63 }
 0x8b1   : > { %6273 = vmatpush3.msra.mxu1 %v5521_v47 }
 0x8b2   : > { %6274 = vmatprep.subr.mxu1 %v8341_v63 }
 0x8b3   : > { %6275 = vmatpush3.msra.mxu1 %v5520_v9 }
 0x8b4   : > { %6276 = vmatprep.subr.mxu1 %v8341_v63 }
 0x8b5   : > { %6277 = vmatpush3.msra.mxu1 %v5519_v41 }
 0x8b6   : > { %6278 = vmatprep.subr.mxu1 %v8341_v63 }
 0x8b7   : > { %6279 = vmatpush3.msra.mxu1 %v5518_v29 }
 0x931   : > { %v5173_v6 = vpop.f32.mrf.mxu1 }
 0x932   : > { %v5177_v49 = vadd.f32 %v5173_v6, %v5093_v36 }
 0x933   : > { %v6157_v40 = vpop.f32.mrf.mxu1  ;;  %v5343_v32 = vpop.f32.mrf.mxu0 }
 0x935   : > { %v6203_v22 = vpop.f32.mrf.mxu0 }
 0x945   : > { %v5258_v5 = vpop.f32.mrf.mxu1 }
 0x946   : > { %v5262_v38 = vadd.f32 %v5258_v5, %v5177_v49 }
 0x947   : > { %v6180_v45 = vpop.f32.mrf.mxu1 }
 0x948   : > { %v5513_v46 = vpop.f32.mrf.mxu0  ;;  %v5347_v1 = vadd.f32 %v5343_v32, %v5262_v38 }
 0x94a   : > { %v6249_v11 = vpop.f32.mrf.mxu0 }
 0x95a   : > { %v5428_v12 = vpop.f32.mrf.mxu1 }
 0x95b   : > { %v5432_v50 = vadd.f32 %v5428_v12, %v5347_v1 }
 0x95c   : > { %v6226_v33 = vpop.f32.mrf.mxu1 }
 0x95d   : > { %v5517_v58 = vadd.f32 %v5513_v46, %v5432_v50 }
 0x95f   : > { %6281 = vmatmul.mubr.msk.f32.vlgmr.msra.gmra.mxu1 %vm5534_vm14, %v5517_v58 }
 0xa1f   : > { %v5604_v35 = vpop.f32.mrf.mxu1 }
 0xa20   : > { %v5605_v51 = vadd.f32 %v5604_v35, %v5533_v14 }
 0xa21   : > { %v6282_v16 = vpop.f32.mrf.mxu1 }
 0xa22   : > { %6306 = vmatmul.mubr.msk.f32.vlgmr.msra.gmra.mxu0 %vm5620_vm15, %v5605_v51 }
 0xae2   : > { %v5693_v44 = vpop.f32.mrf.mxu0 }
 0xae3   : > { %v5694_v53 = vadd.f32 %v5693_v44, %v5619_v54 }
 0xae4   : > { %v6307_v63 = vpop.f32.mrf.mxu0 }
 0xae5   : > { %5697 = vst [vmem:[%s663_s26] sm:$0x1] %v5694_v53 }
 0xae6   : > { %6839 = shalt.err (!%p6836_p9)
}
 0xae7   : > { %s6840_s23 = scalar_lea.hbm %s8197_s17, 16  ;;  %s6844_s4 = scalar_lea.hbm %s8247_s15, 32 }
 0xae8   : > { %p6841_p2 = scmp.ne.s32.totalorder %s8197_s17, %s6840_s23  ;;  %p6845_p10 = scmp.lt.s32.totalorder %s8197_s17, %s8247_s15 }
 0xae9   : > { %p6846_p3 = scmp.lt.s32.totalorder %s6844_s4, %s6840_s23 }
 0xaea   : > { %p6842_p5 = pnand %p6841_p2, %p8342_p7 }
 0xaeb   : > { %p6847_p4 = por %p6846_p3, %p6845_p10 }
 0xaec   : > { %p6843_p6 = pneg %p6842_p5 }
 0xaee   : > { %p6848_p13 = pnand %p6847_p4, %p6843_p6 }
 0xaf0   : > { %6851 = shalt.err (!%p6848_p13)
}
 0xaf1   : > { %6360 = dma.vmem_to_hbm [thread:$0]  (%p8342_p7), %s5712_s20, 16, %s8197_s17, %s5699_s8  }
 0xaf2 PF: > { %s8343_s6 = sld [smem:[#allocation32_spill]]  ;;  %p6432_p8 = scmp.ge.s32.totalorder %s6914_s21, 2 }
 0xaf3   : > { %s8344_s26 = sld [smem:[#allocation36_spill]] }
 0xaf8   : > { %s5723_s2 = sand.u32 1, %s8343_s6  }
 0xaf9   : > { %p8345_p11 = scmp.ne.s32.totalorder %s8344_s26, 0  ;;  %s5724_s27 = scalar_lea.sflag [#allocation4], %s5723_s2 }
 0xafb   : > { %p6403_p12 = pnand %p6432_p8, %p8345_p11 }
 0xafd   : > { %p6404_p0 = pneg %p6403_p12 }
 0xaff   : > { %6897 = dma.done.wait (%p6404_p0), %s5724_s27, 16  }
 0xb00   : > { %6899 = vsyncadd (%p6404_p0), %s5724_s27, 4294967280  ;;  %s8346_s21 = sld [smem:[#allocation34_spill]]  ;;  %s8349_s18 = smov %s6906_s19 }
 0xb01   : > { %s8347_s1 = sld [smem:[#allocation33_spill]] }
 0xb02   : > { %s8348_s20 = sld [smem:[#allocation35_spill]] }
 0xb06   : > { %p32_p1 = scmp.ge.s32.totalorder %s8346_s21, 4  }
 0xb07   : > { %s8350_s19 = smov %s8347_s1 }
 0xb08   :  { %34 = sbr.rel (!%p32_p1) target bundleno = 16 (0x10), region = 204 }
 0xb0d   :  { %5728 = vsyncpa [#allocation3], 1 }
 0xb0e   :  { %5730 = vsyncpa [#allocation3 + $0x1], 1 }
 0xb0f   :  { %5731 = vsyncpa [#allocation6], 1 }
 0xb10   :  { %5732 = vsyncpa [#allocation9], 1 }
 0xb11   :  { %5733 = vsyncpa [#allocation12], 1 }
 0xb12   :  { %5734 = vsyncpa [#allocation15], 1 }
 0xb13   :  { %5735 = vsyncpa [#allocation18], 1 }
 0xb14   :  { %5736 = vsyncpa [#allocation21], 1 }
 0xb15   :  { %5737 = vsyncpa [#allocation4], 1 }
 0xb16   :  { %5739 = vsyncpa [#allocation4 + $0x1], 1 }

</bundles_post_ra>
